<compile_context>
chip_gen: v6e
topology: v6e:2x2x1
jax: 0.10.0
libtpu: 0.0.40
codegen_flags: <defaults>
</compile_context>

<pallas_src>
import functools

import jax
import jax.numpy as jnp
from jax import lax
from jax.experimental import pallas as pl
from jax.experimental.pallas import tpu as pltpu


# ------------------------------ small helpers --------------------------------

def _round_up(x, m):
    return (x + m - 1) // m * m


def _pad_last(a, target):
    pad = target - a.shape[-1]
    if pad == 0:
        return a
    widths = [(0, 0)] * (a.ndim - 1) + [(0, pad)]
    return jnp.pad(a, widths)


def _group_mat(C, num_groups):
    """(C, C) block-diagonal group-membership matrix (f32)."""
    cpg = C // num_groups
    g = jnp.arange(C) // cpg
    return (g[:, None] == g[None, :]).astype(jnp.float32)


# ------------------------------ kernel helpers --------------------------------

def _gn_silu(x, gamma, beta, grp_ref, cpg, eps, inv_count):
    """GroupNorm(affine) + SiLU on a full (HW, C) sample tile (f32 in/out)."""
    s = jnp.sum(x, axis=0, keepdims=True)                     # (1, C)
    ss = jnp.sum(x * x, axis=0, keepdims=True)                # (1, C)
    if cpg == 1:                                              # each channel = group
        gs, gss = s, ss
    else:
        # one tiny (2,C)@(C,C) dot: per-group sums broadcast back to channels
        red = jnp.dot(jnp.concatenate([s, ss], axis=0), grp_ref[...],
                      preferred_element_type=jnp.float32)     # (2, C)
        gs, gss = red[0:1], red[1:2]
    mean_c = gs * inv_count
    var_c = gss * inv_count - mean_c * mean_c                 # biased var (PyTorch GN)
    a = lax.rsqrt(var_c + eps) * gamma
    b = beta - mean_c * a
    y = x * a + b                                             # one FMA pass
    return y * jax.nn.sigmoid(y)                              # SiLU (EUP)


def _pack_shifted(y, W):
    """(HW, C) f32 -> (HW, 3C) bf16 operand [x-1 | x | x+1] with SAME-pad masks."""
    HW, _ = y.shape
    col = lax.broadcasted_iota(jnp.int32, (HW, 1), 0) % W
    left = jnp.where(col > 0, pltpu.roll(y, shift=1, axis=0), 0.0)
    right = jnp.where(col < W - 1, pltpu.roll(y, shift=HW - 1, axis=0), 0.0)
    return jnp.concatenate([left, y, right], axis=1).astype(jnp.bfloat16)


def _zero_halos(pad_ref, H, W):
    """Zero only the top/bottom halo row-blocks (interior is overwritten)."""
    HW = H * W
    zero = jnp.zeros((W, pad_ref.shape[1]), pad_ref.dtype)
    pad_ref[:W, :] = zero
    pad_ref[W + HW:, :] = zero


def _conv3x3_acc(pad_ref, w_ref, H, W):
    """3x3 SAME conv as 3 bf16 MXU dots with K = 3*Cin, f32 accumulator.

    pad_ref: bf16 scratch ((H+2)*W, 3*Cin), rows [W, W+HW) hold the packed
             operand, halo rows are zero.
    w_ref:   (3, 3*Cin, Cout_pad) bf16, row dy = conv_w[dy].reshape(3*Cin, Cout).
    """
    HW = H * W
    Cp = w_ref.shape[-1]
    acc = jnp.zeros((HW, Cp), jnp.float32)
    for dy in range(3):                                   # row offsets are 8-aligned
        win = pad_ref[dy * W:dy * W + HW, :]
        acc = acc + jnp.dot(win, w_ref[dy], preferred_element_type=jnp.float32)
    return acc


# ------------------------------ Pallas kernels --------------------------------

def gn_silu_conv_temb_kernel(x_ref, g_ref, b_ref, grp_ref, w_ref, tb_ref,
                             o_ref, pad_ref, *, H, W, cpg, eps, inv_count):
    """norm1 + SiLU + conv1(3x3, pad 1) + (time-emb proj + conv1 bias)."""
    HW = H * W
    _zero_halos(pad_ref, H, W)
    y = _gn_silu(x_ref[0].astype(jnp.float32), g_ref[...], b_ref[...],
                 grp_ref, cpg, eps, inv_count)
    pad_ref[W:W + HW, :] = _pack_shifted(y, W)
    acc = _conv3x3_acc(pad_ref, w_ref, H, W)
    o_ref[0] = (acc + tb_ref[0]).astype(o_ref.dtype)


def gn_silu_conv_res_kernel(h_ref, g_ref, b_ref, grp_ref, w_ref, b2_ref, x_ref,
                            *rest, C, H, W, cpg, eps, inv_count):
    """norm2 + SiLU + conv2(3x3) + bias(es) + fused shortcut (identity / 1x1)."""
    *sc, o_ref, pad_ref = rest
    HW = H * W
    _zero_halos(pad_ref, H, W)
    h = h_ref[0][:, :C].astype(jnp.float32)       # GN2 stats use real channels only
    y = _gn_silu(h, g_ref[...], b_ref[...], grp_ref, cpg, eps, inv_count)
    pad_ref[W:W + HW, :] = _pack_shifted(y, W)
    acc = _conv3x3_acc(pad_ref, w_ref, H, W)
    x = x_ref[0].astype(jnp.float32)
    if sc:  # conv_shortcut = 1x1 conv (kept in f32; tiny) fused here
        (scw_ref,) = sc
        res = jnp.dot(x, scw_ref[...], preferred_element_type=jnp.float32)
    else:   # identity shortcut (x pre-padded to Cout_pad in the wrapper)
        res = x
    o_ref[0] = (acc + b2_ref[...] + res).astype(o_ref.dtype)


# ---------------------------- pallas_call wrappers ----------------------------

def gn_silu_conv3_temb(x_flat, gamma, beta, conv_w, conv_b, temb, H, W,
                       num_groups=32, eps=1e-5):
    N, HW, Cin = x_flat.shape
    Cout = conv_w.shape[-1]
    Cp = _round_up(Cout, 128)                       # lane-dense output width
    cpg = Cin // num_groups
    grp = _group_mat(Cin, num_groups)
    w = _pad_last(conv_w.reshape(3, 3 * Cin, Cout), Cp).astype(jnp.bfloat16)
    tb = _pad_last(temb.astype(jnp.float32) + conv_b.astype(jnp.float32),
                   Cp).reshape(N, 1, Cp)            # temb + conv1 bias, folded
    kernel = functools.partial(gn_silu_conv_temb_kernel, H=H, W=W, cpg=cpg,
                               eps=eps, inv_count=1.0 / float(HW * cpg))
    return pl.pallas_call(
        kernel,
        out_shape=jax.ShapeDtypeStruct((N, HW, Cp), jnp.bfloat16),
        grid=(N,),
        in_specs=[
            pl.BlockSpec((1, HW, Cin), lambda n: (n, 0, 0)),
            pl.BlockSpec((1, Cin), lambda n: (0, 0)),
            pl.BlockSpec((1, Cin), lambda n: (0, 0)),
            pl.BlockSpec((Cin, Cin), lambda n: (0, 0)),
            pl.BlockSpec((3, 3 * Cin, Cp), lambda n: (0, 0, 0)),
            pl.BlockSpec((1, 1, Cp), lambda n: (n, 0, 0)),
        ],
        out_specs=pl.BlockSpec((1, HW, Cp), lambda n: (n, 0, 0)),
        scratch_shapes=[pltpu.VMEM(((H + 2) * W, 3 * Cin), jnp.bfloat16)],
        compiler_params=pltpu.CompilerParams(dimension_semantics=("parallel",)),
    )(x_flat, gamma.reshape(1, Cin), beta.reshape(1, Cin), grp, w, tb)


def gn_silu_conv3_res(h_pad, gamma, beta, conv_w, conv_b, x_flat, sc_w, sc_b,
                      H, W, out_dtype, num_groups=32, eps=1e-5):
    N, HW, Cp = h_pad.shape
    C = conv_w.shape[2]                             # real channels of h
    Cout = conv_w.shape[-1]
    Cin = x_flat.shape[-1]
    assert Cp == _round_up(Cout, 128)
    cpg = C // num_groups
    project = (Cin != Cout)
    grp = _group_mat(C, num_groups)
    w = _pad_last(conv_w.reshape(3, 3 * C, Cout), Cp).astype(jnp.bfloat16)
    bias2 = conv_b.astype(jnp.float32)
    if project:
        bias2 = bias2 + sc_b.astype(jnp.float32)    # fold shortcut bias
    bias2 = _pad_last(bias2, Cp).reshape(1, Cp)
    kernel = functools.partial(gn_silu_conv_res_kernel, C=C, H=H, W=W, cpg=cpg,
                               eps=eps, inv_count=1.0 / float(HW * cpg))
    in_specs = [
        pl.BlockSpec((1, HW, Cp), lambda n: (n, 0, 0)),
        pl.BlockSpec((1, C), lambda n: (0, 0)),
        pl.BlockSpec((1, C), lambda n: (0, 0)),
        pl.BlockSpec((C, C), lambda n: (0, 0)),
        pl.BlockSpec((3, 3 * C, Cp), lambda n: (0, 0, 0)),
        pl.BlockSpec((1, Cp), lambda n: (0, 0)),
    ]
    args = [h_pad, gamma.reshape(1, C), beta.reshape(1, C), grp, w, bias2]
    if project:
        in_specs += [pl.BlockSpec((1, HW, Cin), lambda n: (n, 0, 0)),
                     pl.BlockSpec((Cin, Cp), lambda n: (0, 0))]
        args += [x_flat, _pad_last(sc_w.astype(jnp.float32), Cp)]
    else:
        in_specs += [pl.BlockSpec((1, HW, Cp), lambda n: (n, 0, 0))]
        args += [_pad_last(x_flat, Cp)]
    return pl.pallas_call(
        kernel,
        out_shape=jax.ShapeDtypeStruct((N, HW, Cp), out_dtype),
        grid=(N,),
        in_specs=in_specs,
        out_specs=pl.BlockSpec((1, HW, Cp), lambda n: (n, 0, 0)),
        scratch_shapes=[pltpu.VMEM(((H + 2) * W, 3 * C), jnp.bfloat16)],
        compiler_params=pltpu.CompilerParams(dimension_semantics=("parallel",)),
    )(*args)


# --------------------------------- forward ------------------------------------

def resblock_forward(x, t_emb, params, num_groups=32, eps=1e-5):
    """ResBlock forward.  x: (N, H, W, Cin) NHWC, t_emb: (N, T)."""
    N, H, W, Cin = x.shape
    Cout = params["conv1_w"].shape[-1]
    x_flat = x.reshape(N, H * W, Cin)

    # time_emb_proj(SiLU(t_emb)) — tiny, plain JAX (fused by XLA; no launch)
    t = t_emb.astype(jnp.float32)
    t = t * jax.nn.sigmoid(t)
    t_hidden = (jnp.matmul(t, params["time_w"], precision=lax.Precision.HIGHEST)
                + params["time_b"])                                      # (N, Cout)

    # norm1 + SiLU + conv1 + (temb + bias)  -> bf16, lane-dense (Cp=128)
    h = gn_silu_conv3_temb(x_flat, params["gn1_g"], params["gn1_b"],
                           params["conv1_w"], params["conv1_b"],
                           t_hidden, H, W, num_groups, eps)

    # norm2 + SiLU + (dropout p=0 -> identity) + conv2 + biases + shortcut
    out = gn_silu_conv3_res(h, params["gn2_g"], params["gn2_b"],
                            params["conv2_w"], params["conv2_b"],
                            x_flat, params.get("sc_w"), params.get("sc_b"),
                            H, W, x.dtype, num_groups, eps)              # (N, HW, Cp)
    return out[:, :, :Cout].reshape(N, H, W, Cout)


# ------------------------------ pure-JAX reference -----------------------------

def ref_resblock(x, t_emb, params, num_groups=32, eps=1e-5):
    def gn(v, g, b):
        N, H, W, C = v.shape
        cpg = C // num_groups
        vr = v.reshape(N, H, W, num_groups, cpg)
        mean = vr.mean(axis=(1, 2, 4), keepdims=True)
        var = ((vr - mean) ** 2).mean(axis=(1, 2, 4), keepdims=True)
        vr = (vr - mean) / jnp.sqrt(var + eps)
        return vr.reshape(N, H, W, C) * g + b

    silu = lambda v: v * jax.nn.sigmoid(v)

    def conv3(v, w, b):
        return lax.conv_general_dilated(
            v, w, (1, 1), "SAME",
            dimension_numbers=("NHWC", "HWIO", "NHWC"),
            precision=lax.Precision.HIGHEST) + b

    h = conv3(silu(gn(x, params["gn1_g"], params["gn1_b"])),
              params["conv1_w"], params["conv1_b"])
    th = jnp.matmul(silu(t_emb), params["time_w"],
                    precision=lax.Precision.HIGHEST) + params["time_b"]
    h = h + th[:, None, None, :]
    h = conv3(silu(gn(h, params["gn2_g"], params["gn2_b"])),
              params["conv2_w"], params["conv2_b"])
    Cin, Cout = x.shape[-1], params["conv1_w"].shape[-1]
    if Cin == Cout:
        sc = x
    else:
        sc = jnp.einsum("nhwc,cd->nhwd", x, params["sc_w"],
                        precision=lax.Precision.HIGHEST) + params["sc_b"]
    return h + sc


# ----------------------------------- main --------------------------------------

if __name__ == "__main__":
    key = jax.random.PRNGKey(0)
    N, H, W = 2, 16, 16
    Cin, Cout, T = 32, 64, 64          # GroupNorm(32) requires channels % 32 == 0

    ks = jax.random.split(key, 14)
    x = jax.random.normal(ks[0], (N, H, W, Cin), jnp.float32)
    t_emb = jax.random.normal(ks[1], (N, T), jnp.float32)

    params = dict(
        gn1_g=1.0 + 0.1 * jax.random.normal(ks[2], (Cin,), jnp.float32),
        gn1_b=0.1 * jax.random.normal(ks[3], (Cin,), jnp.float32),
        conv1_w=0.05 * jax.random.normal(ks[4], (3, 3, Cin, Cout), jnp.float32),
        conv1_b=0.02 * jax.random.normal(ks[5], (Cout,), jnp.float32),
        time_w=0.05 * jax.random.normal(ks[6], (T, Cout), jnp.float32),
        time_b=0.02 * jax.random.normal(ks[7], (Cout,), jnp.float32),
        gn2_g=1.0 + 0.1 * jax.random.normal(ks[8], (Cout,), jnp.float32),
        gn2_b=0.1 * jax.random.normal(ks[9], (Cout,), jnp.float32),
        conv2_w=0.05 * jax.random.normal(ks[10], (3, 3, Cout, Cout), jnp.float32),
        conv2_b=0.02 * jax.random.normal(ks[11], (Cout,), jnp.float32),
        sc_w=0.1 * jax.random.normal(ks[12], (Cin, Cout), jnp.float32),
        sc_b=0.02 * jax.random.normal(ks[13], (Cout,), jnp.float32),
    )

    fwd = jax.jit(resblock_forward)
    out = jax.block_until_ready(fwd(x, t_emb, params))
    ref = ref_resblock(x, t_emb, params)

    assert out.shape == (N, H, W, Cout), out.shape
    max_err = float(jnp.max(jnp.abs(out - ref)))
    # bf16 MXU operands + bf16 intermediate h with f32 accumulation/stats
    assert max_err < 5e-2, f"max abs err {max_err}"
    print("KERNEL_OK")
</pallas_src>

<mosaic_0001>
module attributes {stable_mosaic.version = 11 : i64} {
  func.func @gn_silu_conv_temb_kernel(%arg0: i32, %arg1: memref<1x256x32xf32, #tpu.memory_space<vmem>>, %arg2: memref<1x32xf32, #tpu.memory_space<vmem>>, %arg3: memref<1x32xf32, #tpu.memory_space<vmem>>, %arg4: memref<32x32xf32, #tpu.memory_space<vmem>>, %arg5: memref<3x96x128xbf16, #tpu.memory_space<vmem>>, %arg6: memref<1x1x128xf32, #tpu.memory_space<vmem>>, %arg7: memref<1x256x128xbf16, #tpu.memory_space<vmem>>, %arg8: memref<288x96xbf16, #tpu.memory_space<vmem>>) attributes {dimension_semantics = [#tpu.dimension_semantics<parallel>], iteration_bounds = array<i64: 2>, scalar_prefetch = 0 : i64, scratch_operands = 1 : i64, tpu.core_type = #tpu.core_type<tc>, window_params = [{transform_indices = @transform_0, window_bounds = array<i64: 1, 256, 32>}, {pipeline_mode = #tpu.pipeline_mode<synchronous>, transform_indices = @transform_1, window_bounds = array<i64: 1, 32>}, {pipeline_mode = #tpu.pipeline_mode<synchronous>, transform_indices = @transform_2, window_bounds = array<i64: 1, 32>}, {pipeline_mode = #tpu.pipeline_mode<synchronous>, transform_indices = @transform_3, window_bounds = array<i64: 32, 32>}, {pipeline_mode = #tpu.pipeline_mode<synchronous>, transform_indices = @transform_4, window_bounds = array<i64: 3, 96, 128>}, {transform_indices = @transform_5, window_bounds = array<i64: 1, 1, 128>}, {transform_indices = @transform_6, window_bounds = array<i64: 1, 256, 128>}]} {
    %cst = arith.constant 0.000000e+00 : bf16
    %0 = vector.broadcast %cst : bf16 to vector<16x96xbf16>
    %c0 = arith.constant 0 : index
    %c0_0 = arith.constant 0 : index
    %1 = vector.load %arg8[%c0, %c0_0] : memref<288x96xbf16, #tpu.memory_space<vmem>>, vector<16x96xbf16>
    tpu.vector_store %arg8[%c0, %c0_0], %0 {strides = array<i32>} : memref<288x96xbf16, #tpu.memory_space<vmem>>, vector<16x96xbf16>,
    %c272 = arith.constant 272 : index
    %c0_1 = arith.constant 0 : index
    %2 = vector.load %arg8[%c272, %c0_1] : memref<288x96xbf16, #tpu.memory_space<vmem>>, vector<16x96xbf16>
    tpu.vector_store %arg8[%c272, %c0_1], %0 {strides = array<i32>} : memref<288x96xbf16, #tpu.memory_space<vmem>>, vector<16x96xbf16>,
    %c0_2 = arith.constant 0 : index
    %c0_3 = arith.constant 0 : index
    %c0_4 = arith.constant 0 : index
    %3 = vector.load %arg1[%c0_2, %c0_3, %c0_4] : memref<1x256x32xf32, #tpu.memory_space<vmem>>, vector<1x256x32xf32>
    %4 = vector.shape_cast %3 : vector<1x256x32xf32> to vector<256x32xf32>
    %c0_5 = arith.constant 0 : index
    %c0_6 = arith.constant 0 : index
    %5 = vector.load %arg2[%c0_5, %c0_6] : memref<1x32xf32, #tpu.memory_space<vmem>>, vector<1x32xf32>
    %c0_7 = arith.constant 0 : index
    %c0_8 = arith.constant 0 : index
    %6 = vector.load %arg3[%c0_7, %c0_8] : memref<1x32xf32, #tpu.memory_space<vmem>>, vector<1x32xf32>
    %cst_9 = arith.constant dense<0.000000e+00> : vector<32xf32>
    %7 = vector.multi_reduction <add>, %4, %cst_9 [0] : vector<256x32xf32> to vector<32xf32>
    %8 = vector.shape_cast %7 : vector<32xf32> to vector<1x32xf32>
    %9 = arith.mulf %4, %4 : vector<256x32xf32>
    %cst_10 = arith.constant dense<0.000000e+00> : vector<32xf32>
    %10 = vector.multi_reduction <add>, %9, %cst_10 [0] : vector<256x32xf32> to vector<32xf32>
    %11 = vector.shape_cast %10 : vector<32xf32> to vector<1x32xf32>
    %cst_11 = arith.constant 3.906250e-03 : f32
    %12 = vector.broadcast %cst_11 : f32 to vector<1x32xf32>
    %13 = arith.mulf %8, %12 : vector<1x32xf32>
    %cst_12 = arith.constant 3.906250e-03 : f32
    %14 = vector.broadcast %cst_12 : f32 to vector<1x32xf32>
    %15 = arith.mulf %11, %14 : vector<1x32xf32>
    %16 = arith.mulf %13, %13 : vector<1x32xf32>
    %17 = arith.subf %15, %16 : vector<1x32xf32>
    %cst_13 = arith.constant 9.99999974E-6 : f32
    %18 = vector.broadcast %cst_13 : f32 to vector<1x32xf32>
    %19 = arith.addf %17, %18 : vector<1x32xf32>
    %20 = math.rsqrt %19 : vector<1x32xf32>
    %21 = arith.mulf %20, %5 : vector<1x32xf32>
    %22 = arith.mulf %13, %21 : vector<1x32xf32>
    %23 = arith.subf %6, %22 : vector<1x32xf32>
    %24 = vector.broadcast %21 : vector<1x32xf32> to vector<256x32xf32>
    %25 = arith.mulf %4, %24 : vector<256x32xf32>
    %26 = vector.broadcast %23 : vector<1x32xf32> to vector<256x32xf32>
    %27 = arith.addf %25, %26 : vector<256x32xf32>
    %28 = arith.negf %27 : vector<256x32xf32>
    %29 = math.exp %28 : vector<256x32xf32>
    %cst_14 = arith.constant 1.000000e+00 : f32
    %30 = vector.broadcast %cst_14 : f32 to vector<256x32xf32>
    %31 = arith.addf %30, %29 : vector<256x32xf32>
    %32 = arith.divf %30, %31 : vector<256x32xf32>
    %33 = arith.mulf %27, %32 : vector<256x32xf32>
    %34 = tpu.iota {dimensions = array<i32: 0>} : vector<256x1xi32>
    %c16_i32 = arith.constant 16 : i32
    %c0_i32 = arith.constant 0 : i32
    %35 = arith.cmpi eq, %c16_i32, %c0_i32 : i32
    %c1_i32 = arith.constant 1 : i32
    %36 = arith.select %35, %c1_i32, %c16_i32 : i32
    %37 = vector.broadcast %36 : i32 to vector<256x1xi32>
    %38 = arith.remsi %34, %37 : vector<256x1xi32>
    %c0_i32_15 = arith.constant 0 : i32
    %39 = vector.broadcast %c0_i32_15 : i32 to vector<256x1xi32>
    %40 = arith.cmpi ne, %38, %39 : vector<256x1xi32>
    %c0_i32_16 = arith.constant 0 : i32
    %41 = vector.broadcast %c0_i32_16 : i32 to vector<256x1xi32>
    %42 = arith.cmpi slt, %38, %41 : vector<256x1xi32>
    %c0_i32_17 = arith.constant 0 : i32
    %43 = arith.cmpi slt, %36, %c0_i32_17 : i32
    %44 = vector.broadcast %43 : i1 to vector<256x1xi1>
    %45 = vector.broadcast %44 : vector<256x1xi1> to vector<256x1xi1>
    %46 = arith.xori %42, %45 : vector<256x1xi1>
    %47 = arith.andi %46, %40 : vector<256x1xi1>
    %48 = vector.broadcast %36 : i32 to vector<256x1xi32>
    %49 = arith.addi %38, %48 : vector<256x1xi32>
    %50 = arith.select %47, %49, %38 : vector<256x1xi1>, vector<256x1xi32>
    %c0_i32_18 = arith.constant 0 : i32
    %51 = vector.broadcast %c0_i32_18 : i32 to vector<256x1xi32>
    %52 = arith.cmpi sgt, %50, %51 : vector<256x1xi32>
    %c1_i32_19 = arith.constant 1 : i32
    %53 = tpu.dynamic_rotate %33 by %c1_i32_19 dim 0 : vector<256x32xf32>, i32 -> vector<256x32xf32>
    %cst_20 = arith.constant 0.000000e+00 : f32
    %54 = vector.shape_cast %52 : vector<256x1xi1> to vector<256x1xi1>
    %55 = vector.broadcast %54 : vector<256x1xi1> to vector<256x32xi1>
    %56 = vector.broadcast %cst_20 : f32 to vector<256x32xf32>
    %57 = arith.select %55, %53, %56 : vector<256x32xi1>, vector<256x32xf32>
    %c15_i32 = arith.constant 15 : i32
    %58 = vector.broadcast %c15_i32 : i32 to vector<256x1xi32>
    %59 = arith.cmpi slt, %50, %58 : vector<256x1xi32>
    %c255_i32 = arith.constant 255 : i32
    %60 = tpu.dynamic_rotate %33 by %c255_i32 dim 0 : vector<256x32xf32>, i32 -> vector<256x32xf32>
    %cst_21 = arith.constant 0.000000e+00 : f32
    %61 = vector.shape_cast %59 : vector<256x1xi1> to vector<256x1xi1>
    %62 = vector.broadcast %61 : vector<256x1xi1> to vector<256x32xi1>
    %63 = vector.broadcast %cst_21 : f32 to vector<256x32xf32>
    %64 = arith.select %62, %60, %63 : vector<256x32xi1>, vector<256x32xf32>
    %65 = tpu.concatenate %57, %33, %64 in 1 : vector<256x32xf32>, vector<256x32xf32>, vector<256x32xf32> -> vector<256x96xf32>
    %66 = arith.truncf %65 : vector<256x96xf32> to vector<256x96xbf16>
    %c16 = arith.constant 16 : index
    %c0_22 = arith.constant 0 : index
    %67 = vector.load %arg8[%c16, %c0_22] : memref<288x96xbf16, #tpu.memory_space<vmem>>, vector<256x96xbf16>
    tpu.vector_store %arg8[%c16, %c0_22], %66 {strides = array<i32>} : memref<288x96xbf16, #tpu.memory_space<vmem>>, vector<256x96xbf16>,
    %cst_23 = arith.constant 0.000000e+00 : f32
    %68 = vector.broadcast %cst_23 : f32 to vector<256x128xf32>
    %c0_24 = arith.constant 0 : index
    %c0_25 = arith.constant 0 : index
    %69 = vector.load %arg8[%c0_24, %c0_25] : memref<288x96xbf16, #tpu.memory_space<vmem>>, vector<256x96xbf16>
    %c0_26 = arith.constant 0 : index
    %c0_27 = arith.constant 0 : index
    %c0_28 = arith.constant 0 : index
    %70 = vector.load %arg5[%c0_26, %c0_27, %c0_28] : memref<3x96x128xbf16, #tpu.memory_space<vmem>>, vector<1x96x128xbf16>
    %71 = vector.shape_cast %70 : vector<1x96x128xbf16> to vector<96x128xbf16>
    %cst_29 = arith.constant dense<0.000000e+00> : vector<256x128xf32>
    %72 = tpu.matmul %69, %71, %cst_29 {dimension_numbers = #tpu.dot_dimension_numbers<[1], [0], [0], [1], [0, 0, 1, 1], [], []>} : vector<256x96xbf16>, vector<96x128xbf16>, vector<256x128xf32> -> vector<256x128xf32>
    %73 = arith.addf %68, %72 : vector<256x128xf32>
    %c16_30 = arith.constant 16 : index
    %c0_31 = arith.constant 0 : index
    %74 = vector.load %arg8[%c16_30, %c0_31] : memref<288x96xbf16, #tpu.memory_space<vmem>>, vector<256x96xbf16>
    %c1 = arith.constant 1 : index
    %c0_32 = arith.constant 0 : index
    %c0_33 = arith.constant 0 : index
    %75 = vector.load %arg5[%c1, %c0_32, %c0_33] : memref<3x96x128xbf16, #tpu.memory_space<vmem>>, vector<1x96x128xbf16>
    %76 = vector.shape_cast %75 : vector<1x96x128xbf16> to vector<96x128xbf16>
    %cst_34 = arith.constant dense<0.000000e+00> : vector<256x128xf32>
    %77 = tpu.matmul %74, %76, %cst_34 {dimension_numbers = #tpu.dot_dimension_numbers<[1], [0], [0], [1], [0, 0, 1, 1], [], []>} : vector<256x96xbf16>, vector<96x128xbf16>, vector<256x128xf32> -> vector<256x128xf32>
    %78 = arith.addf %73, %77 : vector<256x128xf32>
    %c32 = arith.constant 32 : index
    %c0_35 = arith.constant 0 : index
    %79 = vector.load %arg8[%c32, %c0_35] : memref<288x96xbf16, #tpu.memory_space<vmem>>, vector<256x96xbf16>
    %c2 = arith.constant 2 : index
    %c0_36 = arith.constant 0 : index
    %c0_37 = arith.constant 0 : index
    %80 = vector.load %arg5[%c2, %c0_36, %c0_37] : memref<3x96x128xbf16, #tpu.memory_space<vmem>>, vector<1x96x128xbf16>
    %81 = vector.shape_cast %80 : vector<1x96x128xbf16> to vector<96x128xbf16>
    %cst_38 = arith.constant dense<0.000000e+00> : vector<256x128xf32>
    %82 = tpu.matmul %79, %81, %cst_38 {dimension_numbers = #tpu.dot_dimension_numbers<[1], [0], [0], [1], [0, 0, 1, 1], [], []>} : vector<256x96xbf16>, vector<96x128xbf16>, vector<256x128xf32> -> vector<256x128xf32>
    %83 = arith.addf %78, %82 : vector<256x128xf32>
    %c0_39 = arith.constant 0 : index
    %c0_40 = arith.constant 0 : index
    %c0_41 = arith.constant 0 : index
    %84 = vector.load %arg6[%c0_39, %c0_40, %c0_41] : memref<1x1x128xf32, #tpu.memory_space<vmem>>, vector<1x1x128xf32>
    %85 = vector.shape_cast %84 : vector<1x1x128xf32> to vector<1x128xf32>
    %86 = vector.broadcast %85 : vector<1x128xf32> to vector<256x128xf32>
    %87 = arith.addf %83, %86 : vector<256x128xf32>
    %88 = arith.truncf %87 : vector<256x128xf32> to vector<256x128xbf16>
    %c0_42 = arith.constant 0 : index
    %c0_43 = arith.constant 0 : index
    %c0_44 = arith.constant 0 : index
    %89 = vector.load %arg7[%c0_42, %c0_43, %c0_44] : memref<1x256x128xbf16, #tpu.memory_space<vmem>>, vector<1x256x128xbf16>
    %90 = vector.shape_cast %89 : vector<1x256x128xbf16> to vector<256x128xbf16>
    %91 = vector.shape_cast %88 : vector<256x128xbf16> to vector<1x256x128xbf16>
    tpu.vector_store %arg7[%c0_42, %c0_43, %c0_44], %91 {strides = array<i32>} : memref<1x256x128xbf16, #tpu.memory_space<vmem>>, vector<1x256x128xbf16>,
    return
  }
  func.func @transform_0(%arg0: i32) -> (i32, i32, i32) {
    %c0_i32 = arith.constant 0 : i32
    %c0_i32_0 = arith.constant 0 : i32
    %c0_i32_1 = arith.constant 0 : i32
    return %arg0, %c0_i32, %c0_i32_0 : i32, i32, i32
  }
  func.func @transform_1(%arg0: i32) -> (i32, i32) {
    %c0_i32 = arith.constant 0 : i32
    %c0_i32_0 = arith.constant 0 : i32
    %c0_i32_1 = arith.constant 0 : i32
    return %c0_i32, %c0_i32_0 : i32, i32
  }
  func.func @transform_2(%arg0: i32) -> (i32, i32) {
    %c0_i32 = arith.constant 0 : i32
    %c0_i32_0 = arith.constant 0 : i32
    %c0_i32_1 = arith.constant 0 : i32
    return %c0_i32, %c0_i32_0 : i32, i32
  }
  func.func @transform_3(%arg0: i32) -> (i32, i32) {
    %c0_i32 = arith.constant 0 : i32
    %c0_i32_0 = arith.constant 0 : i32
    %c0_i32_1 = arith.constant 0 : i32
    return %c0_i32, %c0_i32_0 : i32, i32
  }
  func.func @transform_4(%arg0: i32) -> (i32, i32, i32) {
    %c0_i32 = arith.constant 0 : i32
    %c0_i32_0 = arith.constant 0 : i32
    %c0_i32_1 = arith.constant 0 : i32
    %c0_i32_2 = arith.constant 0 : i32
    return %c0_i32, %c0_i32_0, %c0_i32_1 : i32, i32, i32
  }
  func.func @transform_5(%arg0: i32) -> (i32, i32, i32) {
    %c0_i32 = arith.constant 0 : i32
    %c0_i32_0 = arith.constant 0 : i32
    %c0_i32_1 = arith.constant 0 : i32
    return %arg0, %c0_i32, %c0_i32_0 : i32, i32, i32
  }
  func.func @transform_6(%arg0: i32) -> (i32, i32, i32) {
    %c0_i32 = arith.constant 0 : i32
    %c0_i32_0 = arith.constant 0 : i32
    %c0_i32_1 = arith.constant 0 : i32
    return %arg0, %c0_i32, %c0_i32_0 : i32, i32, i32
  }
}

module attributes {stable_mosaic.version = 11 : i64} {
  func.func @gn_silu_conv_res_kernel(%arg0: i32, %arg1: memref<1x256x128xbf16, #tpu.memory_space<vmem>>, %arg2: memref<1x64xf32, #tpu.memory_space<vmem>>, %arg3: memref<1x64xf32, #tpu.memory_space<vmem>>, %arg4: memref<64x64xf32, #tpu.memory_space<vmem>>, %arg5: memref<3x192x128xbf16, #tpu.memory_space<vmem>>, %arg6: memref<1x128xf32, #tpu.memory_space<vmem>>, %arg7: memref<1x256x32xf32, #tpu.memory_space<vmem>>, %arg8: memref<32x128xf32, #tpu.memory_space<vmem>>, %arg9: memref<1x256x128xf32, #tpu.memory_space<vmem>>, %arg10: memref<288x192xbf16, #tpu.memory_space<vmem>>) attributes {dimension_semantics = [#tpu.dimension_semantics<parallel>], iteration_bounds = array<i64: 2>, scalar_prefetch = 0 : i64, scratch_operands = 1 : i64, tpu.core_type = #tpu.core_type<tc>, window_params = [{transform_indices = @transform_0, window_bounds = array<i64: 1, 256, 128>}, {pipeline_mode = #tpu.pipeline_mode<synchronous>, transform_indices = @transform_1, window_bounds = array<i64: 1, 64>}, {pipeline_mode = #tpu.pipeline_mode<synchronous>, transform_indices = @transform_2, window_bounds = array<i64: 1, 64>}, {pipeline_mode = #tpu.pipeline_mode<synchronous>, transform_indices = @transform_3, window_bounds = array<i64: 64, 64>}, {pipeline_mode = #tpu.pipeline_mode<synchronous>, transform_indices = @transform_4, window_bounds = array<i64: 3, 192, 128>}, {pipeline_mode = #tpu.pipeline_mode<synchronous>, transform_indices = @transform_5, window_bounds = array<i64: 1, 128>}, {transform_indices = @transform_6, window_bounds = array<i64: 1, 256, 32>}, {pipeline_mode = #tpu.pipeline_mode<synchronous>, transform_indices = @transform_7, window_bounds = array<i64: 32, 128>}, {transform_indices = @transform_8, window_bounds = array<i64: 1, 256, 128>}]} {
    %cst = arith.constant 0.000000e+00 : bf16
    %0 = vector.broadcast %cst : bf16 to vector<16x192xbf16>
    %c0 = arith.constant 0 : index
    %c0_0 = arith.constant 0 : index
    %1 = vector.load %arg10[%c0, %c0_0] : memref<288x192xbf16, #tpu.memory_space<vmem>>, vector<16x192xbf16>
    tpu.vector_store %arg10[%c0, %c0_0], %0 {strides = array<i32>} : memref<288x192xbf16, #tpu.memory_space<vmem>>, vector<16x192xbf16>,
    %c272 = arith.constant 272 : index
    %c0_1 = arith.constant 0 : index
    %2 = vector.load %arg10[%c272, %c0_1] : memref<288x192xbf16, #tpu.memory_space<vmem>>, vector<16x192xbf16>
    tpu.vector_store %arg10[%c272, %c0_1], %0 {strides = array<i32>} : memref<288x192xbf16, #tpu.memory_space<vmem>>, vector<16x192xbf16>,
    %c0_2 = arith.constant 0 : index
    %c0_3 = arith.constant 0 : index
    %c0_4 = arith.constant 0 : index
    %3 = vector.load %arg1[%c0_2, %c0_3, %c0_4] : memref<1x256x128xbf16, #tpu.memory_space<vmem>>, vector<1x256x128xbf16>
    %4 = vector.shape_cast %3 : vector<1x256x128xbf16> to vector<256x128xbf16>
    %5 = vector.extract_strided_slice %4 {offsets = [0, 0], sizes = [256, 64], strides = [1, 1]} : vector<256x128xbf16> to vector<256x64xbf16>
    %6 = arith.extf %5 : vector<256x64xbf16> to vector<256x64xf32>
    %c0_5 = arith.constant 0 : index
    %c0_6 = arith.constant 0 : index
    %7 = vector.load %arg2[%c0_5, %c0_6] : memref<1x64xf32, #tpu.memory_space<vmem>>, vector<1x64xf32>
    %c0_7 = arith.constant 0 : index
    %c0_8 = arith.constant 0 : index
    %8 = vector.load %arg3[%c0_7, %c0_8] : memref<1x64xf32, #tpu.memory_space<vmem>>, vector<1x64xf32>
    %cst_9 = arith.constant dense<0.000000e+00> : vector<64xf32>
    %9 = vector.multi_reduction <add>, %6, %cst_9 [0] : vector<256x64xf32> to vector<64xf32>
    %10 = vector.shape_cast %9 : vector<64xf32> to vector<1x64xf32>
    %11 = arith.mulf %6, %6 : vector<256x64xf32>
    %cst_10 = arith.constant dense<0.000000e+00> : vector<64xf32>
    %12 = vector.multi_reduction <add>, %11, %cst_10 [0] : vector<256x64xf32> to vector<64xf32>
    %13 = vector.shape_cast %12 : vector<64xf32> to vector<1x64xf32>
    %14 = tpu.concatenate %10, %13 in 0 : vector<1x64xf32>, vector<1x64xf32> -> vector<2x64xf32>
    %c0_11 = arith.constant 0 : index
    %c0_12 = arith.constant 0 : index
    %15 = vector.load %arg4[%c0_11, %c0_12] : memref<64x64xf32, #tpu.memory_space<vmem>>, vector<64x64xf32>
    %cst_13 = arith.constant dense<0.000000e+00> : vector<2x64xf32>
    %16 = tpu.matmul %14, %15, %cst_13 {dimension_numbers = #tpu.dot_dimension_numbers<[1], [0], [0], [1], [0, 0, 1, 1], [], []>} : vector<2x64xf32>, vector<64x64xf32>, vector<2x64xf32> -> vector<2x64xf32>
    %17 = vector.extract_strided_slice %16 {offsets = [0, 0], sizes = [1, 64], strides = [1, 1]} : vector<2x64xf32> to vector<1x64xf32>
    %18 = vector.extract_strided_slice %16 {offsets = [1, 0], sizes = [1, 64], strides = [1, 1]} : vector<2x64xf32> to vector<1x64xf32>
    %cst_14 = arith.constant 0.001953125 : f32
    %19 = vector.broadcast %cst_14 : f32 to vector<1x64xf32>
    %20 = arith.mulf %17, %19 : vector<1x64xf32>
    %cst_15 = arith.constant 0.001953125 : f32
    %21 = vector.broadcast %cst_15 : f32 to vector<1x64xf32>
    %22 = arith.mulf %18, %21 : vector<1x64xf32>
    %23 = arith.mulf %20, %20 : vector<1x64xf32>
    %24 = arith.subf %22, %23 : vector<1x64xf32>
    %cst_16 = arith.constant 9.99999974E-6 : f32
    %25 = vector.broadcast %cst_16 : f32 to vector<1x64xf32>
    %26 = arith.addf %24, %25 : vector<1x64xf32>
    %27 = math.rsqrt %26 : vector<1x64xf32>
    %28 = arith.mulf %27, %7 : vector<1x64xf32>
    %29 = arith.mulf %20, %28 : vector<1x64xf32>
    %30 = arith.subf %8, %29 : vector<1x64xf32>
    %31 = vector.broadcast %28 : vector<1x64xf32> to vector<256x64xf32>
    %32 = arith.mulf %6, %31 : vector<256x64xf32>
    %33 = vector.broadcast %30 : vector<1x64xf32> to vector<256x64xf32>
    %34 = arith.addf %32, %33 : vector<256x64xf32>
    %35 = arith.negf %34 : vector<256x64xf32>
    %36 = math.exp %35 : vector<256x64xf32>
    %cst_17 = arith.constant 1.000000e+00 : f32
    %37 = vector.broadcast %cst_17 : f32 to vector<256x64xf32>
    %38 = arith.addf %37, %36 : vector<256x64xf32>
    %39 = arith.divf %37, %38 : vector<256x64xf32>
    %40 = arith.mulf %34, %39 : vector<256x64xf32>
    %41 = tpu.iota {dimensions = array<i32: 0>} : vector<256x1xi32>
    %c16_i32 = arith.constant 16 : i32
    %c0_i32 = arith.constant 0 : i32
    %42 = arith.cmpi eq, %c16_i32, %c0_i32 : i32
    %c1_i32 = arith.constant 1 : i32
    %43 = arith.select %42, %c1_i32, %c16_i32 : i32
    %44 = vector.broadcast %43 : i32 to vector<256x1xi32>
    %45 = arith.remsi %41, %44 : vector<256x1xi32>
    %c0_i32_18 = arith.constant 0 : i32
    %46 = vector.broadcast %c0_i32_18 : i32 to vector<256x1xi32>
    %47 = arith.cmpi ne, %45, %46 : vector<256x1xi32>
    %c0_i32_19 = arith.constant 0 : i32
    %48 = vector.broadcast %c0_i32_19 : i32 to vector<256x1xi32>
    %49 = arith.cmpi slt, %45, %48 : vector<256x1xi32>
    %c0_i32_20 = arith.constant 0 : i32
    %50 = arith.cmpi slt, %43, %c0_i32_20 : i32
    %51 = vector.broadcast %50 : i1 to vector<256x1xi1>
    %52 = vector.broadcast %51 : vector<256x1xi1> to vector<256x1xi1>
    %53 = arith.xori %49, %52 : vector<256x1xi1>
    %54 = arith.andi %53, %47 : vector<256x1xi1>
    %55 = vector.broadcast %43 : i32 to vector<256x1xi32>
    %56 = arith.addi %45, %55 : vector<256x1xi32>
    %57 = arith.select %54, %56, %45 : vector<256x1xi1>, vector<256x1xi32>
    %c0_i32_21 = arith.constant 0 : i32
    %58 = vector.broadcast %c0_i32_21 : i32 to vector<256x1xi32>
    %59 = arith.cmpi sgt, %57, %58 : vector<256x1xi32>
    %c1_i32_22 = arith.constant 1 : i32
    %60 = tpu.dynamic_rotate %40 by %c1_i32_22 dim 0 : vector<256x64xf32>, i32 -> vector<256x64xf32>
    %cst_23 = arith.constant 0.000000e+00 : f32
    %61 = vector.shape_cast %59 : vector<256x1xi1> to vector<256x1xi1>
    %62 = vector.broadcast %61 : vector<256x1xi1> to vector<256x64xi1>
    %63 = vector.broadcast %cst_23 : f32 to vector<256x64xf32>
    %64 = arith.select %62, %60, %63 : vector<256x64xi1>, vector<256x64xf32>
    %c15_i32 = arith.constant 15 : i32
    %65 = vector.broadcast %c15_i32 : i32 to vector<256x1xi32>
    %66 = arith.cmpi slt, %57, %65 : vector<256x1xi32>
    %c255_i32 = arith.constant 255 : i32
    %67 = tpu.dynamic_rotate %40 by %c255_i32 dim 0 : vector<256x64xf32>, i32 -> vector<256x64xf32>
    %cst_24 = arith.constant 0.000000e+00 : f32
    %68 = vector.shape_cast %66 : vector<256x1xi1> to vector<256x1xi1>
    %69 = vector.broadcast %68 : vector<256x1xi1> to vector<256x64xi1>
    %70 = vector.broadcast %cst_24 : f32 to vector<256x64xf32>
    %71 = arith.select %69, %67, %70 : vector<256x64xi1>, vector<256x64xf32>
    %72 = tpu.concatenate %64, %40, %71 in 1 : vector<256x64xf32>, vector<256x64xf32>, vector<256x64xf32> -> vector<256x192xf32>
    %73 = arith.truncf %72 : vector<256x192xf32> to vector<256x192xbf16>
    %c16 = arith.constant 16 : index
    %c0_25 = arith.constant 0 : index
    %74 = vector.load %arg10[%c16, %c0_25] : memref<288x192xbf16, #tpu.memory_space<vmem>>, vector<256x192xbf16>
    tpu.vector_store %arg10[%c16, %c0_25], %73 {strides = array<i32>} : memref<288x192xbf16, #tpu.memory_space<vmem>>, vector<256x192xbf16>,
    %cst_26 = arith.constant 0.000000e+00 : f32
    %75 = vector.broadcast %cst_26 : f32 to vector<256x128xf32>
    %c0_27 = arith.constant 0 : index
    %c0_28 = arith.constant 0 : index
    %76 = vector.load %arg10[%c0_27, %c0_28] : memref<288x192xbf16, #tpu.memory_space<vmem>>, vector<256x192xbf16>
    %c0_29 = arith.constant 0 : index
    %c0_30 = arith.constant 0 : index
    %c0_31 = arith.constant 0 : index
    %77 = vector.load %arg5[%c0_29, %c0_30, %c0_31] : memref<3x192x128xbf16, #tpu.memory_space<vmem>>, vector<1x192x128xbf16>
    %78 = vector.shape_cast %77 : vector<1x192x128xbf16> to vector<192x128xbf16>
    %cst_32 = arith.constant dense<0.000000e+00> : vector<256x128xf32>
    %79 = tpu.matmul %76, %78, %cst_32 {dimension_numbers = #tpu.dot_dimension_numbers<[1], [0], [0], [1], [0, 0, 1, 1], [], []>} : vector<256x192xbf16>, vector<192x128xbf16>, vector<256x128xf32> -> vector<256x128xf32>
    %80 = arith.addf %75, %79 : vector<256x128xf32>
    %c16_33 = arith.constant 16 : index
    %c0_34 = arith.constant 0 : index
    %81 = vector.load %arg10[%c16_33, %c0_34] : memref<288x192xbf16, #tpu.memory_space<vmem>>, vector<256x192xbf16>
    %c1 = arith.constant 1 : index
    %c0_35 = arith.constant 0 : index
    %c0_36 = arith.constant 0 : index
    %82 = vector.load %arg5[%c1, %c0_35, %c0_36] : memref<3x192x128xbf16, #tpu.memory_space<vmem>>, vector<1x192x128xbf16>
    %83 = vector.shape_cast %82 : vector<1x192x128xbf16> to vector<192x128xbf16>
    %cst_37 = arith.constant dense<0.000000e+00> : vector<256x128xf32>
    %84 = tpu.matmul %81, %83, %cst_37 {dimension_numbers = #tpu.dot_dimension_numbers<[1], [0], [0], [1], [0, 0, 1, 1], [], []>} : vector<256x192xbf16>, vector<192x128xbf16>, vector<256x128xf32> -> vector<256x128xf32>
    %85 = arith.addf %80, %84 : vector<256x128xf32>
    %c32 = arith.constant 32 : index
    %c0_38 = arith.constant 0 : index
    %86 = vector.load %arg10[%c32, %c0_38] : memref<288x192xbf16, #tpu.memory_space<vmem>>, vector<256x192xbf16>
    %c2 = arith.constant 2 : index
    %c0_39 = arith.constant 0 : index
    %c0_40 = arith.constant 0 : index
    %87 = vector.load %arg5[%c2, %c0_39, %c0_40] : memref<3x192x128xbf16, #tpu.memory_space<vmem>>, vector<1x192x128xbf16>
    %88 = vector.shape_cast %87 : vector<1x192x128xbf16> to vector<192x128xbf16>
    %cst_41 = arith.constant dense<0.000000e+00> : vector<256x128xf32>
    %89 = tpu.matmul %86, %88, %cst_41 {dimension_numbers = #tpu.dot_dimension_numbers<[1], [0], [0], [1], [0, 0, 1, 1], [], []>} : vector<256x192xbf16>, vector<192x128xbf16>, vector<256x128xf32> -> vector<256x128xf32>
    %90 = arith.addf %85, %89 : vector<256x128xf32>
    %c0_42 = arith.constant 0 : index
    %c0_43 = arith.constant 0 : index
    %c0_44 = arith.constant 0 : index
    %91 = vector.load %arg7[%c0_42, %c0_43, %c0_44] : memref<1x256x32xf32, #tpu.memory_space<vmem>>, vector<1x256x32xf32>
    %92 = vector.shape_cast %91 : vector<1x256x32xf32> to vector<256x32xf32>
    %c0_45 = arith.constant 0 : index
    %c0_46 = arith.constant 0 : index
    %93 = vector.load %arg8[%c0_45, %c0_46] : memref<32x128xf32, #tpu.memory_space<vmem>>, vector<32x128xf32>
    %cst_47 = arith.constant dense<0.000000e+00> : vector<256x128xf32>
    %94 = tpu.matmul %92, %93, %cst_47 {dimension_numbers = #tpu.dot_dimension_numbers<[1], [0], [0], [1], [0, 0, 1, 1], [], []>} : vector<256x32xf32>, vector<32x128xf32>, vector<256x128xf32> -> vector<256x128xf32>
    %c0_48 = arith.constant 0 : index
    %c0_49 = arith.constant 0 : index
    %95 = vector.load %arg6[%c0_48, %c0_49] : memref<1x128xf32, #tpu.memory_space<vmem>>, vector<1x128xf32>
    %96 = vector.broadcast %95 : vector<1x128xf32> to vector<256x128xf32>
    %97 = arith.addf %90, %96 : vector<256x128xf32>
    %98 = arith.addf %97, %94 : vector<256x128xf32>
    %c0_50 = arith.constant 0 : index
    %c0_51 = arith.constant 0 : index
    %c0_52 = arith.constant 0 : index
    %99 = vector.load %arg9[%c0_50, %c0_51, %c0_52] : memref<1x256x128xf32, #tpu.memory_space<vmem>>, vector<1x256x128xf32>
    %100 = vector.shape_cast %99 : vector<1x256x128xf32> to vector<256x128xf32>
    %101 = vector.shape_cast %98 : vector<256x128xf32> to vector<1x256x128xf32>
    tpu.vector_store %arg9[%c0_50, %c0_51, %c0_52], %101 {strides = array<i32>} : memref<1x256x128xf32, #tpu.memory_space<vmem>>, vector<1x256x128xf32>,
    return
  }
  func.func @transform_0(%arg0: i32) -> (i32, i32, i32) {
    %c0_i32 = arith.constant 0 : i32
    %c0_i32_0 = arith.constant 0 : i32
    %c0_i32_1 = arith.constant 0 : i32
    return %arg0, %c0_i32, %c0_i32_0 : i32, i32, i32
  }
  func.func @transform_1(%arg0: i32) -> (i32, i32) {
    %c0_i32 = arith.constant 0 : i32
    %c0_i32_0 = arith.constant 0 : i32
    %c0_i32_1 = arith.constant 0 : i32
    return %c0_i32, %c0_i32_0 : i32, i32
  }
  func.func @transform_2(%arg0: i32) -> (i32, i32) {
    %c0_i32 = arith.constant 0 : i32
    %c0_i32_0 = arith.constant 0 : i32
    %c0_i32_1 = arith.constant 0 : i32
    return %c0_i32, %c0_i32_0 : i32, i32
  }
  func.func @transform_3(%arg0: i32) -> (i32, i32) {
    %c0_i32 = arith.constant 0 : i32
    %c0_i32_0 = arith.constant 0 : i32
    %c0_i32_1 = arith.constant 0 : i32
    return %c0_i32, %c0_i32_0 : i32, i32
  }
  func.func @transform_4(%arg0: i32) -> (i32, i32, i32) {
    %c0_i32 = arith.constant 0 : i32
    %c0_i32_0 = arith.constant 0 : i32
    %c0_i32_1 = arith.constant 0 : i32
    %c0_i32_2 = arith.constant 0 : i32
    return %c0_i32, %c0_i32_0, %c0_i32_1 : i32, i32, i32
  }
  func.func @transform_5(%arg0: i32) -> (i32, i32) {
    %c0_i32 = arith.constant 0 : i32
    %c0_i32_0 = arith.constant 0 : i32
    %c0_i32_1 = arith.constant 0 : i32
    return %c0_i32, %c0_i32_0 : i32, i32
  }
  func.func @transform_6(%arg0: i32) -> (i32, i32, i32) {
    %c0_i32 = arith.constant 0 : i32
    %c0_i32_0 = arith.constant 0 : i32
    %c0_i32_1 = arith.constant 0 : i32
    return %arg0, %c0_i32, %c0_i32_0 : i32, i32, i32
  }
  func.func @transform_7(%arg0: i32) -> (i32, i32) {
    %c0_i32 = arith.constant 0 : i32
    %c0_i32_0 = arith.constant 0 : i32
    %c0_i32_1 = arith.constant 0 : i32
    return %c0_i32, %c0_i32_0 : i32, i32
  }
  func.func @transform_8(%arg0: i32) -> (i32, i32, i32) {
    %c0_i32 = arith.constant 0 : i32
    %c0_i32_0 = arith.constant 0 : i32
    %c0_i32_1 = arith.constant 0 : i32
    return %arg0, %c0_i32, %c0_i32_0 : i32, i32, i32
  }
}

</mosaic_0001>

<bundles_post_ra>
// kernel: resblock_forward.2
= control target key start
LH: loop header
LB: loop body
LE: loop exit
PB: predicated region body
PF: predicated region fallthrough
CT: control target
= control target key end

     0   :  { %s4323_s21 = smov 0   ;;  %s6148_s0 = inlined_call_operand.vmem [shape: f32[2,256,32], index: 0, kind: input, shape index: {}]   ;;  %s6149_s1 = inlined_call_operand.vmem [shape: f32[1,32], index: 1, kind: input, shape index: {}]   ;;  %s6150_s2 = inlined_call_operand.vmem [shape: f32[1,32], index: 2, kind: input, shape index: {}]   ;;  %s6151_s3 = inlined_call_operand.vmem [shape: f32[32,32], index: 3, kind: input, shape index: {}]   ;;  %s6152_s4 = inlined_call_operand.vmem [shape: bf16[3,96,128], index: 4, kind: input, shape index: {}]   ;;  %s6153_s5 = inlined_call_operand.vmem [shape: f32[2,1,128], index: 5, kind: input, shape index: {}]   ;;  %s6154_s6 = inlined_call_operand.vmem [shape: bf16[2,256,128], index: 6, kind: output, shape index: {}]  }
   0x1 LB: > { %s3323_s3 = sadd.s32 4294967295, %s4283_s21   ;;  %p3327_p0 = scmp.ge.s32.totalorder %s4283_s21, 1  ;;  %s4283_s21 = sphi %s4323_s21, %s16_s21  }
   0x2   : > { %p220_p1 = scmp.lt.s32.totalorder %s4283_s21, 3 }
   0x4   : > { %p221_p2 = pnand %p3327_p0, %p220_p1 }
   0x6   : > { %224 = sbr.rel (%p221_p2) target bundleno = 650 (0x28a), region = 44 }
   0xb   : > { %p253_p3 = scmp.lt.s32.totalorder %s3323_s3, 1  ;;  %vm306_vm0 = vcmask 261120   ;;  %s4285_s30 = smov 32  }
   0xc   : > { %s4286_s13 = smov 64  }
   0xd   : > { %s6309_s3 = smov (!%p253_p3, %s3323_s3), 1 }
   0xe   : > { %s3554_s22 = sshll.u32 %s6309_s3, 8  ;;  %s260_s24 = scalar_lea.vmem %s6153_s5, %s6309_s3 }
   0xf   : > { %s4337_s25 = scalar_lea.vmem %s6148_s0, %s3554_s22 }
  0x10   : > { %v4340_v0 = vld [vmem:[%s4337_s25] sm:$0xff]  ;;  %v4343_v1 = vld [vmem:[%s4337_s25 + $0x8] sm:$0xff]  ;;  %v4346_v2 = vld [vmem:[%s4337_s25 + $0x10] sm:$0xff] }
  0x11   : > { %v4349_v3 = vld [vmem:[%s4337_s25 + $0x18] sm:$0xff]  ;;  %v307_v4 = vsel %vm306_vm0, %v4340_v0, 0.0  ;;  %v308_v5 = vsel %vm306_vm0, %v4343_v1, 0.0  ;;  %v310_v6 = vsel %vm306_vm0, %v4346_v2, 0.0  ;;  %v4358_v7 = vld [vmem:[%s4337_s25 + $0x20] sm:$0xff]  ;;  %v4363_v10 = vld [vmem:[%s4337_s25 + $0x28] sm:$0xff]  ;;  %v376_v31 = vmul.f32 %v4340_v0, %v4340_v0 }
  0x12   : > { %v309_v8 = vadd.f32 %v308_v5, %v307_v4  ;;  %v312_v9 = vsel %vm306_vm0, %v4349_v3, 0.0  ;;  %v314_v12 = vsel %vm306_vm0, %v4358_v7, 0.0  ;;  %v4368_v13 = vld [vmem:[%s4337_s25 + $0x30] sm:$0xff]  ;;  %v4371_v15 = vld [vmem:[%s4337_s25 + $0x38] sm:$0xff]  ;;  %v4374_v16 = vld [vmem:[%s4337_s25 + $0x40] sm:$0xff]  ;;  %v316_v18 = vsel %vm306_vm0, %v4363_v10, 0.0 }
  0x13   : > { %v4377_v17 = vld [vmem:[%s4337_s25 + $0x48] sm:$0xff]  ;;  %v4382_v19 = vld [vmem:[%s4337_s25 + $0x50] sm:$0xff]  ;;  %v4385_v20 = vld [vmem:[%s4337_s25 + $0x58] sm:$0xff]  ;;  %v318_v22 = vsel %vm306_vm0, %v4368_v13, 0.0  ;;  %v320_v24 = vsel %vm306_vm0, %v4371_v15, 0.0  ;;  %v322_v25 = vsel %vm306_vm0, %v4374_v16, 0.0  ;;  %v377_v32 = vmul.f32 %v4343_v1, %v4343_v1 }
  0x14   : > { %v311_v11 = vadd.f32 %v310_v6, %v309_v8  ;;  %v324_v26 = vsel %vm306_vm0, %v4377_v17, 0.0  ;;  %v326_v27 = vsel %vm306_vm0, %v4382_v19, 0.0  ;;  %v328_v28 = vsel %vm306_vm0, %v4385_v20, 0.0  ;;  %v4406_v34 = vld [vmem:[%s4337_s25 + $0x60] sm:$0xff]  ;;  %v4416_v42 = vld [vmem:[%s4337_s25 + $0x68] sm:$0xff]  ;;  %v4424_v48 = vld [vmem:[%s4337_s25 + $0x70] sm:$0xff] }
  0x15   : > { %v378_v33 = vmul.f32 %v4346_v2, %v4346_v2  ;;  %v379_v36 = vmul.f32 %v4349_v3, %v4349_v3  ;;  %v380_v38 = vmul.f32 %v4358_v7, %v4358_v7  ;;  %v408_v39 = vsel %vm306_vm0, %v376_v31, 0.0  ;;  %v4432_v54 = vld [vmem:[%s4337_s25 + $0x78] sm:$0xff]  ;;  %v4440_v60 = vld [vmem:[%s4337_s25 + $0x80] sm:$0xff]  ;;  %v4448_v6 = vld [vmem:[%s4337_s25 + $0x88] sm:$0xff] }
  0x16   : > { %v313_v14 = vadd.f32 %v312_v9, %v311_v11  ;;  %v409_v40 = vsel %vm306_vm0, %v377_v32, 0.0  ;;  %v330_v45 = vsel %vm306_vm0, %v4406_v34, 0.0  ;;  %v381_v46 = vmul.f32 %v4363_v10, %v4363_v10  ;;  %v4472_v32 = vld [vmem:[%s4337_s25 + $0xa0] sm:$0xff] }
  0x17   : > { %v411_v41 = vsel %vm306_vm0, %v378_v33, 0.0  ;;  %v410_v44 = vadd.f32 %v409_v40, %v408_v39  ;;  %v413_v47 = vsel %vm306_vm0, %v379_v36, 0.0  ;;  %v332_v51 = vsel %vm306_vm0, %v4416_v42, 0.0  ;;  %v4480_v39 = vld [vmem:[%s4337_s25 + $0xa8] sm:$0xff] }
  0x18   : > { %v315_v21 = vadd.f32 %v314_v12, %v313_v14  ;;  %v382_v52 = vmul.f32 %v4368_v13, %v4368_v13  ;;  %v415_v53 = vsel %vm306_vm0, %v380_v38, 0.0  ;;  %v334_v57 = vsel %vm306_vm0, %v4424_v48, 0.0 }
  0x19   : > { %v412_v50 = vadd.f32 %v411_v41, %v410_v44  ;;  %v383_v58 = vmul.f32 %v4371_v15, %v4371_v15  ;;  %v417_v59 = vsel %vm306_vm0, %v381_v46, 0.0  ;;  %v336_v63 = vsel %vm306_vm0, %v4432_v54, 0.0  ;;  %v4488_v46 = vld [vmem:[%s4337_s25 + $0xb0] sm:$0xff] }
  0x1a   : > { %v317_v23 = vadd.f32 %v316_v18, %v315_v21  ;;  %v384_v4 = vmul.f32 %v4374_v16, %v4374_v16  ;;  %v419_v5 = vsel %vm306_vm0, %v382_v52, 0.0  ;;  %v338_v11 = vsel %vm306_vm0, %v4440_v60, 0.0  ;;  %v4456_v18 = vld [vmem:[%s4337_s25 + $0x90] sm:$0xff] }
  0x1b   : > { %v414_v56 = vadd.f32 %v413_v47, %v412_v50  ;;  %v385_v12 = vmul.f32 %v4377_v17, %v4377_v17  ;;  %v421_v14 = vsel %vm306_vm0, %v383_v58, 0.0  ;;  %v389_v44 = vmul.f32 %v4416_v42, %v4416_v42 }
  0x1c   : > { %v319_v29 = vadd.f32 %v318_v22, %v317_v23  ;;  %v340_v23 = vsel %vm306_vm0, %v4448_v6, 0.0  ;;  %v348_v50 = vsel %vm306_vm0, %v4480_v39, 0.0  ;;  %v391_v58 = vmul.f32 %v4432_v54, %v4432_v54 }
  0x1d   : > { %v416_v62 = vadd.f32 %v415_v53, %v414_v56  ;;  %v425_v31 = vsel %vm306_vm0, %v385_v12, 0.0  ;;  %v4496_v53 = vld [vmem:[%s4337_s25 + $0xb8] sm:$0xff] }
  0x1e   : > { %v321_v30 = vadd.f32 %v320_v24, %v319_v29  ;;  %v386_v24 = vmul.f32 %v4382_v19, %v4382_v19  ;;  %v342_v29 = vsel %vm306_vm0, %v4456_v18, 0.0 }
  0x1f   : > { %v418_v9 = vadd.f32 %v417_v59, %v416_v62  ;;  %v433_v59 = vsel %vm306_vm0, %v389_v44, 0.0  ;;  %v396_v44 = vmul.f32 %v4472_v32, %v4472_v32 }
  0x20   : > { %v323_v35 = vadd.f32 %v322_v25, %v321_v30  ;;  %v423_v25 = vsel %vm306_vm0, %v384_v4, 0.0  ;;  %v387_v30 = vmul.f32 %v4385_v20, %v4385_v20  ;;  %v427_v38 = vsel %vm306_vm0, %v386_v24, 0.0 }
  0x21   : > { %v420_v22 = vadd.f32 %v419_v5, %v418_v9  ;;  %v352_v4 = vsel %vm306_vm0, %v4496_v53, 0.0  ;;  %v392_v5 = vmul.f32 %v4440_v60, %v4440_v60  ;;  %v4512_v9 = vld [vmem:[%s4337_s25 + $0xc8] sm:$0xff] }
  0x22   : > { %v325_v37 = vadd.f32 %v324_v26, %v323_v35  ;;  %v4464_v26 = vld [vmem:[%s4337_s25 + $0x98] sm:$0xff] }
  0x23   : > { %v344_v36 = vsel %vm306_vm0, %v4464_v26, 0.0 }
  0x24   : > { %v327_v43 = vadd.f32 %v326_v27, %v325_v37  ;;  %v388_v37 = vmul.f32 %v4406_v34, %v4406_v34 }
  0x26   : > { %v329_v49 = vadd.f32 %v328_v28, %v327_v43  ;;  %v422_v28 = vadd.f32 %v421_v14, %v420_v22  ;;  %v346_v43 = vsel %vm306_vm0, %v4472_v32, 0.0  ;;  %v431_v52 = vsel %vm306_vm0, %v388_v37, 0.0 }
  0x27   : > { %v437_v22 = vsel %vm306_vm0, %v391_v58, 0.0 }
  0x28   : > { %v331_v55 = vadd.f32 %v330_v45, %v329_v49  ;;  %v424_v35 = vadd.f32 %v423_v25, %v422_v28  ;;  %v429_v45 = vsel %vm306_vm0, %v387_v30, 0.0  ;;  %v394_v28 = vmul.f32 %v4456_v18, %v4456_v18  ;;  %v4528_v30 = vld [vmem:[%s4337_s25 + $0xd8] sm:$0xff] }
  0x2a   : > { %v333_v61 = vadd.f32 %v332_v51, %v331_v55  ;;  %v426_v41 = vadd.f32 %v425_v31, %v424_v35  ;;  %v390_v51 = vmul.f32 %v4424_v48, %v4424_v48 }
  0x2c   : > { %v335_v8 = vadd.f32 %v334_v57, %v333_v61  ;;  %v428_v49 = vadd.f32 %v427_v38, %v426_v41  ;;  %v350_v57 = vsel %vm306_vm0, %v4488_v46, 0.0  ;;  %v4504_v61 = vld [vmem:[%s4337_s25 + $0xc0] sm:$0xff] }
  0x2d   : > { %v354_v14 = vsel %vm306_vm0, %v4504_v61, 0.0  ;;  %v4536_v38 = vld [vmem:[%s4337_s25 + $0xe0] sm:$0xff] }
  0x2e   : > { %v337_v21 = vadd.f32 %v336_v63, %v335_v8  ;;  %v430_v56 = vadd.f32 %v429_v45, %v428_v49  ;;  %v435_v8 = vsel %vm306_vm0, %v390_v51, 0.0  ;;  %v443_v45 = vsel %vm306_vm0, %v394_v28, 0.0 }
  0x2f   : > { %v362_v51 = vsel %vm306_vm0, %v4536_v38, 0.0 }
  0x30   : > { %v339_v27 = vadd.f32 %v338_v11, %v337_v21  ;;  %v432_v63 = vadd.f32 %v431_v52, %v430_v56  ;;  %v393_v21 = vmul.f32 %v4448_v6, %v4448_v6  ;;  %v397_v52 = vmul.f32 %v4480_v39, %v4480_v39  ;;  %v4552_v56 = vld [vmem:[%s4337_s25 + $0xf0] sm:$0xff] }
  0x32   : > { %v341_v33 = vadd.f32 %v340_v23, %v339_v27  ;;  %v434_v12 = vadd.f32 %v433_v59, %v432_v63  ;;  %v4520_v23 = vld [vmem:[%s4337_s25 + $0xd0] sm:$0xff]  ;;  %v356_v27 = vsel %vm306_vm0, %v4512_v9, 0.0  ;;  %v441_v37 = vsel %vm306_vm0, %v393_v21, 0.0 }
  0x33   : > { %v358_v35 = vsel %vm306_vm0, %v4520_v23, 0.0  ;;  %v447_v63 = vsel %vm306_vm0, %v396_v44, 0.0  ;;  %v403_v44 = vmul.f32 %v4528_v30, %v4528_v30 }
  0x34   : > { %v343_v40 = vadd.f32 %v342_v29, %v341_v33  ;;  %v436_v25 = vadd.f32 %v435_v8, %v434_v12  ;;  %v439_v29 = vsel %vm306_vm0, %v392_v5, 0.0  ;;  %v399_v12 = vmul.f32 %v4496_v53, %v4496_v53 }
  0x36   : > { %v345_v47 = vadd.f32 %v344_v36, %v343_v40  ;;  %v438_v33 = vadd.f32 %v437_v22, %v436_v25  ;;  %v395_v36 = vmul.f32 %v4464_v26, %v4464_v26  ;;  %v400_v25 = vmul.f32 %v4504_v61, %v4504_v61 }
  0x38   : > { %v347_v55 = vadd.f32 %v346_v43, %v345_v47  ;;  %v440_v41 = vadd.f32 %v439_v29, %v438_v33  ;;  %v360_v43 = vsel %vm306_vm0, %v4528_v30, 0.0  ;;  %v4544_v47 = vld [vmem:[%s4337_s25 + $0xe8] sm:$0xff]  ;;  %v453_v33 = vsel %vm306_vm0, %v399_v12, 0.0 }
  0x39   : > { %v364_v59 = vsel %vm306_vm0, %v4544_v47, 0.0 }
  0x3a   : > { %v349_v62 = vadd.f32 %v348_v50, %v347_v55  ;;  %v442_v50 = vadd.f32 %v441_v37, %v440_v41  ;;  %v445_v55 = vsel %vm306_vm0, %v395_v36, 0.0  ;;  %v402_v37 = vmul.f32 %v4520_v23, %v4520_v23 }
  0x3c   : > { %v351_v11 = vadd.f32 %v350_v57, %v349_v62  ;;  %v444_v58 = vadd.f32 %v443_v45, %v442_v50  ;;  %v398_v62 = vmul.f32 %v4488_v46, %v4488_v46  ;;  %v404_v50 = vmul.f32 %v4536_v38, %v4536_v38 }
  0x3e   : > { %v353_v24 = vadd.f32 %v352_v4, %v351_v11  ;;  %v4560_v4 = vld [vmem:[%s4337_s25 + $0xf8] sm:$0xff]  ;;  %v446_v8 = vadd.f32 %v445_v55, %v444_v58  ;;  %v366_v11 = vsel %vm306_vm0, %v4552_v56, 0.0  ;;  %v461_v58 = vsel %vm306_vm0, %v403_v44, 0.0  ;;  %s3555_s25 = sshll.u32 %s6309_s3, 7 }
  0x3f   : > { %s6073_s28 = scalar_lea.vmem %s6154_s6, %s3555_s25 }
  0x40   : > { %v355_v31 = vadd.f32 %v354_v14, %v353_v24  ;;  %v449_v14 = vsel %vm306_vm0, %v397_v52, 0.0  ;;  %v448_v22 = vadd.f32 %v447_v63, %v446_v8  ;;  %v368_v24 = vsel %vm306_vm0, %v4560_v4, 0.0 }
  0x41   : > { %v463_v63 = vsel %vm306_vm0, %v404_v50, 0.0 }
  0x42   : > { %v357_v40 = vadd.f32 %v356_v27, %v355_v31  ;;  %v451_v27 = vsel %vm306_vm0, %v398_v62, 0.0  ;;  %v450_v29 = vadd.f32 %v449_v14, %v448_v22  ;;  %v401_v31 = vmul.f32 %v4512_v9, %v4512_v9 }
  0x43   : > { %v406_v62 = vmul.f32 %v4552_v56, %v4552_v56 }
  0x44   : > { %v359_v49 = vadd.f32 %v358_v35, %v357_v40  ;;  %v452_v36 = vadd.f32 %v451_v27, %v450_v29  ;;  %v455_v40 = vsel %vm306_vm0, %v400_v25, 0.0  ;;  %v457_v45 = vsel %vm306_vm0, %v401_v31, 0.0 }
  0x46   : > { %v361_v57 = vadd.f32 %v360_v43, %v359_v49  ;;  %v454_v43 = vadd.f32 %v453_v33, %v452_v36 }
  0x48   : > { %v363_v5 = vadd.f32 %v362_v51, %v361_v57  ;;  %v456_v49 = vadd.f32 %v455_v40, %v454_v43  ;;  %v459_v51 = vsel %vm306_vm0, %v402_v37, 0.0  ;;  %v405_v57 = vmul.f32 %v4544_v47, %v4544_v47 }
  0x4a   : > { %v365_v21 = vadd.f32 %v364_v59, %v363_v5  ;;  %v458_v55 = vadd.f32 %v457_v45, %v456_v49  ;;  %v465_v12 = vsel %vm306_vm0, %v405_v57, 0.0 }
  0x4c   : > { %v367_v28 = vadd.f32 %v366_v11, %v365_v21  ;;  %v460_v59 = vadd.f32 %v459_v51, %v458_v55  ;;  %v407_v11 = vmul.f32 %v4560_v4, %v4560_v4  ;;  %v467_v21 = vsel %vm306_vm0, %v406_v62, 0.0  ;;  %v304_v55 = vld [vmem:[%s6149_s1] sm:$0x1] }
  0x4d   : > { %v486_v51 = vlaneseq  ;;  %v305_v62 = vld [vmem:[%s6150_s2] sm:$0x1] }
  0x4e   : > { %v369_v35 = vadd.f32 %v368_v24, %v367_v28  ;;  %v462_v8 = vadd.f32 %v461_v58, %v460_v59  ;;  %v469_v25 = vsel %vm306_vm0, %v407_v11, 0.0 }
  0x50   : > { %v370_v41 = vrot.slane %v369_v35, 4  ;;  %v464_v14 = vadd.f32 %v463_v63, %v462_v8 }
  0x52   : > { %v371_v52 = vadd.f32 %v370_v41, %v369_v35  ;;  %v466_v24 = vadd.f32 %v465_v12, %v464_v14 }
  0x54   : > { %v372_v5 = vrot.slane %v371_v52, 2  ;;  %v468_v27 = vadd.f32 %v467_v21, %v466_v24 }
  0x56   : > { %v373_v22 = vadd.f32 %v372_v5, %v371_v52  ;;  %v470_v29 = vadd.f32 %v469_v25, %v468_v27  ;;  %v4595_v52 = vshrl.u32 %v486_v51, 7 }
  0x58   : > { %v374_v28 = vrot.slane %v373_v22, 1  ;;  %v471_v31 = vrot.slane %v470_v29, 4  ;;  %v488_v57 = vsub.s32 0, %v4595_v52  ;;  %vm1458_vm1 = vcmp.lt.s32.totalorder %v4595_v52, 7 }
  0x59   : > { %vm1265_vm2 = vcmp.lt.s32.totalorder %v4595_v52, 1 }
  0x5a   : > { %v375_v33 = vadd.f32 %v374_v28, %v373_v22  ;;  %v472_v35 = vadd.f32 %v471_v31, %v470_v29 }
  0x5c   : > { %v473_v36 = vrot.slane %v472_v35, 2  ;;  %v477_v40 = vmul.f32 0.00390625, %v375_v33 }
  0x5e   : > { %v474_v37 = vadd.f32 %v473_v36, %v472_v35  ;;  %v479_v44 = vmul.f32 %v477_v40, %v477_v40 }
  0x60   : > { %v475_v41 = vrot.slane %v474_v37, 1 }
  0x62   : > { %v476_v43 = vadd.f32 %v475_v41, %v474_v37 }
  0x64   : > { %v478_v45 = vmul.f32 0.00390625, %v476_v43 }
  0x66   : > { %v480_v49 = vsub.f32 %v478_v45, %v479_v44 }
  0x68   : > { %v481_v50 = vadd.f32 1e-05, %v480_v49 }
  0x6a   : > { %4147 = vrsqrt.f32 %v481_v50 }
  0x77   : > { %v4148_v58 = vpop.eup %4147 }
  0x78   : > { %v483_v59 = vmul.f32 %v4148_v58, %v304_v55 }
  0x7a   : > { %v484_v63 = vmul.f32 %v483_v59, %v477_v40  ;;  %v4604_v5 = vrot.slane %v483_v59, %v488_v57 }
  0x7c   : > { %v485_v8 = vsub.f32 %v305_v62, %v484_v63  ;;  %v506_v11 = vmul.f32 %v4604_v5, %v4440_v60  ;;  %v507_v12 = vmul.f32 %v4604_v5, %v4448_v6  ;;  %v490_v14 = vmul.f32 %v4604_v5, %v4340_v0 }
  0x7d   : > { %v491_v21 = vmul.f32 %v4604_v5, %v4343_v1  ;;  %v508_v22 = vmul.f32 %v4604_v5, %v4456_v18  ;;  %v509_v24 = vmul.f32 %v4604_v5, %v4464_v26  ;;  %v492_v60 = vmul.f32 %v4604_v5, %v4346_v2 }
  0x7e   : > { %v4618_v25 = vrot.slane %v485_v8, %v488_v57  ;;  %v493_v6 = vmul.f32 %v4604_v5, %v4349_v3  ;;  %v510_v0 = vmul.f32 %v4604_v5, %v4472_v32  ;;  %v511_v32 = vmul.f32 %v4604_v5, %v4480_v39 }
  0x7f   : > { %v512_v28 = vmul.f32 %v4604_v5, %v4488_v46  ;;  %v513_v39 = vmul.f32 %v4604_v5, %v4496_v53  ;;  %v514_v41 = vmul.f32 %v4604_v5, %v4504_v61  ;;  %v515_v45 = vmul.f32 %v4604_v5, %v4512_v9 }
  0x80   : > { %v4627_v27 = vadd.f32 %v4618_v25, %v506_v11  ;;  %v4630_v1 = vadd.f32 %v4618_v25, %v507_v12  ;;  %v4633_v18 = vadd.f32 %v4618_v25, %v490_v14  ;;  %v4636_v26 = vadd.f32 %v4618_v25, %v491_v21 }
  0x81   : > { %v4639_v2 = vadd.f32 %v4618_v25, %v508_v22  ;;  %v4642_v3 = vadd.f32 %v4618_v25, %v509_v24  ;;  %v4652_v35 = vadd.f32 %v4618_v25, %v492_v60  ;;  %v4656_v37 = vadd.f32 %v4618_v25, %v493_v6 }
  0x82   : > { %v3348_v29 = vmul.f32 -1.442695, %v4627_v27  ;;  %v3349_v31 = vmul.f32 -1.442695, %v4630_v1  ;;  %v3332_v33 = vmul.f32 -1.442695, %v4633_v18  ;;  %v4662_v40 = vadd.f32 %v4618_v25, %v510_v0 }
  0x83   : > { %v3333_v36 = vmul.f32 -1.442695, %v4636_v26  ;;  %v3350_v46 = vmul.f32 -1.442695, %v4639_v2  ;;  %v3351_v43 = vmul.f32 -1.442695, %v4642_v3  ;;  %v4668_v44 = vadd.f32 %v4618_v25, %v511_v32 }
  0x84   : > { %4149 = vpow2.f32 %v3348_v29  ;;  %v3334_v53 = vmul.f32 -1.442695, %v4652_v35  ;;  %v4674_v49 = vadd.f32 %v4618_v25, %v512_v28  ;;  %v494_v50 = vmul.f32 %v4604_v5, %v4358_v7 }
  0x85   : > { %4151 = vpow2.f32 %v3349_v31  ;;  %v3335_v61 = vmul.f32 -1.442695, %v4656_v37  ;;  %v4680_v51 = vadd.f32 %v4618_v25, %v513_v39  ;;  %v495_v55 = vmul.f32 %v4604_v5, %v4363_v10 }
  0x86   : > { %4153 = vpow2.f32 %v3332_v33  ;;  %v3352_v9 = vmul.f32 -1.442695, %v4662_v40  ;;  %v4686_v57 = vadd.f32 %v4618_v25, %v514_v41  ;;  %v3353_v58 = vmul.f32 -1.442695, %v4668_v44 }
  0x87   : > { %4155 = vpow2.f32 %v3333_v36  ;;  %v4690_v7 = vadd.f32 %v4618_v25, %v515_v45  ;;  %v3354_v59 = vmul.f32 -1.442695, %v4674_v49  ;;  %v4694_v62 = vadd.f32 %v4618_v25, %v494_v50 }
  0x88   : > { %4157 = vpow2.f32 %v3350_v46  ;;  %v3355_v10 = vmul.f32 -1.442695, %v4680_v51  ;;  %v4698_v63 = vadd.f32 %v4618_v25, %v495_v55  ;;  %v3356_v8 = vmul.f32 -1.442695, %v4686_v57 }
  0x89   : > { %4159 = vpow2.f32 %v3351_v43  ;;  %v3357_v11 = vmul.f32 -1.442695, %v4690_v7  ;;  %v4703_v12 = vadd.s32 152, %v4595_v52  ;;  %v4706_v14 = vadd.s32 8, %v4595_v52 }
  0x8a   : > { %4161 = vpow2.f32 %v3334_v53  ;;  %v3336_v21 = vmul.f32 -1.442695, %v4694_v62  ;;  %v4710_v22 = vadd.s32 168, %v4595_v52  ;;  %v4713_v24 = vadd.s32 136, %v4595_v52 }
  0x8b   : > { %4163 = vpow2.f32 %v3335_v61  ;;  %v3337_v60 = vmul.f32 -1.442695, %v4698_v63  ;;  %v4717_v6 = vadd.s32 184, %v4595_v52  ;;  %v954_v32 = vand.u32 15, %v4703_v12 }
  0x8c   : > { %4165 = vpow2.f32 %v3352_v9  ;;  %v518_v41 = vmul.f32 %v4604_v5, %v4536_v38  ;;  %v519_v50 = vmul.f32 %v4604_v5, %v4544_v47  ;;  %v4729_v61 = vadd.s32 24, %v4595_v52 }
  0x8d   : > { %4167 = vpow2.f32 %v3353_v58  ;;  %v496_v58 = vmul.f32 %v4604_v5, %v4368_v13  ;;  %v497_v38 = vmul.f32 %v4604_v5, %v4371_v15  ;;  %v503_v47 = vmul.f32 %v4604_v5, %v4416_v42 }
  0x8e   : > { %4169 = vpow2.f32 %v3354_v59  ;;  %v4743_v13 = vadd.s32 40, %v4595_v52  ;;  %vm4934_vm3 = vcmp.lt.s32.totalorder %v954_v32, 15 }
  0x8f   : > { %4171 = vpow2.f32 %v3355_v10 }
  0x90   : > { %4173 = vpow2.f32 %v3356_v8  ;;  %v502_v8 = vmul.f32 %v4604_v5, %v4406_v34  ;;  %v4749_v34 = vadd.f32 %v4618_v25, %v503_v47 }
  0x91   : > { %v4150_v0 = vpop.eup %4149  ;;  %4175 = vpow2.f32 %v3357_v11 }
  0x92   : > { %v4152_v29 = vpop.eup %4151  ;;  %v672_v31 = vadd.f32 1.0, %v4150_v0  ;;  %4177 = vpow2.f32 %v3336_v21  ;;  %6170 = vst [vmem:[#allocation4_spill] sm:$0xff] %v4749_v34 }
  0x93   : > { %v4154_v39 = vpop.eup %4153  ;;  %v673_v46 = vadd.f32 1.0, %v4152_v29  ;;  %4179 = vpow2.f32 %v3337_v60  ;;  %v4740_v60 = vadd.f32 %v4618_v25, %v518_v41  ;;  %v4746_v29 = vadd.f32 %v4618_v25, %v502_v8 }
  0x94   : > { %v4156_v45 = vpop.eup %4155  ;;  %4181 = vrcp.f32 %v672_v31  ;;  %v656_v53 = vadd.f32 1.0, %v4154_v39  ;;  %v4752_v39 = vadd.f32 %v4618_v25, %v519_v50  ;;  %v505_v50 = vmul.f32 %v4604_v5, %v4432_v54 }
  0x95   : > { %v4158_v55 = vpop.eup %4157  ;;  %4183 = vrcp.f32 %v673_v46  ;;  %v657_v9 = vadd.f32 1.0, %v4156_v45  ;;  %6169 = vst [vmem:[#allocation3_spill] sm:$0xff] %v4746_v29  ;;  %v4755_v46 = vadd.f32 %v4618_v25, %v496_v58  ;;  %v3360_v47 = vmul.f32 -1.442695, %v4740_v60 }
  0x96   : > { %v4160_v59 = vpop.eup %4159  ;;  %4185 = vrcp.f32 %v656_v53  ;;  %v674_v10 = vadd.f32 1.0, %v4158_v55  ;;  %v4758_v53 = vadd.f32 %v4618_v25, %v497_v38  ;;  %v516_v55 = vmul.f32 %v4604_v5, %v4520_v23 }
  0x97   : > { %v4162_v11 = vpop.eup %4161  ;;  %4187 = vrcp.f32 %v657_v9  ;;  %v675_v21 = vadd.f32 1.0, %v4160_v59  ;;  %v517_v38 = vmul.f32 %v4604_v5, %v4528_v30  ;;  %v3344_v36 = vmul.f32 -1.442695, %v4746_v29 }
  0x98   : > { %v4164_v0 = vpop.eup %4163  ;;  %4189 = vrcp.f32 %v674_v10  ;;  %v658_v15 = vadd.f32 1.0, %v4162_v11  ;;  %v504_v10 = vmul.f32 %v4604_v5, %v4424_v48 }
  0x99   : > { %v4166_v31 = vpop.eup %4165  ;;  %4191 = vrcp.f32 %v675_v21  ;;  %v659_v42 = vadd.f32 1.0, %v4164_v0  ;;  %v4773_v0 = vadd.f32 %v4618_v25, %v505_v50  ;;  %v500_v50 = vmul.f32 %v4604_v5, %v4382_v19 }
  0x9a   : > { %v4168_v41 = vpop.eup %4167  ;;  %4193 = vrcp.f32 %v658_v15  ;;  %v676_v45 = vadd.f32 1.0, %v4166_v31  ;;  %v4770_v21 = vadd.f32 %v4618_v25, %v504_v10  ;;  %v3361_v15 = vmul.f32 -1.442695, %v4752_v39 }
  0x9b   : > { %v4170_v9 = vpop.eup %4169  ;;  %4195 = vrcp.f32 %v659_v42  ;;  %v677_v59 = vadd.f32 1.0, %v4168_v41  ;;  %6172 = vst [vmem:[#allocation6_spill] sm:$0xff] %v4773_v0  ;;  %v498_v31 = vmul.f32 %v4604_v5, %v4374_v16  ;;  %v4779_v41 = vadd.f32 %v4618_v25, %v516_v55 }
  0x9c   : > { %v4172_v58 = vpop.eup %4171  ;;  %4197 = vrcp.f32 %v676_v45  ;;  %v678_v8 = vadd.f32 1.0, %v4170_v9  ;;  %6171 = vst [vmem:[#allocation5_spill] sm:$0xff] %v4770_v21  ;;  %v499_v45 = vmul.f32 %v4604_v5, %v4377_v17  ;;  %v4784_v10 = vadd.f32 %v4618_v25, %v517_v38 }
  0x9d   : > { %v4174_v11 = vpop.eup %4173  ;;  %4199 = vrcp.f32 %v677_v59  ;;  %v679_v23 = vadd.f32 1.0, %v4172_v58  ;;  %v501_v55 = vmul.f32 %v4604_v5, %v4385_v20  ;;  %v4796_v38 = vadd.f32 %v4618_v25, %v498_v31 }
  0x9e   : > { %v4176_v48 = vpop.eup %4175  ;;  %4201 = vrcp.f32 %v678_v8  ;;  %v680_v54 = vadd.f32 1.0, %v4174_v11  ;;  %v3338_v8 = vmul.f32 -1.442695, %v4755_v46  ;;  %v4810_v31 = vadd.f32 %v4618_v25, %v500_v50 }
  0x9f   : > { %v4178_v42 = vpop.eup %4177  ;;  %4203 = vrcp.f32 %v679_v23  ;;  %v681_v30 = vadd.f32 1.0, %v4176_v48  ;;  %v3339_v23 = vmul.f32 -1.442695, %v4758_v53  ;;  %v3346_v28 = vmul.f32 -1.442695, %v4770_v21 }
  0xa0   : > { %v4180_v9 = vpop.eup %4179  ;;  %4205 = vrcp.f32 %v680_v54  ;;  %v660_v59 = vadd.f32 1.0, %v4178_v42  ;;  %v3358_v54 = vmul.f32 -1.442695, %v4779_v41  ;;  %v4803_v42 = vadd.f32 %v4618_v25, %v499_v45 }
  0xa1   : > { %v4182_v58 = vpop.eup %4181  ;;  %4207 = vrcp.f32 %v681_v30  ;;  %v661_v16 = vadd.f32 1.0, %v4180_v9  ;;  %v3359_v30 = vmul.f32 -1.442695, %v4784_v10  ;;  %v4818_v45 = vadd.f32 %v4618_v25, %v501_v55 }
  0xa2   : > { %v4184_v11 = vpop.eup %4183  ;;  %v4792_v17 = vmul.f32 %v4182_v58, %v4627_v27  ;;  %4209 = vrcp.f32 %v660_v59  ;;  %v3341_v55 = vmul.f32 -1.442695, %v4803_v42 }
  0xa3   : > { %v4186_v48 = vpop.eup %4185  ;;  %v4799_v19 = vmul.f32 %v4184_v11, %v4630_v1  ;;  %4211 = vrcp.f32 %v661_v16  ;;  %v3342_v11 = vmul.f32 -1.442695, %v4810_v31 }
  0xa4   : > { %v4188_v20 = vpop.eup %4187  ;;  %v4806_v27 = vmul.f32 %v4186_v48, %v4633_v18  ;;  %4213 = vpow2.f32 %v3360_v47  ;;  %v3340_v47 = vmul.f32 -1.442695, %v4796_v38  ;;  %v4837_v48 = vadd.s32 200, %v4595_v52 }
  0xa5   : > { %v4190_v9 = vpop.eup %4189  ;;  %v3936_v1 = vpack.i.bf16 %v4799_v19, %v4792_v17  ;;  %v4815_v59 = vmul.f32 %v4188_v20, %v4636_v26  ;;  %4215 = vpow2.f32 %v3361_v15 }
  0xa6   : > { %v4192_v58 = vpop.eup %4191  ;;  %v4821_v18 = vmul.f32 %v4190_v9, %v4639_v2  ;;  %4217 = vpow2.f32 %v3338_v8  ;;  %v3343_v9 = vmul.f32 -1.442695, %v4818_v45 }
  0xa7   : > { %v4194_v16 = vpop.eup %4193  ;;  %3937 = vrot.lane.b32.xlu0 %v3936_v1, %s4285_s30  ;;  %v3946_v26 = vpack.i.bf16 %v4815_v59, %v4806_v27  ;;  %v4829_v15 = vmul.f32 %v4192_v58, %v4642_v3  ;;  %4219 = vpow2.f32 %v3339_v23  ;;  %v4850_v1 = vadd.s32 56, %v4595_v52 }
  0xa8   : > { %v4196_v2 = vpop.eup %4195  ;;  %v4833_v8 = vmul.f32 %v4194_v16, %v4652_v35  ;;  %4221 = vpow2.f32 %v3358_v54  ;;  %v4853_v58 = vadd.s32 216, %v4595_v52 }
  0xa9   : > { %v4198_v20 = vpop.eup %4197  ;;  %3947 = vrot.lane.b32.xlu1 %v3946_v26, %s4285_s30  ;;  %v3941_v3 = vpack.i.bf16 %v4829_v15, %v4821_v18  ;;  %v4843_v23 = vmul.f32 %v4196_v2, %v4656_v37  ;;  %4223 = vpow2.f32 %v3359_v30  ;;  %v520_v2 = vmul.f32 %v4604_v5, %v4552_v56 }
  0xaa   : > { %v4200_v35 = vpop.eup %4199  ;;  %v4847_v54 = vmul.f32 %v4198_v20, %v4662_v40  ;;  %4225 = vpow2.f32 %v3340_v47  ;;  %v4862_v40 = vadd.s32 72, %v4595_v52  ;;  %v521_v20 = vmul.f32 %v4604_v5, %v4560_v4 }
  0xab   : > { %v4202_v16 = vpop.eup %4201  ;;  %3942 = vrot.lane.b32.xlu0 %v3941_v3, %s4285_s30  ;;  %v3951_v37 = vpack.i.bf16 %v4843_v23, %v4833_v8  ;;  %v4859_v30 = vmul.f32 %v4200_v35, %v4668_v44  ;;  %4227 = vpow2.f32 %v3341_v55  ;;  %v4885_v4 = vadd.s32 232, %v4595_v52 }
  0xac   : > { %v4204_v47 = vpop.eup %4203  ;;  %v4865_v26 = vmul.f32 %v4202_v16, %v4674_v49  ;;  %4229 = vpow2.f32 %v3342_v11  ;;  %v4878_v49 = vadd.s32 88, %v4595_v52  ;;  %v4888_v5 = vadd.s32 248, %v4595_v52 }
  0xad   : > { %v4206_v3 = vpop.eup %4205  ;;  %3952 = vrot.lane.b32.xlu1 %v3951_v37, %s4285_s30  ;;  %v3956_v44 = vpack.i.bf16 %v4859_v30, %v4847_v54  ;;  %v4875_v55 = vmul.f32 %v4204_v47, %v4680_v51  ;;  %4231 = vpow2.f32 %v3343_v9  ;;  %v4902_v56 = vadd.f32 %v4618_v25, %v520_v2 }
  0xae   : > { %6173 = vst [vmem:[#allocation7_spill] sm:$0xff] %v4878_v49  ;;  %v4208_v11 = vpop.eup %4207  ;;  %v4881_v35 = vmul.f32 %v4206_v3, %v4686_v57  ;;  %6174 = vst [vmem:[#allocation8_spill] sm:$0xff] %v4888_v5  ;;  %v4905_v50 = vadd.f32 %v4618_v25, %v521_v20  ;;  %v3347_v5 = vmul.f32 -1.442695, %v4773_v0  ;;  %v6163_v21 = vrot.slane %v4847_v54, 1 }
  0xaf   : > { %v4210_v16 = vpop.eup %4209  ;;  %3957 = vrot.lane.b32.xlu0 %v3956_v44, %s4285_s30  ;;  %v3961_v51 = vpack.i.bf16 %v4875_v55, %v4865_v26  ;;  %v4894_v9 = vmul.f32 %v4208_v11, %v4690_v7  ;;  %6175 = vst [vmem:[#allocation9_spill] sm:$0xff] %v4902_v56  ;;  %v3362_v20 = vmul.f32 -1.442695, %v4902_v56  ;;  %v6166_v49 = vrot.slane %v4821_v18, 1 }
  0xb0   : > { %v4212_v47 = vpop.eup %4211  ;;  %v4899_v3 = vmul.f32 %v4210_v16, %v4694_v62  ;;  %6176 = vst [vmem:[#allocation10_spill] sm:$0xff] %v4905_v50  ;;  %v4926_v16 = vadd.s32 104, %v4595_v52  ;;  %v3363_v62 = vmul.f32 -1.442695, %v4905_v50  ;;  %v1234_v50 = vrot.slane %v4815_v59, 7 }
  0xb1   : > { %v4214_v43 = vpop.eup %4213  ;;  %3962 = vrot.lane.b32.xlu1 %v3961_v51, %s4285_s30  ;;  %v3976_v7 = vpack.i.bf16 %v4894_v9, %v4881_v35  ;;  %v4912_v11 = vmul.f32 %v4212_v47, %v4698_v63  ;;  %v4920_v51 = vadd.s32 120, %v4595_v52  ;;  %v6164_v12 = vrot.slane %v4833_v8, 1 }
  0xb2   : > { %v4216_v2 = vpop.eup %4215  ;;  %v684_v37 = vadd.f32 1.0, %v4214_v43 }
  0xb3   : > { %v4218_v44 = vpop.eup %4217  ;;  %3977 = vrot.lane.b32.xlu0 %v3976_v7, %s4285_s30  ;;  %v3966_v63 = vpack.i.bf16 %v4912_v11, %v4899_v3  ;;  %v685_v47 = vadd.f32 1.0, %v4216_v2 }
  0xb4   : > { %v4220_v43 = vpop.eup %4219  ;;  %4233 = vrcp.f32 %v684_v37  ;;  %v662_v25 = vadd.f32 1.0, %v4218_v44  ;;  %v3345_v37 = vmul.f32 -1.442695, %v4749_v34 }
  0xb5   : > { %v4222_v57 = vpop.eup %4221  ;;  %3967 = vrot.lane.b32.xlu1 %v3966_v63, %s4285_s30  ;;  %4235 = vrcp.f32 %v685_v47  ;;  %v663_v7 = vadd.f32 1.0, %v4220_v43  ;;  %v1250_v47 = vrot.slane %v4799_v19, 7 }
  0xb6   : > { %v4224_v44 = vpop.eup %4223  ;;  %4237 = vrcp.f32 %v662_v25  ;;  %v682_v33 = vadd.f32 1.0, %v4222_v57  ;;  %v1445_v57 = vrot.slane %v4829_v15, 1 }
  0xb7   : > { %v4226_v63 = vpop.eup %4225  ;;  %4239 = vrcp.f32 %v663_v7  ;;  %v683_v32 = vadd.f32 1.0, %v4224_v44  ;;  %v6167_v7 = vrot.slane %v4815_v59, 1 }
  0xb8   : > { %v4228_v43 = vpop.eup %4227  ;;  %4241 = vrcp.f32 %v682_v33  ;;  %v664_v34 = vadd.f32 1.0, %v4226_v63  ;;  %v6179_v33 = vrot.slane %v4792_v17, 7 }
  0xb9   : > { %v4230_v25 = vpop.eup %4229  ;;  %4243 = vrcp.f32 %v683_v32  ;;  %v665_v0 = vadd.f32 1.0, %v4228_v43  ;;  %v6181_v32 = vand.u32 15, %v4706_v14  ;;  %v1470_v14 = vsel %vm1458_vm1, %v1445_v57, %v6163_v21 }
  0xba   : > { %v4232_v56 = vpop.eup %4231  ;;  %4245 = vrcp.f32 %v664_v34  ;;  %v666_v44 = vadd.f32 1.0, %v4230_v25  ;;  %v4955_v63 = vsel %vm1265_vm2, %v6179_v33, %v1250_v47  ;;  %v1251_v25 = vrot.slane %v4821_v18, 7 }
  0xbb   : > { %4247 = vrcp.f32 %v665_v0  ;;  %v667_v29 = vadd.f32 1.0, %v4232_v56  ;;  %6180 = vst [vmem:[#allocation11_spill] sm:$0xff] %v4955_v63  ;;  %vm4959_vm4 = vcmp.lt.s32.totalorder %v6181_v32, 15  ;;  %v6184_v0 = vrot.slane %v4806_v27, 7 }
  0xbc   : > { %4249 = vrcp.f32 %v666_v44  ;;  %v1252_v33 = vrot.slane %v4829_v15, 7  ;;  %v1235_v32 = vrot.slane %v4833_v8, 7  ;;  %v1471_v44 = vsel %vm1458_vm1, %v6166_v49, %v1445_v57 }
  0xbd   : > { %v4968_v56 = vsel %vm1265_vm2, %v6184_v0, %v1234_v50  ;;  %4251 = vrcp.f32 %v667_v29  ;;  %v4983_v0 = vsel %vm1265_vm2, %v1250_v47, %v1251_v25  ;;  %v6165_v34 = vrot.slane %v4843_v23, 7 }
  0xbe   : > { %4253 = vpow2.f32 %v3362_v20  ;;  %v4992_v29 = vsel %vm1458_vm1, %v6167_v7, %v6164_v12  ;;  %v6185_v15 = vand.u32 15, %v4710_v22  ;;  %v5002_v20 = vsel %vm1265_vm2, %v1251_v25, %v1252_v33 }
  0xbf   : > { %4255 = vpow2.f32 %v3363_v62  ;;  %v5006_v47 = vsel %vm1265_vm2, %v1234_v50, %v1235_v32  ;;  %v1574_v57 = vsel %vm4934_vm3, %v1470_v14, 0.0  ;;  %v6188_v22 = vand.u32 15, %v4713_v24 }
  0xc0   : > { %vm4996_vm5 = vcmp.lt.s32.totalorder %v6185_v15, 15  ;;  %v6191_v62 = vand.u32 15, %v4717_v6  ;;  %4257 = vpow2.f32 %v3344_v36  ;;  %v5027_v50 = vsel %vm1265_vm2, %v1235_v32, %v6165_v34  ;;  %v4096_v6 = vld [vmem:[%s6152_s4 + $0x58] sm:$0xff]  }
  0xc1   : > { %vm5013_vm6 = vcmp.lt.s32.totalorder %v6188_v22, 15  ;;  %6194 = vst [vmem:[#allocation12_spill] sm:$0xff] %v5027_v50  ;;  %v4234_v2 = vpop.eup %4233  ;;  %4259 = vpow2.f32 %v3345_v37  ;;  %v1253_v14 = vrot.slane %v4847_v54, 7  ;;  %v1254_v22 = vrot.slane %v4859_v30, 7  ;;  %3913 = vmatprep.subr.bf16.mxu1 %v4096_v6  ;;  %3781 = vmatprep.subr.bf16.mxu0 %v4096_v6 }
  0xc2   : > { %vm5019_vm7 = vcmp.lt.s32.totalorder %v6191_v62, 15  ;;  %v4236_v62 = vpop.eup %4235  ;;  %v5036_v36 = vmul.f32 %v4234_v2, %v4740_v60  ;;  %4261 = vpow2.f32 %v3346_v28  ;;  %v1255_v32 = vrot.slane %v4865_v26, 7  ;;  %3919 = vmatpush3.bf16.msra.mxu1 %v4096_v6  ;;  %3782 = vmatpush3.bf16.msra.mxu0 %v4096_v6  ;;  %v4097_v6 = vld [vmem:[%s6152_s4 + $0x50] sm:$0xff]  }
  0xc3   : > { %v6168_v34 = vrot.slane %v4875_v55, 7  ;;  %v4238_v49 = vpop.eup %4237  ;;  %v5041_v37 = vmul.f32 %v4236_v62, %v4752_v39  ;;  %4263 = vpow2.f32 %v3347_v5  ;;  %v5045_v12 = vsel %vm1265_vm2, %v1253_v14, %v1254_v22  ;;  %3914 = vmatprep.subr.bf16.mxu1 %v4097_v6  ;;  %3783 = vmatprep.subr.bf16.mxu0 %v4097_v6 }
  0xc4   : > { %v5049_v24 = vsel %vm1265_vm2, %v1252_v33, %v1253_v14  ;;  %v4240_v28 = vpop.eup %4239  ;;  %v5052_v60 = vmul.f32 %v4238_v49, %v4755_v46  ;;  %v1443_v2 = vrot.slane %v4799_v19, 1  ;;  %v1449_v39 = vrot.slane %v4875_v55, 1 }
  0xc5   : > { %v4242_v62 = vpop.eup %4241  ;;  %v3996_v7 = vpack.i.bf16 %v5041_v37, %v5036_v36  ;;  %v5060_v33 = vmul.f32 %v4240_v28, %v4758_v53  ;;  %v6195_v46 = vand.u32 15, %v4729_v61  ;;  %v5073_v19 = vsel %vm1265_vm2, %v1255_v32, %v6168_v34 }
  0xc6   : > { %6198 = vst [vmem:[#allocation13_spill] sm:$0xff] %v5073_v19  ;;  %v4244_v53 = vpop.eup %4243  ;;  %v4006_v28 = vpack.i.bf16 %v1574_v57, %v1471_v44  ;;  %v5079_v14 = vmul.f32 %v4242_v62, %v4779_v41  ;;  %v6199_v61 = vrot.slane %v4815_v59, 1  ;;  %v5089_v34 = vsel %vm1265_vm2, %v1254_v22, %v1255_v32  ;;  %3920 = vmatpush3.bf16.msra.mxu1 %v4097_v6 }
  0xc7   : > { %vm5065_vm8 = vcmp.lt.s32.totalorder %v6195_v46, 15  ;;  %v6200_v46 = vrot.slane %v4806_v27, 1  ;;  %v4246_v19 = vpop.eup %4245  ;;  %3997 = vrot.lane.b32.xlu0 %v3996_v7, %s4285_s30  ;;  %v3971_v44 = vpack.i.bf16 %v5060_v33, %v5052_v60  ;;  %v5095_v41 = vmul.f32 %v4244_v53, %v4784_v10  ;;  %3784 = vmatpush3.bf16.msra.mxu0 %v4097_v6 }
  0xc8   : > { %v1556_v59 = vsel %vm4959_vm4, %v4992_v29, 0.0  ;;  %v6201_v57 = vrot.slane %v4865_v26, 1  ;;  %v6202_v62 = vrot.slane %v4859_v30, 1  ;;  %v4248_v32 = vpop.eup %4247  ;;  %v6203_v7 = vrot.slane %v4821_v18, 1 }
  0xc9   : > { %v1489_v5 = vsel %vm1458_vm1, %v6200_v46, %v6199_v61  ;;  %v6204_v10 = vrot.slane %v4881_v35, 1  ;;  %v1429_v29 = vrot.slane %v4843_v23, 1  ;;  %v6205_v46 = vand.u32 15, %v4743_v13  ;;  %v4250_v18 = vpop.eup %4249  ;;  %3972 = vrot.lane.b32.xlu1 %v3971_v44, %s4285_s30 }
  0xca   : > { %v1468_v22 = vsel %vm1458_vm1, %v6202_v62, %v6201_v57  ;;  %v1472_v61 = vsel %vm1458_vm1, %v1443_v2, %v6203_v7  ;;  %v3981_v62 = vpack.i.bf16 %v5095_v41, %v5079_v14  ;;  %v5126_v7 = vmul.f32 %v4246_v19, %v4796_v38  ;;  %v4252_v53 = vpop.eup %4251 }
  0xcb   : > { %v1466_v43 = vsel %vm1458_vm1, %v1449_v39, %v6204_v10  ;;  %vm5118_vm9 = vcmp.lt.s32.totalorder %v6205_v46, 15  ;;  %v5129_v10 = vmul.f32 %v4248_v32, %v4803_v42  ;;  %v4098_v46 = vld [vmem:[%s6152_s4 + $0x48] sm:$0xff]   ;;  %v4011_v50 = vpack.i.bf16 %v1556_v59, %v1489_v5  ;;  %v4254_v32 = vpop.eup %4253  ;;  %4007 = vrot.lane.b32.xlu0 %v4006_v28, %s4286_s13 }
  0xcc   : > { %v6208_v44 = vrot.slane %v4859_v30, 1  ;;  %v6209_v63 = vrot.slane %v4847_v54, 1  ;;  %v1576_v42 = vsel %vm4996_vm5, %v1468_v22, 0.0  ;;  %v912_v19 = vand.u32 15, %v4926_v16  ;;  %3915 = vmatprep.subr.bf16.mxu1 %v4098_v46  ;;  %v4256_v59 = vpop.eup %4255  ;;  %3785 = vmatprep.subr.bf16.mxu0 %v4098_v46 }
  0xcd   : > { %v6210_v6 = vrot.slane %v4792_v17, 1  ;;  %v1572_v54 = vsel %vm5013_vm6, %v1472_v61, 0.0  ;;  %v6211_v30 = vrot.slane %v4865_v26, 1  ;;  %v6212_v28 = vrot.slane %v4899_v3, 1  ;;  %3921 = vmatpush3.bf16.msra.mxu1 %v4098_v46  ;;  %v4258_v26 = vpop.eup %4257  ;;  %3982 = vrot.lane.b32.xlu1 %v3981_v62, %s4285_s30  ;;  %v4099_v62 = vld [vmem:[%s6152_s4 + $0x40] sm:$0xff]  }
  0xce   : > { %v1469_v38 = vsel %vm1458_vm1, %v6209_v63, %v6208_v44  ;;  %v1578_v63 = vsel %vm5019_vm7, %v1466_v43, 0.0  ;;  %v1432_v15 = vrot.slane %v5052_v60, 1  ;;  %v686_v61 = vadd.f32 1.0, %v4254_v32  ;;  %3786 = vmatpush3.bf16.msra.mxu0 %v4098_v46  ;;  %v4260_v32 = vpop.eup %4259  ;;  %3916 = vmatprep.subr.bf16.mxu1 %v4099_v62 }
  0xcf   : > { %v1473_v5 = vsel %vm1458_vm1, %v6210_v6, %v1443_v2  ;;  %v1467_v21 = vsel %vm1458_vm1, %v6211_v30, %v1449_v39  ;;  %v5161_v22 = vsel %vm1458_vm1, %v1429_v29, %v6212_v28  ;;  %v1431_v2 = vrot.slane %v4912_v11, 1  ;;  %4012 = vrot.lane.b32.xlu0 %v4011_v50, %s4286_s13  ;;  %3787 = vmatprep.subr.bf16.mxu0 %v4099_v62 }
  0xd0   : > { %v3986_v25 = vpack.i.bf16 %v5129_v10, %v5126_v7  ;;  %v5169_v39 = vmul.f32 %v4250_v18, %v4810_v31  ;;  %v5172_v43 = vmul.f32 %v4252_v53, %v4818_v45  ;;  %v687_v44 = vadd.f32 1.0, %v4256_v59 }
  0xd1   : > { %v6213_v6 = vand.u32 15, %v4837_v48  ;;  %v4026_v28 = vpack.i.bf16 %v1576_v42, %v1469_v38  ;;  %v5183_v13 = vpack.i.bf16 %v1572_v54, %v1473_v5  ;;  %v6216_v31 = vrot.slane %v4833_v8, 1  ;;  %v4262_v48 = vpop.eup %4261  ;;  %3922 = vmatpush3.bf16.msra.mxu1 %v4099_v62 }
  0xd2   : > { %4265 = vrcp.f32 %v686_v61  ;;  %v4031_v53 = vpack.i.bf16 %v1578_v63, %v1467_v21  ;;  %v668_v18 = vadd.f32 1.0, %v4258_v26  ;;  %v669_v46 = vadd.f32 1.0, %v4260_v32  ;;  %v4264_v59 = vpop.eup %4263  ;;  %3987 = vrot.lane.b32.xlu1 %v3986_v25, %s4285_s30  ;;  %3788 = vmatpush3.bf16.msra.mxu0 %v4099_v62  ;;  %v4101_v63 = vld [vmem:[%s6152_s4 + $0x38] sm:$0xff]  }
  0xd3   : > { %vm5176_vm10 = vcmp.lt.s32.totalorder %v6213_v6, 15  ;;  %v5189_v45 = vsel %vm1458_vm1, %v6216_v31, %v1429_v29  ;;  %4267 = vrcp.f32 %v687_v44  ;;  %v1558_v38 = vsel %vm5065_vm8, %v5161_v22, 0.0  ;;  %4027 = vrot.lane.b32.xlu0 %v4026_v28, %s4286_s13  ;;  %3917 = vmatprep.subr.bf16.mxu1 %v4101_v63 }
  0xd4   : > { %v1484_v8 = vsel %vm1458_vm1, %v1431_v2, %v1432_v15  ;;  %v1451_v29 = vrot.slane %v4894_v9, 1  ;;  %v1452_v42 = vrot.slane %v5079_v14, 1  ;;  %v3991_v50 = vpack.i.bf16 %v5172_v43, %v5169_v39  ;;  %3789 = vmatprep.subr.bf16.mxu0 %v4101_v63 }
  0xd5   : > { %v6217_v5 = vand.u32 15, %v4853_v58  ;;  %4269 = vrcp.f32 %v668_v18  ;;  %v670_v54 = vadd.f32 1.0, %v4262_v48  ;;  %v671_v21 = vadd.f32 1.0, %v4264_v59  ;;  %3923 = vmatpush3.bf16.msra.mxu1 %v4101_v63  ;;  %v4102_v59 = vld [vmem:[%s6152_s4 + $0x30] sm:$0xff]  }
  0xd6   : > { %v6220_v22 = vrot.slane %v4899_v3, 1  ;;  %v6221_v26 = vand.u32 15, %v4850_v1  ;;  %v1454_v25 = vrot.slane %v5036_v36, 1  ;;  %4271 = vrcp.f32 %v669_v46  ;;  %3992 = vrot.lane.b32.xlu1 %v3991_v50, %s4285_s30  ;;  %3790 = vmatpush3.bf16.msra.mxu0 %v4101_v63 }
  0xd7   : > { %vm5206_vm11 = vcmp.lt.s32.totalorder %v6217_v5, 15  ;;  %v1257_v44 = vrot.slane %v4881_v35, 7  ;;  %v1560_v6 = vsel %vm5118_vm9, %v1484_v8, 0.0  ;;  %v1433_v62 = vrot.slane %v5060_v33, 1  ;;  %4032 = vrot.lane.b32.xlu0 %v4031_v53, %s4286_s13  ;;  %3918 = vmatprep.subr.bf16.mxu1 %v4102_v59 }
  0xd8   : > { %v1485_v61 = vsel %vm1458_vm1, %v6220_v22, %v1431_v2  ;;  %vm5219_vm12 = vcmp.lt.s32.totalorder %v6221_v26, 15  ;;  %v6224_v2 = vand.u32 15, %v4862_v40  ;;  %4273 = vrcp.f32 %v670_v54  ;;  %3791 = vmatprep.subr.bf16.mxu0 %v4102_v59 }
  0xd9   : > { %v1258_v32 = vrot.slane %v4894_v9, 7  ;;  %v1260_v31 = vrot.slane %v5095_v41, 7  ;;  %v1464_v57 = vsel %vm1458_vm1, %v1451_v29, %v1452_v42  ;;  %4275 = vrcp.f32 %v671_v21  ;;  %3924 = vmatpush3.bf16.msra.mxu1 %v4102_v59  ;;  %v5400_v9 = vld [vmem:[%s6152_s4 + $0x28] sm:$0xff]  }
  0xda   : > { %vm5231_vm13 = vcmp.lt.s32.totalorder %v6224_v2, 15  ;;  %v6227_v28 = vrot.slane %v4875_v55, 7  ;;  %v1453_v48 = vrot.slane %v5095_v41, 1  ;;  %v1237_v46 = vrot.slane %v4899_v3, 7  ;;  %4002 = vrot.lane.b32.xlu1 %v5183_v13, %s4286_s13  ;;  %3792 = vmatpush3.bf16.msra.mxu0 %v4102_v59 }
  0xdb   : > { %v5253_v18 = vsel %vm1265_vm2, %v1257_v44, %v1258_v32  ;;  %v1238_v55 = vrot.slane %v4912_v11, 7  ;;  %v4036_v8 = vpack.i.bf16 %v1560_v6, %v1485_v61  ;;  %v1434_v50 = vrot.slane %v5126_v7, 1  ;;  %3825 = vmatprep.subr.bf16.mxu1 %v5400_v9 }
  0xdc   : > { %v5245_v40 = vsel %vm1265_vm2, %v6227_v28, %v1257_v44  ;;  %v1435_v5 = vrot.slane %v5129_v10, 1  ;;  %v1261_v54 = vrot.slane %v5036_v36, 7  ;;  %v1436_v21 = vrot.slane %v5169_v39, 1 }
  0xdd   : > { %v5267_v3 = vsel %vm1265_vm2, %v1237_v46, %v1238_v55  ;;  %v6228_v11 = vrot.slane %v4843_v23, 7  ;;  %v1262_v22 = vrot.slane %v5041_v37, 7  ;;  %v6229_v61 = vrot.slane %v4881_v35, 1  ;;  %4037 = vrot.lane.b32.xlu0 %v4036_v8, %s4286_s13  ;;  %v6239_v8 = vld [vmem:[#allocation9_spill] sm:$0xff] }
  0xde   : > { %v1580_v26 = vsel %vm5176_vm10, %v1464_v57, 0.0  ;;  %v5286_v23 = vsel %vm1265_vm2, %v1260_v31, %v1261_v54  ;;  %v1239_v44 = vrot.slane %v5052_v60, 7  ;;  %v4016_v35 = vpack.i.bf16 %v1558_v38, %v5189_v45 }
  0xdf   : > { %v5273_v63 = vsel %vm1265_vm2, %v6228_v11, %v1237_v46  ;;  %v1465_v53 = vsel %vm1458_vm1, %v6229_v61, %v1451_v29  ;;  %v1462_v30 = vsel %vm1458_vm1, %v1453_v48, %v1454_v25  ;;  %v5300_v29 = vsel %vm1265_vm2, %v1261_v54, %v1262_v22  ;;  %v4266_v28 = vpop.eup %4265  ;;  %v6233_v54 = vld [vmem:[#allocation7_spill] sm:$0xff] }
  0xe0   : > { %v1240_v6 = vrot.slane %v5060_v33, 7  ;;  %v1482_v2 = vsel %vm1458_vm1, %v1433_v62, %v1434_v50  ;;  %v6230_v13 = vand.u32 15, %v4885_v4  ;;  %v1455_v38 = vrot.slane %v5041_v37, 1  ;;  %4017 = vrot.lane.b32.xlu1 %v4016_v35, %s4286_s13 }
  0xe1   : > { %v5314_v57 = vsel %vm1265_vm2, %v1238_v55, %v1239_v44  ;;  %v4051_v46 = vpack.i.bf16 %v1580_v26, %v1465_v53  ;;  %v1463_v59 = vsel %vm1458_vm1, %v1452_v42, %v1453_v48  ;;  %v1480_v4 = vsel %vm1458_vm1, %v1435_v5, %v1436_v21  ;;  %v4268_v48 = vpop.eup %4267 }
  0xe2   : > { %vm5307_vm14 = vcmp.lt.s32.totalorder %v6230_v13, 15  ;;  %v6234_v11 = vand.u32 15, %v6233_v54  ;;  %vm5331_vm3 = vcmp.lt.s32.totalorder %v912_v19, 15  ;;  %v5339_v42 = vsel %vm1265_vm2, %v1239_v44, %v1240_v6  ;;  %v6240_v19 = vld [vmem:[#allocation10_spill] sm:$0xff]  ;;  %v4270_v60 = vpop.eup %4269 }
  0xe3   : > { %v5342_v53 = vmul.f32 %v4266_v28, %v6239_v8  ;;  %v1582_v26 = vsel %vm5206_vm11, %v1462_v30, 0.0  ;;  %v1437_v13 = vrot.slane %v5172_v43, 1  ;;  %v1259_v16 = vrot.slane %v5079_v14, 7  ;;  %v6241_v30 = vld [vmem:[#allocation8_spill] sm:$0xff]  ;;  %4052 = vrot.lane.b32.xlu0 %v4051_v46, %s4286_s13 }
  0xe4   : > { %vm5325_vm15 = vcmp.lt.s32.totalorder %v6234_v11, 15  ;;  %v5350_v54 = vmul.f32 %v4268_v48, %v6240_v19  ;;  %v1483_v44 = vsel %vm1458_vm1, %v1432_v15, %v1433_v62  ;;  %v1562_v28 = vsel %vm5219_vm12, %v1482_v2, 0.0  ;;  %v6248_v2 = vld [vmem:[#allocation3_spill] sm:$0xff] }
  0xe5   : > { %v1481_v49 = vsel %vm1458_vm1, %v1434_v50, %v1435_v5  ;;  %v6242_v11 = vand.u32 15, %v6241_v30  ;;  %v6245_v35 = vand.u32 15, %v4920_v51  ;;  %v1564_v15 = vsel %vm5231_vm13, %v1480_v4, 0.0  ;;  %v4272_v50 = vpop.eup %4271 }
  0xe6   : > { %v1456_v58 = vrot.slane %v5342_v53, 1  ;;  %v5379_v62 = vsel %vm1265_vm2, %v1259_v16, %v1260_v31  ;;  %v5385_v51 = vsel %vm1265_vm2, %v1258_v32, %v1259_v16  ;;  %v4021_v5 = vpack.i.bf16 %v5350_v54, %v5342_v53  ;;  %v5405_v32 = vld [vmem:[%s6152_s4 + $0x88] sm:$0xff]   ;;  %v4274_v31 = vpop.eup %4273 }
  0xe7   : > { %vm5362_vm4 = vcmp.lt.s32.totalorder %v6242_v11, 15  ;;  %vm5368_vm5 = vcmp.lt.s32.totalorder %v6245_v35, 15  ;;  %v4056_v1 = vpack.i.bf16 %v1582_v26, %v1463_v59  ;;  %v5391_v4 = vmul.f32 %v4270_v60, %v6248_v2  ;;  %v6249_v59 = vld [vmem:[#allocation4_spill] sm:$0xff]  ;;  %v4276_v26 = vpop.eup %4275  ;;  %v6250_v11 = vld [vmem:[#allocation5_spill] sm:$0xff]  ;;  %3869 = vmatprep.subr.bf16.mxu0 %v5405_v32 }
  0xe8   : > { %v1461_v41 = vsel %vm1458_vm1, %v1454_v25, %v1455_v38  ;;  %v4041_v46 = vpack.i.bf16 %v1562_v28, %v1483_v44  ;;  %v5408_v8 = vmul.f32 %v4272_v50, %v6249_v59  ;;  %v1479_v36 = vsel %vm1458_vm1, %v1436_v21, %v1437_v13  ;;  %4022 = vrot.lane.b32.xlu1 %v4021_v5, %s4285_s30  ;;  %v6251_v28 = vld [vmem:[#allocation6_spill] sm:$0xff] }
  0xe9   : > { %v1457_v25 = vrot.slane %v5350_v54, 1  ;;  %v4061_v16 = vpack.i.bf16 %v1564_v15, %v1481_v49  ;;  %v1438_v19 = vrot.slane %v5391_v4, 1  ;;  %v1460_v30 = vsel %vm1458_vm1, %v1455_v38, %v1456_v58  ;;  %4057 = vrot.lane.b32.xlu0 %v4056_v1, %s4286_s13 }
  0xea   : > { %v766_v35 = vmul.f32 %v4274_v31, %v6250_v11  ;;  %v1264_v44 = vrot.slane %v5350_v54, 7  ;;  %v4046_v21 = vpack.i.bf16 %v5408_v8, %v5391_v4  ;;  %v767_v60 = vmul.f32 %v4276_v26, %v6251_v28 }
  0xeb   : > { %v1241_v50 = vrot.slane %v5126_v7, 7  ;;  %v1478_v38 = vsel %vm1458_vm1, %v1437_v13, %v1438_v19  ;;  %v1439_v15 = vrot.slane %v5408_v8, 1  ;;  %v1242_v5 = vrot.slane %v5129_v10, 7 }
  0xec   : > { %v1440_v49 = vrot.slane %v766_v35, 1  ;;  %v1584_v54 = vsel %vm5307_vm14, %v1460_v30, 0.0  ;;  %v1248_v2 = vrot.slane %v767_v60, 7  ;;  %v4071_v31 = vpack.i.bf16 %v767_v60, %v766_v35  ;;  %4042 = vrot.lane.b32.xlu1 %v4041_v46, %s4286_s13 }
  0xed   : > { %v1459_v7 = vsel %vm1458_vm1, %v1456_v58, %v1457_v25  ;;  %v6252_v1 = vrot.slane %v4806_v27, 1  ;;  %v1441_v59 = vrot.slane %v767_v60, 1  ;;  %v1477_v10 = vsel %vm1458_vm1, %v1438_v19, %v1439_v15  ;;  %4062 = vrot.lane.b32.xlu0 %v4061_v16, %s4286_s13 }
  0xee   : > { %v1476_v26 = vsel %vm1458_vm1, %v1439_v15, %v1440_v49  ;;  %v1566_v45 = vsel %vm5325_vm15, %v1478_v38, 0.0  ;;  %v6253_v46 = vrot.slane %v4792_v17, 7  ;;  %v4076_v19 = vpack.i.bf16 %v1584_v54, %v1461_v41 }
  0xef   : > { %v1490_v13 = vsel %vm1458_vm1, %v1457_v25, %v6252_v1  ;;  %v1568_v58 = vsel %vm5331_vm3, %v1476_v26, 0.0  ;;  %v6254_v25 = vrot.slane %v4806_v27, 7  ;;  %v6255_v61 = vrot.slane %v4792_v17, 1 }
  0xf0   : > { %v5451_v30 = vsel %vm1265_vm2, %v1248_v2, %v6253_v46  ;;  %v1475_v28 = vsel %vm1458_vm1, %v1440_v49, %v1441_v59  ;;  %v4086_v60 = vpack.i.bf16 %v1568_v58, %v1477_v10  ;;  %v1586_v38 = vsel %vm5362_vm4, %v1490_v13, 0.0  ;;  %4047 = vrot.lane.b32.xlu1 %v4046_v21, %s4285_s30 }
  0xf1   : > { %v5457_v11 = vsel %vm1265_vm2, %v1264_v44, %v6254_v25  ;;  %v1474_v55 = vsel %vm1458_vm1, %v1441_v59, %v6255_v61  ;;  %v5472_v15 = vsel %vm1265_vm2, %v1241_v50, %v1242_v5  ;;  %v5478_v17 = vsel %vm1265_vm2, %v1240_v6, %v1241_v50  ;;  %4077 = vrot.lane.b32.xlu0 %v4076_v19, %s4286_s13 }
  0xf2   : > { %v1570_v27 = vsel %vm5368_vm5, %v1474_v55, 0.0  ;;  %v4066_v41 = vpack.i.bf16 %v1566_v45, %v1479_v36  ;;  %v1243_v14 = vrot.slane %v5169_v39, 7  ;;  %v1244_v49 = vrot.slane %v5172_v43, 7 }
  0xf3   : > { %v4091_v16 = vpack.i.bf16 %v1570_v27, %v1475_v28  ;;  %v1263_v48 = vrot.slane %v5342_v53, 7  ;;  %v4081_v54 = vpack.i.bf16 %v1586_v38, %v1459_v7  ;;  %v1245_v6 = vrot.slane %v5391_v4, 7 }
  0xf4   : > { %v5487_v33 = vsel %vm1265_vm2, %v1242_v5, %v1243_v14  ;;  %v5492_v21 = vsel %vm1265_vm2, %v1243_v14, %v1244_v49  ;;  %4067 = vrot.lane.b32.xlu1 %v4066_v41, %s4286_s13  ;;  %v1246_v53 = vrot.slane %v5408_v8, 7  ;;  %v1247_v36 = vrot.slane %v766_v35, 7 }
  0xf5   : > { %v5496_v39 = vsel %vm1265_vm2, %v1263_v48, %v1264_v44  ;;  %v5502_v43 = vsel %vm1265_vm2, %v1262_v22, %v1263_v48  ;;  %v5508_v4 = vsel %vm1265_vm2, %v1244_v49, %v1245_v6  ;;  %4082 = vrot.lane.b32.xlu0 %v4081_v54, %s4286_s13  ;;  %vm267_vm1 = vcmask 781312  }
  0xf6   : > { %6256 = vst [vmem:[#allocation7_spill] sm:$0xff] %v5508_v4  ;;  %v5513_v44 = vsel %vm1265_vm2, %v1245_v6, %v1246_v53  ;;  %v5517_v37 = vsel %vm1265_vm2, %v1247_v36, %v1248_v2  ;;  %v5521_v22 = vsel %vm1265_vm2, %v1246_v53, %v1247_v36  ;;  %v4287_v8 = vmov 0  }
  0xf7   : > { %6257 = vst [vmem:[#allocation9_spill] sm:$0xff] %v5513_v44  ;;  %6258 = vst [vmem:[#allocation10_spill] sm:$0xff] %v5517_v37  ;;  %v801_v1 = vadd.s32 128, %v4595_v52  ;;  %v787_v13 = vadd.s32 16, %v4595_v52  ;;  %v805_v10 = vadd.s32 160, %v4595_v52  ;;  %v807_v45 = vadd.s32 176, %v4595_v52 }
  0xf8   : > { %6259 = vst [vmem:[#allocation8_spill] sm:$0xff] %v5521_v22  ;;  %4072 = vrot.lane.b32.xlu1 %v4071_v31, %s4285_s30  ;;  %268 = vst.msk [vmem:[#allocation2] sm:$0xf] %vm267_vm1, %v4287_v8  ;;  %v803_v31 = vadd.s32 144, %v4595_v52  ;;  %v809_v58 = vadd.s32 192, %v4595_v52  ;;  %v789_v46 = vadd.s32 32, %v4595_v52 }
  0xf9   : > { %269 = vst.msk [vmem:[#allocation2 + $0x4] sm:$0xf] %vm267_vm1, %v4287_v8  ;;  %270 = vst.msk [vmem:[#allocation2 + $0x88] sm:$0xf] %vm267_vm1, %v4287_v8  ;;  %4087 = vrot.lane.b32.xlu0 %v4086_v60, %s4286_s13  ;;  %v813_v25 = vadd.s32 224, %v4595_v52  ;;  %v791_v19 = vadd.s32 48, %v4595_v52 }
  0xfa   : > { %271 = vst.msk [vmem:[#allocation2 + $0x8c] sm:$0xf] %vm267_vm1, %v4287_v8  ;;  %v947_v26 = vand.u32 15, %v803_v31  ;;  %v811_v61 = vadd.s32 208, %v4595_v52  ;;  %v933_v55 = vand.u32 15, %v801_v1  ;;  %v835_v28 = vand.u32 15, %v787_v13 }
  0xfb   : > { %v821_v38 = vand.u32 15, %v4595_v52  ;;  %v961_v41 = vand.u32 15, %v805_v10  ;;  %v989_v14 = vand.u32 15, %v809_v58  ;;  %v849_v49 = vand.u32 15, %v789_v46 }
  0xfc   : > { %4092 = vrot.lane.b32.xlu1 %v4091_v16, %s4286_s13  ;;  %vm5555_vm2 = vcmp.gt.s32.totalorder %v947_v26, 0  ;;  %v975_v16 = vand.u32 15, %v807_v45  ;;  %v1017_v54 = vand.u32 15, %v813_v25  ;;  %v793_v6 = vadd.s32 64, %v4595_v52 }
  0xfd   : > { %v863_v53 = vand.u32 15, %v791_v19  ;;  %v1003_v36 = vand.u32 15, %v811_v61  ;;  %vm5562_vm6 = vcmp.gt.s32.totalorder %v933_v55, 0  ;;  %vm5566_vm7 = vcmp.gt.s32.totalorder %v835_v28, 0 }
  0xfe   : > { %vm5570_vm8 = vcmp.gt.s32.totalorder %v821_v38, 0  ;;  %v1380_v13 = vsel %vm5555_vm2, %v4983_v0, 0.0  ;;  %vm5577_vm9 = vcmp.gt.s32.totalorder %v961_v41, 0  ;;  %vm5581_vm10 = vcmp.gt.s32.totalorder %v975_v16, 0 }
  0xff   : > { %vm5585_vm11 = vcmp.gt.s32.totalorder %v989_v14, 0  ;;  %vm5589_vm12 = vcmp.gt.s32.totalorder %v849_v49, 0  ;;  %vm5593_vm13 = vcmp.gt.s32.totalorder %v1017_v54, 0  ;;  %v877_v25 = vand.u32 15, %v793_v6 }
 0x100   : > { %vm5602_vm14 = vcmp.gt.s32.totalorder %v863_v53, 0  ;;  %vm5606_vm15 = vcmp.gt.s32.totalorder %v1003_v36, 0  ;;  %v795_v28 = vadd.s32 80, %v4595_v52  ;;  %v1382_v41 = vsel %vm5577_vm9, %v5049_v24, 0.0 }
 0x101   : > { %vm1875_vm3 = vcmask 523264   ;;  %vm5636_vm4 = vcmp.gt.s32.totalorder %v877_v25, 0  ;;  %v5641_v26 = vadd.s32 240, %v4595_v52  ;;  %v5644_v16 = vadd.s32 96, %v4595_v52 }
 0x102   : > { %v1378_v44 = vsel %vm5562_vm6, %v5451_v30, 0.0  ;;  %vm2243_vm2 = vcmask 785408   ;;  %v6291_v10 = vsel %vm5585_vm11, %v5245_v40, 0.0  ;;  %v6292_v40 = vsel %vm5589_vm12, %v5273_v63, 0.0 }
 0x119   : > { %v5530_v35 = vpop.permute.xlu0 %3937 }
 0x11b   : > { %v5532_v50 = vpop.permute.xlu1 %3947 }
 0x11c   : > { %v3950_v24 = vunpack.i.h.bf16 %v5532_v50  ;;  %v3949_v19 = vunpack.i.l.bf16 %v5532_v50 }
 0x11d   : > { %v5534_v5 = vpop.permute.xlu0 %3942 }
 0x11e   : > { %v3945_v38 = vunpack.i.h.bf16 %v5534_v5  ;;  %v3944_v27 = vunpack.i.l.bf16 %v5534_v5  ;;  %v891_v5 = vand.u32 15, %v795_v28  ;;  %v1362_v28 = vsel %vm5570_vm8, %v5457_v11, 0.0 }
 0x11f   : > { %v5536_v2 = vpop.permute.xlu1 %3952  ;;  %v1843_v1 = vsel %vm306_vm0, %v1362_v28, %v3949_v19 }
 0x120   : > { %v1862_v53 = vsel %vm306_vm0, %v5002_v20, %v3945_v38  ;;  %v1861_v25 = vsel %vm306_vm0, %v1380_v13, %v3944_v27  ;;  %v1370_v20 = vsel %vm5636_vm4, %v5478_v17, 0.0  ;;  %v1031_v38 = vand.u32 15, %v5641_v26  ;;  %v5819_v17 = vld [vmem:[%s6152_s4 + $0x80] sm:$0xff]  }
 0x121   : > { %v5539_v7 = vpop.permute.xlu0 %3957  ;;  %vm5665_vm5 = vcmp.gt.s32.totalorder %v891_v5, 0  ;;  %v3940_v5 = vunpack.i.h.bf16 %v5530_v35 }
 0x122   : > { %vm5765_vm6 = vcmp.gt.s32.totalorder %v1031_v38, 0 }
 0x123   : > { %v5543_v59 = vpop.permute.xlu1 %3962 }
 0x125   : > { %v5552_v60 = vpop.permute.xlu0 %3977 }
 0x127   : > { %v5559_v48 = vpop.permute.xlu1 %3967 }
 0x139   : > { %v5597_v0 = vpop.permute.xlu0 %3997 }
 0x13b   : > { %v5619_v14 = vpop.permute.xlu1 %3972 }
 0x13c   : > { %v3974_v63 = vunpack.i.l.bf16 %v5619_v14 }
 0x13d   : > { %v4008_v6 = vpop.permute.xlu0 %4007 }
 0x13e   : > { %v4010_v54 = vunpack.i.h.bf16 %v4008_v6  ;;  %v4009_v49 = vunpack.i.l.bf16 %v4008_v6 }
 0x13f   : > { %v5651_v37 = vpop.permute.xlu1 %3982 }
 0x140   : > { %v1894_v6 = vsel %vm1875_vm3, %v1861_v25, %v4009_v49  ;;  %v1895_v22 = vsel %vm1875_vm3, %v1862_v53, %v4010_v54  ;;  %v3960_v49 = vunpack.i.h.bf16 %v5539_v7  ;;  %v3959_v54 = vunpack.i.l.bf16 %v5539_v7  ;;  %v6287_v7 = vld [vmem:[#allocation12_spill] sm:$0xff] }
 0x141   : > { %v3574_v50 = vpack.c.bf16 %v1894_v6, %v1894_v6  ;;  %v3575_v4 = vpack.c.bf16 %v1895_v22, %v1895_v22  ;;  %v4013_v13 = vpop.permute.xlu0 %4012  ;;  %v1844_v22 = vsel %vm306_vm0, %v4968_v56, %v3950_v24  ;;  %v3939_v25 = vunpack.i.l.bf16 %v5530_v35 }
 0x142   : > { %v4015_v27 = vunpack.i.h.bf16 %v4013_v13  ;;  %v4014_v8 = vunpack.i.l.bf16 %v4013_v13  ;;  %v3954_v13 = vunpack.i.l.bf16 %v5536_v2 }
 0x143   : > { %2054 = vst.msk [vmem:[#allocation2 + $0x50] sm:$0xf] %vm267_vm1, %v3574_v50  ;;  %2055 = vst.msk [vmem:[#allocation2 + $0x54] sm:$0xf] %vm267_vm1, %v3575_v4  ;;  %v5687_v4 = vadd.s32 112, %v4595_v52  ;;  %v3955_v50 = vunpack.i.h.bf16 %v5536_v2  ;;  %v6286_v2 = vld [vmem:[#allocation11_spill] sm:$0xff] }
 0x144   : > { %v5677_v53 = vpop.permute.xlu1 %3987  ;;  %v1876_v6 = vsel %vm1875_vm3, %v1843_v1, %v4014_v8  ;;  %v1877_v19 = vsel %vm1875_vm3, %v1844_v22, %v4015_v27  ;;  %v1864_v27 = vsel %vm306_vm0, %v5045_v12, %v3960_v49  ;;  %v1863_v8 = vsel %vm306_vm0, %v1382_v41, %v3959_v54 }
 0x145   : > { %v3556_v28 = vpack.c.bf16 %v1876_v6, %v1876_v6  ;;  %v3557_v56 = vpack.c.bf16 %v1877_v19, %v1877_v19  ;;  %v4028_v24 = vpop.permute.xlu0 %4027  ;;  %v3965_v1 = vunpack.i.h.bf16 %v5543_v59  ;;  %v3964_v22 = vunpack.i.l.bf16 %v5543_v59 }
 0x146   : > { %v4030_v35 = vunpack.i.h.bf16 %v4028_v24  ;;  %v4029_v11 = vunpack.i.l.bf16 %v4028_v24  ;;  %v1859_v6 = vsel %vm306_vm0, %v1378_v44, %v3939_v25  ;;  %v1860_v19 = vsel %vm306_vm0, %v6286_v2, %v3940_v5 }
 0x147   : > { %2036 = vst.msk [vmem:[#allocation2 + $0x8] sm:$0xf] %vm267_vm1, %v3556_v28  ;;  %2037 = vst.msk [vmem:[#allocation2 + $0xc] sm:$0xf] %vm267_vm1, %v3557_v56  ;;  %v3980_v41 = vunpack.i.h.bf16 %v5552_v60  ;;  %v3979_v49 = vunpack.i.l.bf16 %v5552_v60  ;;  %v1846_v56 = vsel %vm306_vm0, %v6287_v7, %v3955_v50  ;;  %v6288_v44 = vsel %vm5566_vm7, %v5006_v47, 0.0 }
 0x148   : > { %v5698_v52 = vpop.permute.xlu1 %3992  ;;  %v1897_v24 = vsel %vm1875_vm3, %v1864_v27, %v4030_v35  ;;  %v1896_v12 = vsel %vm1875_vm3, %v1863_v8, %v4029_v11  ;;  %v1845_v5 = vsel %vm306_vm0, %v6288_v44, %v3954_v13  ;;  %v6289_v27 = vld [vmem:[#allocation13_spill] sm:$0xff]  ;;  %v6290_v60 = vsel %vm5581_vm10, %v5089_v34, 0.0 }
 0x149   : > { %v3577_v59 = vpack.c.bf16 %v1897_v24, %v1897_v24  ;;  %v3576_v54 = vpack.c.bf16 %v1896_v12, %v1896_v12  ;;  %v4033_v28 = vpop.permute.xlu0 %4032  ;;  %v1866_v11 = vsel %vm306_vm0, %v6289_v27, %v3965_v1  ;;  %v1865_v8 = vsel %vm306_vm0, %v6290_v60, %v3964_v22 }
 0x14a   : > { %v4035_v25 = vunpack.i.h.bf16 %v4033_v28  ;;  %v4034_v35 = vunpack.i.l.bf16 %v4033_v28  ;;  %v3970_v2 = vunpack.i.h.bf16 %v5559_v48  ;;  %v3969_v7 = vunpack.i.l.bf16 %v5559_v48 }
 0x14b   : > { %2057 = vst.msk [vmem:[#allocation2 + $0x5c] sm:$0xf] %vm267_vm1, %v3577_v59  ;;  %2056 = vst.msk [vmem:[#allocation2 + $0x58] sm:$0xf] %vm267_vm1, %v3576_v54  ;;  %v1868_v34 = vsel %vm306_vm0, %v5253_v18, %v3980_v41  ;;  %v1867_v48 = vsel %vm306_vm0, %v6291_v10, %v3979_v49  ;;  %v3995_v36 = vunpack.i.h.bf16 %v5698_v52 }
 0x14c   : > { %v4003_v47 = vpop.permute.xlu1 %4002  ;;  %v1899_v13 = vsel %vm1875_vm3, %v1866_v11, %v4035_v25  ;;  %v1898_v1 = vsel %vm1875_vm3, %v1865_v8, %v4034_v35  ;;  %v1848_v18 = vsel %vm306_vm0, %v5267_v3, %v3970_v2  ;;  %v1847_v45 = vsel %vm306_vm0, %v6292_v40, %v3969_v7 }
 0x14d   : > { %v4005_v31 = vunpack.i.h.bf16 %v4003_v47  ;;  %v4004_v50 = vunpack.i.l.bf16 %v4003_v47  ;;  %v3579_v22 = vpack.c.bf16 %v1899_v13, %v1899_v13  ;;  %v3578_v24 = vpack.c.bf16 %v1898_v1, %v1898_v1 }
 0x14e   : > { %v5736_v25 = vld [vmem:[#allocation2 + $0x8] sm:$0xff]   ;;  %v3975_v3 = vunpack.i.h.bf16 %v5619_v14  ;;  %v3984_v13 = vunpack.i.l.bf16 %v5651_v37 }
 0x14f   : > { %v4038_v12 = vpop.permute.xlu0 %4037  ;;  %v1893_v59 = vsel %vm1875_vm3, %v1860_v19, %v4005_v31  ;;  %v1892_v54 = vsel %vm1875_vm3, %v1859_v6, %v4004_v50  ;;  %2059 = vst.msk [vmem:[#allocation2 + $0x64] sm:$0xf] %vm267_vm1, %v3579_v22  ;;  %2058 = vst.msk [vmem:[#allocation2 + $0x60] sm:$0xf] %vm267_vm1, %v3578_v24  ;;  %3793 = vmatprep.mubr.msk.bf16.mxu0 %vm2243_vm2, %v5736_v25  ;;  %v3985_v50 = vunpack.i.h.bf16 %v5651_v37  ;;  %v919_v37 = vand.u32 15, %v5687_v4 }
 0x150   : > { %v4040_v28 = vunpack.i.h.bf16 %v4038_v12  ;;  %v4039_v44 = vunpack.i.l.bf16 %v4038_v12  ;;  %v3573_v41 = vpack.c.bf16 %v1893_v59, %v1893_v59  ;;  %v3572_v49 = vpack.c.bf16 %v1892_v54, %v1892_v54 }
 0x151   : > { %v3990_v24 = vunpack.i.h.bf16 %v5677_v53  ;;  %v3989_v12 = vunpack.i.l.bf16 %v5677_v53  ;;  %v4000_v54 = vunpack.i.h.bf16 %v5597_v0  ;;  %v6295_v53 = vsel %vm5602_vm14, %v5314_v57, 0.0  ;;  %v4110_v57 = vld [vmem:[%s6152_s4 + $0x20] sm:$0xff]  }
 0x152   : > { %v4018_v6 = vpop.permute.xlu1 %4017  ;;  %v1881_v27 = vsel %vm1875_vm3, %v1848_v18, %v4040_v28  ;;  %v1880_v11 = vsel %vm1875_vm3, %v1847_v45, %v4039_v44  ;;  %2053 = vst.msk [vmem:[#allocation2 + $0x4c] sm:$0xf] %vm267_vm1, %v3573_v41  ;;  %2052 = vst.msk [vmem:[#allocation2 + $0x48] sm:$0xf] %vm267_vm1, %v3572_v49  ;;  %v3999_v28 = vunpack.i.l.bf16 %v5597_v0  ;;  %v1849_v18 = vsel %vm306_vm0, %v6295_v53, %v3974_v63  ;;  %v4116_v53 = vld [vmem:[%s6152_s4 + $0x78] sm:$0xff]  }
 0x153   : > { %v4020_v19 = vunpack.i.h.bf16 %v4018_v6  ;;  %v4019_v35 = vunpack.i.l.bf16 %v4018_v6  ;;  %v3561_v58 = vpack.c.bf16 %v1881_v27, %v1881_v27  ;;  %v3560_v60 = vpack.c.bf16 %v1880_v11, %v1880_v11  ;;  %v5808_v11 = vld [vmem:[#allocation2 + $0x50] sm:$0xff]  }
 0x154   : > { %v1870_v40 = vsel %vm306_vm0, %v5379_v62, %v3985_v50  ;;  %v6296_v45 = vsel %vm5606_vm15, %v5385_v51, 0.0  ;;  %v1852_v51 = vsel %vm306_vm0, %v5472_v15, %v3990_v24  ;;  %v1851_v6 = vsel %vm306_vm0, %v1370_v20, %v3989_v12 }
 0x155   : > { %v4053_v8 = vpop.permute.xlu0 %4052  ;;  %v1878_v2 = vsel %vm1875_vm3, %v1845_v5, %v4019_v35  ;;  %v1879_v7 = vsel %vm1875_vm3, %v1846_v56, %v4020_v19  ;;  %2041 = vst.msk [vmem:[#allocation2 + $0x1c] sm:$0xf] %vm267_vm1, %v3561_v58  ;;  %2040 = vst.msk [vmem:[#allocation2 + $0x18] sm:$0xf] %vm267_vm1, %v3560_v60  ;;  %v1869_v0 = vsel %vm306_vm0, %v6296_v45, %v3984_v13  ;;  %v5814_v60 = vld [vmem:[#allocation2 + $0x58] sm:$0xff]   ;;  %v3994_v20 = vunpack.i.l.bf16 %v5698_v52 }
 0x156   : > { %v4055_v47 = vunpack.i.h.bf16 %v4053_v8  ;;  %v4054_v31 = vunpack.i.l.bf16 %v4053_v8  ;;  %v3558_v1 = vpack.c.bf16 %v1878_v2, %v1878_v2  ;;  %v3559_v10 = vpack.c.bf16 %v1879_v7, %v1879_v7 }
 0x157   : > { %v6297_v24 = vand.u32 15, %v5644_v16  ;;  %v6301_v16 = vsel %vm5665_vm5, %v5487_v33, 0.0  ;;  %vm5877_vm8 = vcmp.gt.s32.totalorder %v919_v37, 0 }
 0x158   : > { %v1901_v56 = vsel %vm1875_vm3, %v1868_v34, %v4055_v47  ;;  %v1900_v22 = vsel %vm1875_vm3, %v1867_v48, %v4054_v31  ;;  %2038 = vst.msk [vmem:[#allocation2 + $0x10] sm:$0xf] %vm267_vm1, %v3558_v1  ;;  %2039 = vst.msk [vmem:[#allocation2 + $0x14] sm:$0xf] %vm267_vm1, %v3559_v10  ;;  %v1850_v48 = vsel %vm306_vm0, %v5339_v42, %v3975_v3  ;;  %v1392_v31 = vsel %vm5765_vm6, %v5502_v43, 0.0 }
 0x159   : > { %v3581_v59 = vpack.c.bf16 %v1901_v56, %v1901_v56  ;;  %v3580_v26 = vpack.c.bf16 %v1900_v22, %v1900_v22  ;;  %v5799_v55 = vld [vmem:[#allocation2 + $0x48] sm:$0xff]   ;;  %v4115_v22 = vld [vmem:[%s6152_s4 + $0x18] sm:$0xff]   ;;  %vm5852_vm7 = vcmp.gt.s32.totalorder %v6297_v24, 0 }
 0x15a   : > { %v5761_v14 = vpop.permute.xlu1 %4022  ;;  %3809 = vmatprep.mubr.msk.bf16.mxu1 %vm2243_vm2, %v5799_v55 }
 0x15b   : > { %v4058_v38 = vpop.permute.xlu0 %4057  ;;  %2061 = vst.msk [vmem:[#allocation2 + $0x6c] sm:$0xf] %vm267_vm1, %v3581_v59  ;;  %2060 = vst.msk [vmem:[#allocation2 + $0x68] sm:$0xf] %vm267_vm1, %v3580_v26  ;;  %3810 = vmatmul.mubr.msk.bf16.vlgmr.msra.gmra.mxu1 %vm2243_vm2, %v5808_v11  ;;  %v4025_v1 = vunpack.i.h.bf16 %v5761_v14  ;;  %v4024_v10 = vunpack.i.l.bf16 %v5761_v14  ;;  %v6300_v26 = vsel %vm5593_vm13, %v5286_v23, 0.0 }
 0x15c   : > { %v4060_v34 = vunpack.i.h.bf16 %v4058_v38  ;;  %v4059_v44 = vunpack.i.l.bf16 %v4058_v38  ;;  %v5829_v47 = vld [vmem:[#allocation2 + $0x18] sm:$0xff]   ;;  %3813 = vmatprep.mubr.msk.bf16.mxu1 %vm2243_vm2, %v5814_v60  ;;  %3826 = vmatpush3.bf16.msra.mxu1 %v5400_v9  ;;  %v1872_v9 = vsel %vm306_vm0, %v5300_v29, %v4000_v54  ;;  %v1871_v38 = vsel %vm306_vm0, %v6300_v26, %v3999_v28 }
 0x15d   : > { %3827 = vmatprep.subr.bf16.mxu1 %v4110_v57  ;;  %v1854_v29 = vsel %vm306_vm0, %v5492_v21, %v3995_v36  ;;  %v1853_v54 = vsel %vm306_vm0, %v6301_v16, %v3994_v20  ;;  %v1874_v28 = vsel %vm306_vm0, %v5496_v39, %v4025_v1  ;;  %v4123_v20 = vld [vmem:[%s6152_s4 + $0x8] sm:$0xff]   ;;  %v4128_v16 = vld [vmem:[%s6152_s4] sm:$0xff]  }
 0x15e   : > { %v4043_v42 = vpop.permute.xlu1 %4042  ;;  %v1903_v49 = vsel %vm1875_vm3, %v1870_v40, %v4060_v34  ;;  %v1902_v62 = vsel %vm1875_vm3, %v1869_v0, %v4059_v44 }
 0x15f   : > { %v4045_v61 = vunpack.i.h.bf16 %v4043_v42  ;;  %v4044_v41 = vunpack.i.l.bf16 %v4043_v42  ;;  %v3583_v19 = vpack.c.bf16 %v1903_v49, %v1903_v49  ;;  %v3582_v35 = vpack.c.bf16 %v1902_v62, %v1902_v62  ;;  %v4063_v27 = vpop.permute.xlu0 %4062  ;;  %v5839_v13 = vld [vmem:[#allocation2 + $0x10] sm:$0xff]  }
 0x160   : > { %v4065_v58 = vunpack.i.h.bf16 %v4063_v27  ;;  %v4064_v15 = vunpack.i.l.bf16 %v4063_v27  ;;  %3794 = vmatmul.mubr.msk.bf16.vlgmr.msra.gmra.mxu0 %vm2243_vm2, %v5839_v13  ;;  %3828 = vmatpush3.bf16.msra.mxu1 %v4110_v57 }
 0x161   : > { %v1882_v3 = vsel %vm1875_vm3, %v1849_v18, %v4044_v41  ;;  %v1883_v63 = vsel %vm1875_vm3, %v1850_v48, %v4045_v61  ;;  %2063 = vst.msk [vmem:[#allocation2 + $0x74] sm:$0xf] %vm267_vm1, %v3583_v19  ;;  %2062 = vst.msk [vmem:[#allocation2 + $0x70] sm:$0xf] %vm267_vm1, %v3582_v35  ;;  %3797 = vmatprep.mubr.msk.bf16.mxu0 %vm2243_vm2, %v5829_v47  ;;  %3870 = vmatpush3.bf16.msra.mxu0 %v5405_v32  ;;  %v5887_v48 = vld [vmem:[#allocation2 + $0x60] sm:$0xff]   ;;  %v4119_v18 = vld [vmem:[%s6152_s4 + $0x10] sm:$0xff]  }
 0x162   : > { %v3562_v8 = vpack.c.bf16 %v1882_v3, %v1882_v3  ;;  %v3563_v2 = vpack.c.bf16 %v1883_v63, %v1883_v63  ;;  %v5825_v7 = vpop.permute.xlu1 %4047  ;;  %v1885_v50 = vsel %vm1875_vm3, %v1852_v51, %v4065_v58  ;;  %v1884_v52 = vsel %vm1875_vm3, %v1851_v6, %v4064_v15  ;;  %3871 = vmatprep.subr.bf16.mxu0 %v5819_v17  ;;  %v5897_v42 = vld [vmem:[#allocation2 + $0x68] sm:$0xff]   ;;  %v4122_v51 = vld [vmem:[%s6152_s4 + $0x70] sm:$0xff]  }
 0x163   : > { %v3565_v43 = vpack.c.bf16 %v1885_v50, %v1885_v50  ;;  %v3564_v5 = vpack.c.bf16 %v1884_v52, %v1884_v52  ;;  %v4078_v56 = vpop.permute.xlu0 %4077  ;;  %v1873_v32 = vsel %vm306_vm0, %v1392_v31, %v4024_v10  ;;  %3829 = vmatprep.subr.bf16.mxu1 %v4115_v22  ;;  %v4050_v57 = vunpack.i.h.bf16 %v5825_v7  ;;  %3814 = vmatmul.mubr.msk.bf16.gmra.mxu1 %vm2243_vm2, %v5887_v48  ;;  %v6304_v6 = vld [vmem:[#allocation7_spill] sm:$0xff]  ;;  %v6306_v52 = vld [vmem:[#allocation9_spill] sm:$0xff] }
 0x164   : > { %2042 = vst.msk [vmem:[#allocation2 + $0x20] sm:$0xf] %vm267_vm1, %v3562_v8  ;;  %2043 = vst.msk [vmem:[#allocation2 + $0x24] sm:$0xf] %vm267_vm1, %v3563_v2  ;;  %v4080_v14 = vunpack.i.h.bf16 %v4078_v56  ;;  %v4079_v59 = vunpack.i.l.bf16 %v4078_v56  ;;  %v4049_v61 = vunpack.i.l.bf16 %v5825_v7  ;;  %v1374_v19 = vsel %vm5852_vm7, %v6304_v6, 0.0  ;;  %3817 = vmatprep.mubr.msk.bf16.mxu1 %vm2243_vm2, %v5897_v42  ;;  %3830 = vmatpush3.bf16.msra.mxu1 %v4115_v22  ;;  %v6305_v8 = vld [vmem:[#allocation8_spill] sm:$0xff] }
 0x165   : > { %2045 = vst.msk [vmem:[#allocation2 + $0x2c] sm:$0xf] %vm267_vm1, %v3565_v43  ;;  %2044 = vst.msk [vmem:[#allocation2 + $0x28] sm:$0xf] %vm267_vm1, %v3564_v5  ;;  %3872 = vmatpush3.bf16.msra.mxu0 %v5819_v17  ;;  %3831 = vmatprep.subr.bf16.mxu1 %v4119_v18  ;;  %v1376_v2 = vsel %vm5877_vm8, %v6305_v8, 0.0  ;;  %v1856_v1 = vsel %vm306_vm0, %v6306_v52, %v4050_v57  ;;  %v6307_v43 = vld [vmem:[#allocation10_spill] sm:$0xff] }
 0x166   : > { %v4068_v34 = vpop.permute.xlu1 %4067  ;;  %v1905_v46 = vsel %vm1875_vm3, %v1872_v9, %v4080_v14  ;;  %v1904_v30 = vsel %vm1875_vm3, %v1871_v38, %v4079_v59  ;;  %3873 = vmatprep.subr.bf16.mxu0 %v4116_v53  ;;  %v1855_v10 = vsel %vm306_vm0, %v1374_v19, %v4049_v61  ;;  %v4141_v57 = vld [vmem:[#allocation2 + $0x60] sm:$0xff]   ;;  %v4142_v61 = vld [vmem:[#allocation2 + $0x68] sm:$0xff]  }
 0x167   : > { %v4070_v21 = vunpack.i.h.bf16 %v4068_v34  ;;  %v4069_v33 = vunpack.i.l.bf16 %v4068_v34  ;;  %v3585_v44 = vpack.c.bf16 %v1905_v46, %v1905_v46  ;;  %v3584_v4 = vpack.c.bf16 %v1904_v30, %v1904_v30  ;;  %v4083_v37 = vpop.permute.xlu0 %4082  ;;  %v4130_v46 = vld [vmem:[%s6152_s4 + $0x60] sm:$0xff]  }
 0x168   : > { %v4085_v45 = vunpack.i.h.bf16 %v4083_v37  ;;  %v4084_v0 = vunpack.i.l.bf16 %v4083_v37  ;;  %3832 = vmatpush3.bf16.msra.mxu1 %v4119_v18  ;;  %v5942_v38 = vld [vmem:[#allocation2 + $0x70] sm:$0xff]  }
 0x169   : > { %v1886_v40 = vsel %vm1875_vm3, %v1853_v54, %v4069_v33  ;;  %v1887_v39 = vsel %vm1875_vm3, %v1854_v29, %v4070_v21  ;;  %2065 = vst.msk [vmem:[#allocation2 + $0x7c] sm:$0xf] %vm267_vm1, %v3585_v44  ;;  %2064 = vst.msk [vmem:[#allocation2 + $0x78] sm:$0xf] %vm267_vm1, %v3584_v4  ;;  %3874 = vmatpush3.bf16.msra.mxu0 %v4116_v53  ;;  %3833 = vmatprep.subr.bf16.mxu1 %v4123_v20  ;;  %v4125_v29 = vld [vmem:[%s6152_s4 + $0x68] sm:$0xff]   ;;  %v4129_v37 = vld [vmem:[#allocation2 + $0x10] sm:$0xff]  }
 0x16a   : > { %v3566_v41 = vpack.c.bf16 %v1886_v40, %v1886_v40  ;;  %v3567_v49 = vpack.c.bf16 %v1887_v39, %v1887_v39  ;;  %v4073_v62 = vpop.permute.xlu1 %4072  ;;  %v1907_v27 = vsel %vm1875_vm3, %v1874_v28, %v4085_v45  ;;  %v1906_v3 = vsel %vm1875_vm3, %v1873_v32, %v4084_v0  ;;  %3875 = vmatprep.subr.bf16.mxu0 %v4122_v51  ;;  %v4131_v32 = vld [vmem:[#allocation2] sm:$0xff]   ;;  %v4132_v53 = vld [vmem:[#allocation2 + $0x18] sm:$0xff]   ;;  %v4139_v45 = vld [vmem:[#allocation2 + $0x50] sm:$0xff]  }
 0x16b   : > { %v4075_v35 = vunpack.i.h.bf16 %v4073_v62  ;;  %v5916_v63 = vld [vmem:[#allocation2 + $0x20] sm:$0xff]   ;;  %v4074_v58 = vunpack.i.l.bf16 %v4073_v62  ;;  %v3587_v15 = vpack.c.bf16 %v1907_v27, %v1907_v27  ;;  %v3586_v17 = vpack.c.bf16 %v1906_v3, %v1906_v3  ;;  %v4088_v36 = vpop.permute.xlu0 %4087  ;;  %3818 = vmatmul.mubr.msk.bf16.gmra.mxu1 %vm2243_vm2, %v5942_v38  ;;  %v4140_v0 = vld [vmem:[#allocation2 + $0x58] sm:$0xff]  }
 0x16c   : > { %2046 = vst.msk [vmem:[#allocation2 + $0x30] sm:$0xf] %vm267_vm1, %v3566_v41  ;;  %2047 = vst.msk [vmem:[#allocation2 + $0x34] sm:$0xf] %vm267_vm1, %v3567_v49  ;;  %v4090_v7 = vunpack.i.h.bf16 %v4088_v36  ;;  %v4089_v31 = vunpack.i.l.bf16 %v4088_v36  ;;  %3798 = vmatmul.mubr.msk.bf16.gmra.mxu0 %vm2243_vm2, %v5916_v63  ;;  %v5928_v50 = vld [vmem:[#allocation2 + $0x28] sm:$0xff]   ;;  %3834 = vmatpush3.bf16.msra.mxu1 %v4123_v20  ;;  %v4133_v18 = vld [vmem:[#allocation2 + $0x20] sm:$0xff]  }
 0x16d   : > { %v1858_v5 = vsel %vm306_vm0, %v6307_v43, %v4075_v35  ;;  %2067 = vst.msk [vmem:[#allocation2 + $0x84] sm:$0xf] %vm267_vm1, %v3587_v15  ;;  %2066 = vst.msk [vmem:[#allocation2 + $0x80] sm:$0xf] %vm267_vm1, %v3586_v17  ;;  %3801 = vmatprep.mubr.msk.bf16.mxu0 %vm2243_vm2, %v5928_v50  ;;  %v1857_v14 = vsel %vm306_vm0, %v1376_v2, %v4074_v58  ;;  %3876 = vmatpush3.bf16.msra.mxu0 %v4122_v51  ;;  %v4134_v40 = vld [vmem:[#allocation2 + $0x28] sm:$0xff]   ;;  %v4143_v41 = vld [vmem:[#allocation2 + $0x70] sm:$0xff]  }
 0x16e   : > { %v4093_v56 = vpop.permute.xlu1 %4092  ;;  %v1889_v24 = vsel %vm1875_vm3, %v1856_v1, %v4090_v7  ;;  %v1888_v12 = vsel %vm1875_vm3, %v1855_v10, %v4089_v31  ;;  %3877 = vmatprep.subr.bf16.mxu0 %v4125_v29  ;;  %3835 = vmatprep.subr.bf16.mxu1 %v4128_v16 }
 0x16f   : > { %v4095_v22 = vunpack.i.h.bf16 %v4093_v56  ;;  %v4094_v9 = vunpack.i.l.bf16 %v4093_v56  ;;  %v3569_v59 = vpack.c.bf16 %v1889_v24, %v1889_v24  ;;  %v3568_v26 = vpack.c.bf16 %v1888_v12, %v1888_v12 }
 0x170   : > { %v5952_v23 = vld [vmem:[#allocation2 + $0x78] sm:$0xff]   ;;  %3836 = vmatpush3.bf16.msra.mxu1 %v4128_v16 }
 0x171   : > { %v1890_v54 = vsel %vm1875_vm3, %v1857_v14, %v4094_v9  ;;  %v1891_v34 = vsel %vm1875_vm3, %v1858_v5, %v4095_v22  ;;  %2049 = vst.msk [vmem:[#allocation2 + $0x3c] sm:$0xf] %vm267_vm1, %v3569_v59  ;;  %2048 = vst.msk [vmem:[#allocation2 + $0x38] sm:$0xf] %vm267_vm1, %v3568_v26  ;;  %3821 = vmatprep.mubr.msk.bf16.mxu1 %vm2243_vm2, %v5952_v23  ;;  %3878 = vmatpush3.bf16.msra.mxu0 %v4125_v29 }
 0x172   : > { %v3570_v21 = vpack.c.bf16 %v1890_v54, %v1890_v54  ;;  %v3571_v33 = vpack.c.bf16 %v1891_v34, %v1891_v34  ;;  %3879 = vmatprep.subr.bf16.mxu0 %v4130_v46 }
 0x173   : > { %v4120_v30 = vld [vmem:[#allocation2 + $0x30] sm:$0xff]  }
 0x174   : > { %2050 = vst.msk [vmem:[#allocation2 + $0x40] sm:$0xf] %vm267_vm1, %v3570_v21  ;;  %2051 = vst.msk [vmem:[#allocation2 + $0x44] sm:$0xf] %vm267_vm1, %v3571_v33  ;;  %3802 = vmatmul.mubr.msk.bf16.gmra.mxu0 %vm2243_vm2, %v4120_v30  ;;  %v4124_v28 = vld [vmem:[#allocation2 + $0x80] sm:$0xff]   ;;  %v4135_v39 = vld [vmem:[#allocation2 + $0x30] sm:$0xff]  }
 0x175   : > { %3822 = vmatmul.mubr.msk.bf16.gmra.mxu1 %vm2243_vm2, %v4124_v28  ;;  %3880 = vmatpush3.bf16.msra.mxu0 %v4130_v46  ;;  %v6065_v46 = vld [vmem:[%s260_s24] ss:$0 sm:$0xff] }
 0x176   : > { %3837 = vmatprep.mubr.msk.bf16.mxu1 %vm2243_vm2, %v4131_v32 }
 0x178   : > { %v4126_v44 = vld [vmem:[#allocation2 + $0x38] sm:$0xff]  }
 0x179   : > { %3805 = vmatprep.mubr.msk.bf16.mxu0 %vm2243_vm2, %v4126_v44 }
 0x17b   : > { %v4127_v4 = vld [vmem:[#allocation2 + $0x40] sm:$0xff]  }
 0x17c   : > { %3806 = vmatmul.mubr.msk.bf16.gmra.mxu0 %vm2243_vm2, %v4127_v4 }
 0x17d   : > { %3881 = vmatprep.mubr.msk.bf16.mxu0 %vm2243_vm2, %v4129_v37  ;;  %3838 = vmatmul.mubr.msk.bf16.vlgmr.msra.gmra.mxu1 %vm2243_vm2, %v5736_v25  ;;  %v4136_v25 = vld [vmem:[#allocation2 + $0x38] sm:$0xff]  }
 0x17e   : > { %3841 = vmatprep.mubr.msk.bf16.mxu1 %vm2243_vm2, %v5839_v13  ;;  %v4137_v13 = vld [vmem:[#allocation2 + $0x40] sm:$0xff]  }
 0x184   : > { %3882 = vmatmul.mubr.msk.bf16.vlgmr.msra.gmra.mxu0 %vm2243_vm2, %v4132_v53 }
 0x185   : > { %3885 = vmatprep.mubr.msk.bf16.mxu0 %vm2243_vm2, %v4133_v18  ;;  %3842 = vmatmul.mubr.msk.bf16.gmra.mxu1 %vm2243_vm2, %v5829_v47  ;;  %v4138_v47 = vld [vmem:[#allocation2 + $0x48] sm:$0xff]  }
 0x186   : > { %3845 = vmatprep.mubr.msk.bf16.mxu1 %vm2243_vm2, %v5916_v63 }
 0x18c   : > { %3886 = vmatmul.mubr.msk.bf16.gmra.mxu0 %vm2243_vm2, %v4134_v40 }
 0x18d   : > { %3889 = vmatprep.mubr.msk.bf16.mxu0 %vm2243_vm2, %v4135_v39  ;;  %3846 = vmatmul.mubr.msk.bf16.gmra.mxu1 %vm2243_vm2, %v5928_v50 }
 0x18e   : > { %3849 = vmatprep.mubr.msk.bf16.mxu1 %vm2243_vm2, %v4120_v30 }
 0x194   : > { %3890 = vmatmul.mubr.msk.bf16.gmra.mxu0 %vm2243_vm2, %v4136_v25 }
 0x195   : > { %3893 = vmatprep.mubr.msk.bf16.mxu0 %vm2243_vm2, %v4137_v13  ;;  %3850 = vmatmul.mubr.msk.bf16.gmra.mxu1 %vm2243_vm2, %v4126_v44 }
 0x196   : > { %3853 = vmatprep.mubr.msk.bf16.mxu1 %vm2243_vm2, %v4127_v4 }
 0x19c   : > { %3894 = vmatmul.mubr.msk.bf16.gmra.mxu0 %vm2243_vm2, %v4138_v47 }
 0x19d   : > { %3897 = vmatprep.mubr.msk.bf16.mxu0 %vm2243_vm2, %v4139_v45  ;;  %3854 = vmatmul.mubr.msk.bf16.gmra.mxu1 %vm2243_vm2, %v5799_v55  ;;  %v4144_v55 = vld [vmem:[#allocation2 + $0x78] sm:$0xff]  }
 0x19e   : > { %3857 = vmatprep.mubr.msk.bf16.mxu1 %vm2243_vm2, %v5808_v11  ;;  %v4145_v11 = vld [vmem:[#allocation2 + $0x80] sm:$0xff]  }
 0x1a4   : > { %3898 = vmatmul.mubr.msk.bf16.gmra.mxu0 %vm2243_vm2, %v4140_v0 }
 0x1a5   : > { %3901 = vmatprep.mubr.msk.bf16.mxu0 %vm2243_vm2, %v4141_v57  ;;  %3858 = vmatmul.mubr.msk.bf16.gmra.mxu1 %vm2243_vm2, %v5814_v60  ;;  %v4146_v60 = vld [vmem:[#allocation2 + $0x88] sm:$0xff]  }
 0x1a6   : > { %3861 = vmatprep.mubr.msk.bf16.mxu1 %vm2243_vm2, %v5887_v48 }
 0x1ac   : > { %3902 = vmatmul.mubr.msk.bf16.gmra.mxu0 %vm2243_vm2, %v4142_v61 }
 0x1ad   : > { %3905 = vmatprep.mubr.msk.bf16.mxu0 %vm2243_vm2, %v4143_v41  ;;  %3862 = vmatmul.mubr.msk.bf16.gmra.mxu1 %vm2243_vm2, %v5897_v42 }
 0x1ae   : > { %3865 = vmatprep.mubr.msk.bf16.mxu1 %vm2243_vm2, %v5942_v38 }
 0x1b4   : > { %3906 = vmatmul.mubr.msk.bf16.gmra.mxu0 %vm2243_vm2, %v4144_v55 }
 0x1b5   : > { %3909 = vmatprep.mubr.msk.bf16.mxu0 %vm2243_vm2, %v4145_v11  ;;  %3866 = vmatmul.mubr.msk.bf16.gmra.mxu1 %vm2243_vm2, %v5952_v23 }
 0x1bc   : > { %3910 = vmatmul.mubr.msk.bf16.gmra.mxu0 %vm2243_vm2, %v4146_v60 }
 0x21b   : > { %v6013_v48 = vpop.f32.mrf.mxu1 }
 0x21d   : > { %v6015_v49 = vpop.f32.mrf.mxu1 }
 0x21f   : > { %v6017_v62 = vpop.f32.mrf.mxu1 }
 0x220   : > { %v3795_v42 = vpop.f32.mrf.mxu0 }
 0x221   : > { %v6019_v6 = vpop.f32.mrf.mxu1 }
 0x222   : > { %v2326_v51 = vpop.f32.mrf.mxu0 }
 0x223   : > { %v6021_v35 = vpop.f32.mrf.mxu1 }
 0x224   : > { %v3796_v19 = vpop.f32.mrf.mxu0 }
 0x225   : > { %v6023_v3 = vpop.f32.mrf.mxu1 }
 0x226   : > { %v2329_v27 = vpop.f32.mrf.mxu0 }
 0x227   : > { %v6025_v58 = vpop.f32.mrf.mxu1 }
 0x229   : > { %v6027_v17 = vpop.f32.mrf.mxu1 }
 0x22b   : > { %v6029_v20 = vpop.f32.mrf.mxu1 }
 0x22c   : > { %v3799_v63 = vpop.f32.mrf.mxu0 }
 0x22d   : > { %v6031_v2 = vpop.f32.mrf.mxu1 }
 0x22e   : > { %v2342_v15 = vpop.f32.mrf.mxu0 }
 0x22f   : > { %v6035_v31 = vpop.f32.mrf.mxu1 }
 0x230   : > { %v3800_v36 = vpop.f32.mrf.mxu0 }
 0x231   : > { %v6039_v52 = vpop.f32.mrf.mxu1 }
 0x232   : > { %v2345_v8 = vpop.f32.mrf.mxu0 }
 0x234   : > { %v6033_v7 = vpop.f32.mrf.mxu0 }
 0x235   : > { %v6043_v10 = vpop.f32.mrf.mxu1 }
 0x236   : > { %v6037_v50 = vpop.f32.mrf.mxu0 }
 0x237   : > { %v6047_v5 = vpop.f32.mrf.mxu1 }
 0x238   : > { %v6041_v1 = vpop.f32.mrf.mxu0 }
 0x239   : > { %v6051_v22 = vpop.f32.mrf.mxu1 }
 0x23a   : > { %v6045_v43 = vpop.f32.mrf.mxu0 }
 0x23b   : > { %v6055_v24 = vpop.f32.mrf.mxu1 }
 0x23c   : > { %v6049_v56 = vpop.f32.mrf.mxu0 }
 0x23d   : > { %v3839_v14 = vpop.f32.mrf.mxu1 }
 0x23e   : > { %v6053_v9 = vpop.f32.mrf.mxu0  ;;  %v2540_v29 = vadd.f32 %v3839_v14, %v3795_v42 }
 0x23f   : > { %v2531_v26 = vpop.f32.mrf.mxu1 }
 0x240   : > { %v6057_v12 = vpop.f32.mrf.mxu0  ;;  %v2532_v34 = vadd.f32 %v2531_v26, %v2326_v51 }
 0x241   : > { %v3840_v16 = vpop.f32.mrf.mxu1 }
 0x242   : > { %v6059_v59 = vpop.f32.mrf.mxu0  ;;  %v2543_v23 = vadd.f32 %v3840_v16, %v3796_v19 }
 0x243   : > { %v2534_v33 = vpop.f32.mrf.mxu1 }
 0x244   : > { %v3883_v38 = vpop.f32.mrf.mxu0  ;;  %v2535_v28 = vadd.f32 %v2534_v33, %v2329_v27 }
 0x245   : > { %v3030_v21 = vadd.f32 %v3883_v38, %v2540_v29  ;;  %v3843_v44 = vpop.f32.mrf.mxu1 }
 0x246   : > { %v2901_v54 = vpop.f32.mrf.mxu0  ;;  %v2556_v47 = vadd.f32 %v3843_v44, %v3799_v63 }
 0x247   : > { %v3028_v32 = vadd.f32 %v2901_v54, %v2532_v34  ;;  %v3069_v53 = vadd.f32 %v6065_v46, %v3030_v21  ;;  %v2547_v40 = vpop.f32.mrf.mxu1 }
 0x248   : > { %v3884_v30 = vpop.f32.mrf.mxu0  ;;  %v2548_v41 = vadd.f32 %v2547_v40, %v2342_v15 }
 0x249   : > { %v3031_v4 = vadd.f32 %v3884_v30, %v2543_v23  ;;  %v3067_v13 = vadd.f32 %v6065_v46, %v3028_v32  ;;  %v3844_v57 = vpop.f32.mrf.mxu1 }
 0x24a   : > { %v2904_v37 = vpop.f32.mrf.mxu0  ;;  %v2559_v11 = vadd.f32 %v3844_v57, %v3800_v36 }
 0x24b   : > { %v3070_v18 = vadd.f32 %v6065_v46, %v3031_v4  ;;  %v3029_v39 = vadd.f32 %v2904_v37, %v2535_v28  ;;  %v2550_v42 = vpop.f32.mrf.mxu1 }
 0x24c   : > { %v3887_v25 = vpop.f32.mrf.mxu0  ;;  %v2551_v19 = vadd.f32 %v2550_v42, %v2345_v8 }
 0x24d   : > { %v3628_v45 = vpack.c.bf16 %v3070_v18, %v3069_v53  ;;  %v3068_v0 = vadd.f32 %v6065_v46, %v3029_v39  ;;  %v3034_v60 = vadd.f32 %v3887_v25, %v2556_v47  ;;  %v3847_v14 = vpop.f32.mrf.mxu1 }
 0x24e   : > { %v2917_v61 = vpop.f32.mrf.mxu0  ;;  %v2572_v34 = vadd.f32 %v3847_v14, %v6033_v7 }
 0x24f   : > { %3700 = vst [vmem:[%s6073_s28 + $0x8] sm:$0xff] %v3628_v45   ;;  %v3623_v55 = vpack.c.bf16 %v3068_v0, %v3067_v13  ;;  %v3032_v27 = vadd.f32 %v2917_v61, %v2548_v41  ;;  %v3073_v63 = vadd.f32 %v6065_v46, %v3034_v60  ;;  %v2563_v16 = vpop.f32.mrf.mxu1 }
 0x250   : > { %v3888_v51 = vpop.f32.mrf.mxu0  ;;  %v2564_v30 = vadd.f32 %v2563_v16, %v6037_v50 }
 0x251   : > { %3624 = vst [vmem:[%s6073_s28] sm:$0xff] %v3623_v55   ;;  %v3035_v26 = vadd.f32 %v3888_v51, %v2559_v11  ;;  %v3071_v36 = vadd.f32 %v6065_v46, %v3032_v27  ;;  %v3848_v21 = vpop.f32.mrf.mxu1 }
 0x252   : > { %v2920_v38 = vpop.f32.mrf.mxu0  ;;  %v2575_v32 = vadd.f32 %v3848_v21, %v6041_v1 }
 0x253   : > { %v3074_v29 = vadd.f32 %v6065_v46, %v3035_v26  ;;  %v3033_v54 = vadd.f32 %v2920_v38, %v2551_v19  ;;  %v2566_v4 = vpop.f32.mrf.mxu1 }
 0x254   : > { %v3891_v15 = vpop.f32.mrf.mxu0  ;;  %v2567_v53 = vadd.f32 %v2566_v4, %v6045_v43 }
 0x255   : > { %v3638_v23 = vpack.c.bf16 %v3074_v29, %v3073_v63  ;;  %v3072_v8 = vadd.f32 %v6065_v46, %v3033_v54  ;;  %v3038_v44 = vadd.f32 %v3891_v15, %v2572_v34  ;;  %v3851_v7 = vpop.f32.mrf.mxu1 }
 0x256   : > { %v2933_v33 = vpop.f32.mrf.mxu0  ;;  %v2588_v0 = vadd.f32 %v3851_v7, %v6049_v56 }
 0x257   : > { %3702 = vst [vmem:[%s6073_s28 + $0x18] sm:$0xff] %v3638_v23   ;;  %v3633_v28 = vpack.c.bf16 %v3072_v8, %v3071_v36  ;;  %v3036_v18 = vadd.f32 %v2933_v33, %v2564_v30  ;;  %v3077_v25 = vadd.f32 %v6065_v46, %v3038_v44  ;;  %v2579_v47 = vpop.f32.mrf.mxu1 }
 0x258   : > { %v3892_v37 = vpop.f32.mrf.mxu0  ;;  %v2580_v55 = vadd.f32 %v2579_v47, %v6053_v9 }
 0x259   : > { %3701 = vst [vmem:[%s6073_s28 + $0x10] sm:$0xff] %v3633_v28   ;;  %v3039_v40 = vadd.f32 %v3892_v37, %v2575_v32  ;;  %v3075_v1 = vadd.f32 %v6065_v46, %v3036_v18  ;;  %v3852_v61 = vpop.f32.mrf.mxu1 }
 0x25a   : > { %v2936_v39 = vpop.f32.mrf.mxu0  ;;  %v2591_v60 = vadd.f32 %v3852_v61, %v6057_v12 }
 0x25b   : > { %v3078_v13 = vadd.f32 %v6065_v46, %v3039_v40  ;;  %v3037_v50 = vadd.f32 %v2936_v39, %v2567_v53  ;;  %v2582_v51 = vpop.f32.mrf.mxu1 }
 0x25c   : > { %v3895_v45 = vpop.f32.mrf.mxu0  ;;  %v2583_v27 = vadd.f32 %v2582_v51, %v6059_v59 }
 0x25d   : > { %v3648_v57 = vpack.c.bf16 %v3078_v13, %v3077_v25  ;;  %v3076_v43 = vadd.f32 %v6065_v46, %v3037_v50  ;;  %v3042_v42 = vadd.f32 %v3895_v45, %v2588_v0  ;;  %v3855_v56 = vpop.f32.mrf.mxu1 }
 0x25e   : > { %v2949_v41 = vpop.f32.mrf.mxu0  ;;  %v2604_v15 = vadd.f32 %v3855_v56, %v6013_v48 }
 0x25f   : > { %3704 = vst [vmem:[%s6073_s28 + $0x28] sm:$0xff] %v3648_v57   ;;  %v3643_v11 = vpack.c.bf16 %v3076_v43, %v3075_v1  ;;  %v3040_v14 = vadd.f32 %v2949_v41, %v2580_v55  ;;  %v3081_v63 = vadd.f32 %v6065_v46, %v3042_v42  ;;  %v2595_v16 = vpop.f32.mrf.mxu1 }
 0x260   : > { %v3896_v19 = vpop.f32.mrf.mxu0  ;;  %v2596_v8 = vadd.f32 %v2595_v16, %v6015_v49 }
 0x261   : > { %3703 = vst [vmem:[%s6073_s28 + $0x20] sm:$0xff] %v3643_v11   ;;  %v3043_v26 = vadd.f32 %v3896_v19, %v2591_v60  ;;  %v3079_v12 = vadd.f32 %v6065_v46, %v3040_v14  ;;  %v3856_v34 = vpop.f32.mrf.mxu1 }
 0x262   : > { %v2952_v38 = vpop.f32.mrf.mxu0  ;;  %v2607_v33 = vadd.f32 %v3856_v34, %v6017_v62 }
 0x263   : > { %v3082_v29 = vadd.f32 %v6065_v46, %v3043_v26  ;;  %v3041_v9 = vadd.f32 %v2952_v38, %v2583_v27  ;;  %v2598_v28 = vpop.f32.mrf.mxu1 }
 0x264   : > { %v3899_v54 = vpop.f32.mrf.mxu0  ;;  %v2599_v44 = vadd.f32 %v2598_v28, %v6019_v6 }
 0x265   : > { %v3658_v36 = vpack.c.bf16 %v3082_v29, %v3081_v63  ;;  %v3080_v59 = vadd.f32 %v6065_v46, %v3041_v9  ;;  %v3046_v30 = vadd.f32 %v3899_v54, %v2604_v15  ;;  %v3859_v48 = vpop.f32.mrf.mxu1 }
 0x266   : > { %v2965_v23 = vpop.f32.mrf.mxu0  ;;  %v2620_v25 = vadd.f32 %v3859_v48, %v6021_v35 }
 0x267   : > { %3706 = vst [vmem:[%s6073_s28 + $0x38] sm:$0xff] %v3658_v36   ;;  %v3653_v21 = vpack.c.bf16 %v3080_v59, %v3079_v12  ;;  %v3044_v4 = vadd.f32 %v2965_v23, %v2596_v8  ;;  %v3085_v18 = vadd.f32 %v6065_v46, %v3046_v30  ;;  %v2611_v40 = vpop.f32.mrf.mxu1 }
 0x268   : > { %v3900_v32 = vpop.f32.mrf.mxu0  ;;  %v2612_v45 = vadd.f32 %v2611_v40, %v6023_v3 }
 0x269   : > { %3705 = vst [vmem:[%s6073_s28 + $0x30] sm:$0xff] %v3653_v21   ;;  %v3047_v37 = vadd.f32 %v3900_v32, %v2607_v33  ;;  %v3083_v62 = vadd.f32 %v6065_v46, %v3044_v4  ;;  %v3860_v47 = vpop.f32.mrf.mxu1 }
 0x26a   : > { %v2968_v53 = vpop.f32.mrf.mxu0  ;;  %v2623_v0 = vadd.f32 %v3860_v47, %v6025_v58 }
 0x26b   : > { %v3086_v7 = vadd.f32 %v6065_v46, %v3047_v37  ;;  %v3045_v49 = vadd.f32 %v2968_v53, %v2599_v44  ;;  %v2614_v43 = vpop.f32.mrf.mxu1 }
 0x26c   : > { %v3903_v39 = vpop.f32.mrf.mxu0  ;;  %v2615_v41 = vadd.f32 %v2614_v43, %v6027_v17 }
 0x26d   : > { %v3668_v13 = vpack.c.bf16 %v3086_v7, %v3085_v18  ;;  %v3084_v6 = vadd.f32 %v6065_v46, %v3045_v49  ;;  %v3050_v57 = vadd.f32 %v3903_v39, %v2620_v25  ;;  %v3863_v35 = vpop.f32.mrf.mxu1 }
 0x26e   : > { %v2981_v50 = vpop.f32.mrf.mxu0  ;;  %v2636_v14 = vadd.f32 %v3863_v35, %v6029_v20 }
 0x26f   : > { %3708 = vst [vmem:[%s6073_s28 + $0x48] sm:$0xff] %v3668_v13   ;;  %v3663_v1 = vpack.c.bf16 %v3084_v6, %v3083_v62  ;;  %v3048_v55 = vadd.f32 %v2981_v50, %v2612_v45  ;;  %v3089_v42 = vadd.f32 %v6065_v46, %v3050_v57  ;;  %v2627_v19 = vpop.f32.mrf.mxu1 }
 0x270   : > { %v3904_v61 = vpop.f32.mrf.mxu0  ;;  %v2628_v63 = vadd.f32 %v2627_v19, %v6031_v2 }
 0x271   : > { %3707 = vst [vmem:[%s6073_s28 + $0x40] sm:$0xff] %v3663_v1   ;;  %v3051_v11 = vadd.f32 %v3904_v61, %v2623_v0  ;;  %v3087_v58 = vadd.f32 %v6065_v46, %v3048_v55  ;;  %v3864_v26 = vpop.f32.mrf.mxu1 }
 0x272   : > { %v2984_v60 = vpop.f32.mrf.mxu0  ;;  %v2639_v16 = vadd.f32 %v3864_v26, %v6035_v31 }
 0x273   : > { %v3090_v51 = vadd.f32 %v6065_v46, %v3051_v11  ;;  %v3049_v3 = vadd.f32 %v2984_v60, %v2615_v41  ;;  %v2630_v54 = vpop.f32.mrf.mxu1 }
 0x274   : > { %v3907_v27 = vpop.f32.mrf.mxu0  ;;  %v2631_v15 = vadd.f32 %v2630_v54, %v6039_v52 }
 0x275   : > { %v3678_v56 = vpack.c.bf16 %v3090_v51, %v3089_v42  ;;  %v3088_v17 = vadd.f32 %v6065_v46, %v3049_v3  ;;  %v3054_v9 = vadd.f32 %v3907_v27, %v2636_v14  ;;  %v3867_v20 = vpop.f32.mrf.mxu1 }
 0x276   : > { %v2997_v38 = vpop.f32.mrf.mxu0  ;;  %v2652_v30 = vadd.f32 %v3867_v20, %v6043_v10 }
 0x277   : > { %3710 = vst [vmem:[%s6073_s28 + $0x58] sm:$0xff] %v3678_v56   ;;  %v3673_v29 = vpack.c.bf16 %v3088_v17, %v3087_v58  ;;  %v3052_v36 = vadd.f32 %v2997_v38, %v2628_v63  ;;  %v3093_v23 = vadd.f32 %v6065_v46, %v3054_v9  ;;  %v2643_v21 = vpop.f32.mrf.mxu1 }
 0x278   : > { %v3908_v12 = vpop.f32.mrf.mxu0  ;;  %v2644_v4 = vadd.f32 %v2643_v21, %v6047_v5 }
 0x279   : > { %3709 = vst [vmem:[%s6073_s28 + $0x50] sm:$0xff] %v3673_v29   ;;  %v3055_v59 = vadd.f32 %v3908_v12, %v2639_v16  ;;  %v3091_v31 = vadd.f32 %v6065_v46, %v3052_v36  ;;  %v3868_v32 = vpop.f32.mrf.mxu1 }
 0x27a   : > { %v3000_v34 = vpop.f32.mrf.mxu0  ;;  %v2655_v37 = vadd.f32 %v3868_v32, %v6051_v22 }
 0x27b   : > { %v3094_v8 = vadd.f32 %v6065_v46, %v3055_v59  ;;  %v3053_v2 = vadd.f32 %v3000_v34, %v2631_v15  ;;  %v2646_v18 = vpop.f32.mrf.mxu1 }
 0x27c   : > { %v3911_v33 = vpop.f32.mrf.mxu0  ;;  %v2647_v40 = vadd.f32 %v2646_v18, %v6055_v24 }
 0x27d   : > { %v3688_v28 = vpack.c.bf16 %v3094_v8, %v3093_v23  ;;  %v3092_v52 = vadd.f32 %v6065_v46, %v3053_v2  ;;  %v3058_v53 = vadd.f32 %v3911_v33, %v2652_v30 }
 0x27e   : > { %v3013_v44 = vpop.f32.mrf.mxu0 }
 0x27f   : > { %3712 = vst [vmem:[%s6073_s28 + $0x68] sm:$0xff] %v3688_v28   ;;  %v3683_v48 = vpack.c.bf16 %v3092_v52, %v3091_v31  ;;  %v3056_v10 = vadd.f32 %v3013_v44, %v2644_v4  ;;  %v3097_v62 = vadd.f32 %v6065_v46, %v3058_v53 }
 0x280   : > { %v3912_v7 = vpop.f32.mrf.mxu0 }
 0x281   : > { %3711 = vst [vmem:[%s6073_s28 + $0x60] sm:$0xff] %v3683_v48   ;;  %v3059_v49 = vadd.f32 %v3912_v7, %v2655_v37  ;;  %v3095_v5 = vadd.f32 %v6065_v46, %v3056_v10 }
 0x282   : > { %v3016_v39 = vpop.f32.mrf.mxu0 }
 0x283   : > { %v3098_v25 = vadd.f32 %v6065_v46, %v3059_v49  ;;  %v3057_v13 = vadd.f32 %v3016_v39, %v2647_v40 }
 0x285   : > { %v3698_v6 = vpack.c.bf16 %v3098_v25, %v3097_v62  ;;  %v3096_v22 = vadd.f32 %v6065_v46, %v3057_v13 }
 0x287   : > { %3714 = vst [vmem:[%s6073_s28 + $0x78] sm:$0xff] %v3698_v6   ;;  %v3693_v47 = vpack.c.bf16 %v3096_v22, %v3095_v5 }
 0x289   : > { %3713 = vst [vmem:[%s6073_s28 + $0x70] sm:$0xff] %v3693_v47  }
 0x28a PF: > { %s16_s21 = sadd.s32 1, %s4283_s21  }
 0x28b   : > { %p13_p4 = scmp.ge.s32.totalorder %s16_s21, 4  }
 0x28d   :  { %15 = sbr.rel (!%p13_p4) target bundleno = 1 (0x1), region = 79 }

// kernel: resblock_forward.3
= control target key start
LH: loop header
LB: loop body
LE: loop exit
PB: predicated region body
PF: predicated region fallthrough
CT: control target
= control target key end

     0   :  { %13 = vsyncpa [#allocation4], 0  ;;  %s7218_s0 = inlined_call_operand.vmem [shape: bf16[2,256,128], index: 0, kind: input, shape index: {}]   ;;  %s7219_s1 = inlined_call_operand.vmem [shape: f32[1,64], index: 1, kind: input, shape index: {}]   ;;  %s7220_s2 = inlined_call_operand.vmem [shape: f32[1,64], index: 2, kind: input, shape index: {}]   ;;  %s7221_s3 = inlined_call_operand.vmem [shape: f32[64,64], index: 3, kind: input, shape index: {}]   ;;  %s7222_s4 = inlined_call_operand.vmem [shape: bf16[3,192,128], index: 4, kind: input, shape index: {}]   ;;  %s7223_s5 = inlined_call_operand.vmem [shape: f32[1,128], index: 5, kind: input, shape index: {}]   ;;  %s7224_s6 = inlined_call_operand.vmem [shape: f32[2,256,32], index: 6, kind: input, shape index: {}]   ;;  %s7225_s7 = inlined_call_operand.vmem [shape: f32[32,128], index: 7, kind: input, shape index: {}]   ;;  %s7226_s8 = inlined_call_operand.hbm [shape: f32[2,256,128], index: 8, kind: output, shape index: {}]  }
   0x1   :  { %15 = vsyncpa [#allocation4 + $0x1], 0  ;;  %s4998_s27 = smov 0   ;;  %s5000_s28 = smov 0  }
   0x2   :  { %s5002_s29 = smov 0   ;;  %s5004_s30 = smov 0  }
   0x3 LB: > { %s5019_s9 = sadd.s32 4294967295, %s4944_s30   ;;  %s3973_s10 = sadd.s32 4294967294, %s4944_s30   ;;  %s4944_s30 = sphi %s5004_s30, %s7408_s30   ;;  %s4940_s29 = sphi %s5002_s29, %s7407_s29   ;;  %s4936_s28 = sphi %s5000_s28, %s7406_s28   ;;  %s4932_s27 = sphi %s4998_s27, %s7405_s27  }
   0x4   : > { %s5023_s11 = sadd.s32 1, %s4944_s30   ;;  %s206_s12 = sadd.s32 1, %s4940_s29 }
   0x5   : > { %s203_s13 = ssub.s32 %s4944_s30, %s5023_s11  ;;  %p216_p0 = scmp.ne.s32.totalorder %s4940_s29, %s4936_s28 }
   0x6   : > { %p204_p1 = scmp.eq.s32.totalorder %s203_s13, 0  ;;  %p217_p2 = scmp.eq.s32.totalorder %s5019_s9, 1 }
   0x7   : > { %p222_p3 = scmp.ne.s32.totalorder %s4936_s28, %s4932_s27  ;;  %p223_p4 = scmp.eq.s32.totalorder %s3973_s10, 1 }
   0x8   : > { %s5034_s14 = scalar_select %p204_p1, %s4940_s29, %s206_s12  }
   0x9   : > { %p5036_p5 = por %p217_p2, %p216_p0  ;;  %p5040_p6 = por %p223_p4, %p222_p3 }
   0xa   : > { %p3976_p7 = scmp.ge.s32.totalorder %s4944_s30, 1  ;;  %p275_p8 = scmp.lt.s32.totalorder %s4944_s30, 3 }
   0xc   : > { %p276_p9 = pnand %p3976_p7, %p275_p8 }
   0xe   : > { %279 = sbr.rel (%p276_p9) target bundleno = 950 (0x3b6), region = 52 }
  0x13   : > { %v578_v0 = vld [vmem:[%s7221_s3 + $0x38] sm:$0xff]  ;;  %p314_p10 = scmp.lt.s32.totalorder %s5019_s9, 1  ;;  %v4946_v1 = vmov 0.0   ;;  %v577_v2 = vld [vmem:[%s7221_s3 + $0x30] sm:$0xff]  ;;  %vm4947_vm0 = vmmov 0   ;;  %v576_v3 = vld [vmem:[%s7221_s3 + $0x28] sm:$0xff] }
  0x14   : > { %4443 = vmatprep.subr.mxu0 %v4946_v1  ;;  %4459 = vmatprep.mubr.msk.f32.mxu0 %vm4947_vm0, %v4946_v1  ;;  %v575_v4 = vld [vmem:[%s7221_s3 + $0x20] sm:$0xff]  ;;  %v574_v5 = vld [vmem:[%s7221_s3 + $0x18] sm:$0xff]  ;;  %v573_v6 = vld [vmem:[%s7221_s3 + $0x10] sm:$0xff]  ;;  %vm398_vm1 = vcmask 523264   ;;  %vm569_vm2 = vcmask 1040384   ;;  %vm325_vm3 = vcmask 1043456  }
  0x15   : > { %4444 = vmatpush3.msra.mxu0 %v578_v0  ;;  %s5054_s21 = scalar_select %p314_p10, %s5019_s9, 1  ;;  %v572_v7 = vld [vmem:[%s7221_s3 + $0x8] sm:$0xff]  ;;  %v571_v10 = vld [vmem:[%s7221_s3] sm:$0xff]  ;;  %vm326_vm4 = vcmask 523268  }
  0x16   : > { %4445 = vmatprep.subr.mxu0 %v4946_v1  ;;  %vm5343_vm5 = vmor %vm326_vm4, %vm325_vm3  ;;  %s4318_s23 = sshll.u32 %s5019_s9, 12  ;;  %s4950_s13 = smov [#allocation3]  }
  0x17   : > { %4446 = vmatpush3.msra.mxu0 %v577_v2  ;;  %s4284_s26 = sshll.u32 %s5054_s21, 7 }
  0x18   : > { %4447 = vmatprep.subr.mxu0 %v4946_v1  ;;  %s5069_s18 = scalar_lea.vmem %s7218_s0, %s4284_s26  ;;  %s4949_s26 = smov 64  }
  0x19   : > { %4448 = vmatpush3.msra.mxu0 %v576_v3  ;;  %v4320_v8 = vld [vmem:[%s5069_s18] sm:$0xff]   ;;  %v4383_v9 = vld [vmem:[%s5069_s18 + $0x8] sm:$0xff]   ;;  %v4384_v11 = vld [vmem:[%s5069_s18 + $0x10] sm:$0xff]  }
  0x1a   : > { %4449 = vmatprep.subr.mxu0 %v4946_v1  ;;  %v5083_v12 = vunpack.c.l.bf16 %v4320_v8  ;;  %v5085_v13 = vunpack.c.h.bf16 %v4320_v8  ;;  %v5087_v14 = vunpack.c.l.bf16 %v4383_v9  ;;  %v5089_v15 = vunpack.c.h.bf16 %v4383_v9  ;;  %v4385_v21 = vld [vmem:[%s5069_s18 + $0x18] sm:$0xff]   ;;  %v4386_v22 = vld [vmem:[%s5069_s18 + $0x20] sm:$0xff]   ;;  %v4387_v24 = vld [vmem:[%s5069_s18 + $0x28] sm:$0xff]  }
  0x1b   : > { %4450 = vmatpush3.msra.mxu0 %v575_v4  ;;  %v5097_v20 = vunpack.c.l.bf16 %v4384_v11  ;;  %v5104_v26 = vunpack.c.h.bf16 %v4384_v11  ;;  %v5108_v28 = vunpack.c.l.bf16 %v4385_v21  ;;  %v5110_v29 = vunpack.c.h.bf16 %v4385_v21  ;;  %v4388_v45 = vld [vmem:[%s5069_s18 + $0x30] sm:$0xff]   ;;  %v4389_v58 = vld [vmem:[%s5069_s18 + $0x38] sm:$0xff]  }
  0x1c   : > { %4451 = vmatprep.subr.mxu0 %v4946_v1  ;;  %v399_v16 = vsel %vm398_vm1, %v5083_v12, 0.0  ;;  %v400_v17 = vsel %vm398_vm1, %v5085_v13, 0.0  ;;  %v402_v18 = vsel %vm398_vm1, %v5087_v14, 0.0  ;;  %v404_v23 = vsel %vm398_vm1, %v5089_v15, 0.0 }
  0x1d   : > { %4452 = vmatpush3.msra.mxu0 %v574_v5  ;;  %v401_v19 = vadd.f32 %v400_v17, %v399_v16  ;;  %v406_v27 = vsel %vm398_vm1, %v5097_v20, 0.0  ;;  %v5112_v30 = vunpack.c.l.bf16 %v4386_v22  ;;  %v5114_v32 = vunpack.c.h.bf16 %v4386_v22 }
  0x1e   : > { %4453 = vmatprep.subr.mxu0 %v4946_v1  ;;  %v5116_v33 = vunpack.c.l.bf16 %v4387_v24  ;;  %v5118_v34 = vunpack.c.h.bf16 %v4387_v24  ;;  %v408_v35 = vsel %vm398_vm1, %v5104_v26, 0.0  ;;  %v410_v37 = vsel %vm398_vm1, %v5108_v28, 0.0 }
  0x1f   : > { %4454 = vmatpush3.msra.mxu0 %v573_v6  ;;  %v403_v25 = vadd.f32 %v402_v18, %v401_v19  ;;  %v412_v38 = vsel %vm398_vm1, %v5110_v29, 0.0  ;;  %v414_v39 = vsel %vm398_vm1, %v5112_v30, 0.0  ;;  %v416_v40 = vsel %vm398_vm1, %v5114_v32, 0.0 }
  0x20   : > { %4455 = vmatprep.subr.mxu0 %v4946_v1  ;;  %v418_v41 = vsel %vm398_vm1, %v5116_v33, 0.0  ;;  %v420_v42 = vsel %vm398_vm1, %v5118_v34, 0.0  ;;  %v468_v47 = vmul.f32 %v5083_v12, %v5083_v12  ;;  %v469_v48 = vmul.f32 %v5085_v13, %v5085_v13 }
  0x21   : > { %4456 = vmatpush3.msra.mxu0 %v572_v7  ;;  %v405_v31 = vadd.f32 %v404_v23, %v403_v25  ;;  %v470_v49 = vmul.f32 %v5087_v14, %v5087_v14  ;;  %v471_v51 = vmul.f32 %v5089_v15, %v5089_v15  ;;  %v5143_v52 = vunpack.c.l.bf16 %v4388_v45  ;;  %v4390_v7 = vld [vmem:[%s5069_s18 + $0x40] sm:$0xff]   ;;  %v4391_v25 = vld [vmem:[%s5069_s18 + $0x48] sm:$0xff]  }
  0x22   : > { %4457 = vmatprep.subr.mxu0 %v4946_v1  ;;  %v472_v54 = vmul.f32 %v5097_v20, %v5097_v20  ;;  %v500_v55 = vsel %vm398_vm1, %v468_v47, 0.0  ;;  %v501_v56 = vsel %vm398_vm1, %v469_v48, 0.0  ;;  %v5151_v61 = vunpack.c.h.bf16 %v4388_v45  ;;  %v4392_v45 = vld [vmem:[%s5069_s18 + $0x50] sm:$0xff]  }
  0x23   : > { %4458 = vmatpush3.msra.mxu0 %v571_v10  ;;  %v407_v36 = vadd.f32 %v406_v27, %v405_v31  ;;  %v503_v57 = vsel %vm398_vm1, %v470_v49, 0.0  ;;  %v502_v60 = vadd.f32 %v501_v56, %v500_v55  ;;  %v422_v62 = vsel %vm398_vm1, %v5143_v52, 0.0 }
  0x24   : > { %v473_v63 = vmul.f32 %v5104_v26, %v5104_v26  ;;  %v505_v0 = vsel %vm398_vm1, %v471_v51, 0.0  ;;  %v5158_v3 = vunpack.c.l.bf16 %v4389_v58  ;;  %v424_v4 = vsel %vm398_vm1, %v5151_v61, 0.0 }
  0x25   : > { %v409_v43 = vadd.f32 %v408_v35, %v407_v36  ;;  %v504_v2 = vadd.f32 %v503_v57, %v502_v60  ;;  %v474_v5 = vmul.f32 %v5108_v28, %v5108_v28  ;;  %v507_v6 = vsel %vm398_vm1, %v472_v54, 0.0 }
  0x26   : > { %v5166_v10 = vunpack.c.h.bf16 %v4389_v58  ;;  %v426_v11 = vsel %vm398_vm1, %v5158_v3, 0.0  ;;  %v475_v16 = vmul.f32 %v5110_v29, %v5110_v29  ;;  %v509_v17 = vsel %vm398_vm1, %v473_v63, 0.0 }
  0x27   : > { %v411_v44 = vadd.f32 %v410_v37, %v409_v43  ;;  %v506_v9 = vadd.f32 %v505_v0, %v504_v2  ;;  %v5173_v21 = vunpack.c.l.bf16 %v4390_v7  ;;  %v476_v23 = vmul.f32 %v5112_v30, %v5112_v30 }
  0x28   : > { %v428_v22 = vsel %vm398_vm1, %v5166_v10, 0.0  ;;  %v511_v24 = vsel %vm398_vm1, %v474_v5, 0.0  ;;  %v5181_v35 = vunpack.c.h.bf16 %v4390_v7  ;;  %v477_v37 = vmul.f32 %v5114_v32, %v5114_v32 }
  0x29   : > { %v413_v46 = vadd.f32 %v412_v38, %v411_v44  ;;  %v508_v19 = vadd.f32 %v507_v6, %v506_v9  ;;  %v430_v36 = vsel %vm398_vm1, %v5173_v21, 0.0  ;;  %v513_v38 = vsel %vm398_vm1, %v475_v16, 0.0 }
  0x2a   : > { %v478_v43 = vmul.f32 %v5116_v33, %v5116_v33  ;;  %v515_v44 = vsel %vm398_vm1, %v476_v23, 0.0  ;;  %v5196_v48 = vunpack.c.h.bf16 %v4391_v25  ;;  %v517_v51 = vsel %vm398_vm1, %v477_v37, 0.0 }
  0x2b   : > { %v415_v50 = vadd.f32 %v414_v39, %v413_v46  ;;  %v510_v31 = vadd.f32 %v509_v17, %v508_v19  ;;  %v5203_v55 = vunpack.c.l.bf16 %v4392_v45  ;;  %v480_v57 = vmul.f32 %v5143_v52, %v5143_v52 }
  0x2c   : > { %v436_v56 = vsel %vm398_vm1, %v5196_v48, 0.0  ;;  %v519_v58 = vsel %vm398_vm1, %v478_v43, 0.0  ;;  %v5211_v63 = vunpack.c.h.bf16 %v4392_v45 }
  0x2d   : > { %v417_v53 = vadd.f32 %v416_v40, %v415_v50  ;;  %v512_v40 = vadd.f32 %v511_v24, %v510_v31  ;;  %v479_v50 = vmul.f32 %v5118_v34, %v5118_v34  ;;  %v438_v0 = vsel %vm398_vm1, %v5203_v55, 0.0 }
  0x2e   : > { %v440_v7 = vsel %vm398_vm1, %v5211_v63, 0.0  ;;  %v523_v9 = vsel %vm398_vm1, %v480_v57, 0.0 }
  0x2f   : > { %v419_v59 = vadd.f32 %v418_v41, %v417_v53  ;;  %v5188_v41 = vunpack.c.l.bf16 %v4391_v25  ;;  %v514_v47 = vadd.f32 %v513_v38, %v512_v40  ;;  %v521_v2 = vsel %vm398_vm1, %v479_v50, 0.0  ;;  %v4395_v38 = vld [vmem:[%s5069_s18 + $0x68] sm:$0xff]  }
  0x31   : > { %v421_v1 = vadd.f32 %v420_v42, %v419_v59  ;;  %v432_v42 = vsel %vm398_vm1, %v5181_v35, 0.0  ;;  %v434_v49 = vsel %vm398_vm1, %v5188_v41, 0.0  ;;  %v516_v54 = vadd.f32 %v515_v44, %v514_v47  ;;  %v4393_v59 = vld [vmem:[%s5069_s18 + $0x58] sm:$0xff]  }
  0x32   : > { %v5218_v6 = vunpack.c.l.bf16 %v4393_v59  ;;  %v485_v44 = vmul.f32 %v5181_v35, %v5181_v35 }
  0x33   : > { %v423_v8 = vadd.f32 %v422_v62, %v421_v1  ;;  %v518_v62 = vadd.f32 %v517_v51, %v516_v54  ;;  %v481_v1 = vmul.f32 %v5151_v61, %v5151_v61  ;;  %v486_v51 = vmul.f32 %v5188_v41, %v5188_v41  ;;  %v4396_v54 = vld [vmem:[%s5069_s18 + $0x70] sm:$0xff]  }
  0x34   : > { %v442_v19 = vsel %vm398_vm1, %v5218_v6, 0.0 }
  0x35   : > { %v425_v18 = vadd.f32 %v424_v4, %v423_v8  ;;  %v520_v5 = vadd.f32 %v519_v58, %v518_v62  ;;  %v482_v8 = vmul.f32 %v5158_v3, %v5158_v3  ;;  %v525_v23 = vsel %vm398_vm1, %v481_v1, 0.0 }
  0x36   : > { %v5256_v58 = vunpack.c.h.bf16 %v4395_v38  ;;  %v533_v62 = vsel %vm398_vm1, %v485_v44, 0.0 }
  0x37   : > { %v427_v27 = vadd.f32 %v426_v11, %v425_v18  ;;  %v4394_v11 = vld [vmem:[%s5069_s18 + $0x60] sm:$0xff]   ;;  %v522_v17 = vadd.f32 %v521_v2, %v520_v5  ;;  %v5226_v18 = vunpack.c.h.bf16 %v4393_v59  ;;  %v527_v37 = vsel %vm398_vm1, %v482_v8, 0.0 }
  0x38   : > { %v5263_v2 = vunpack.c.l.bf16 %v4396_v54  ;;  %v488_v5 = vmul.f32 %v5203_v55, %v5203_v55 }
  0x39   : > { %v429_v39 = vadd.f32 %v428_v22, %v427_v27  ;;  %v483_v22 = vmul.f32 %v5166_v10, %v5166_v10  ;;  %v524_v25 = vadd.f32 %v523_v9, %v522_v17  ;;  %v5233_v27 = vunpack.c.l.bf16 %v4394_v11 }
  0x3a   : > { %v444_v31 = vsel %vm398_vm1, %v5226_v18, 0.0  ;;  %v489_v17 = vmul.f32 %v5211_v63, %v5211_v63 }
  0x3b   : > { %v431_v46 = vadd.f32 %v430_v36, %v429_v39  ;;  %v484_v36 = vmul.f32 %v5173_v21, %v5173_v21  ;;  %v526_v40 = vadd.f32 %v525_v23, %v524_v25  ;;  %v446_v43 = vsel %vm398_vm1, %v5233_v27, 0.0 }
  0x3c   : > { %v529_v45 = vsel %vm398_vm1, %v483_v22, 0.0  ;;  %v4397_v22 = vld [vmem:[%s5069_s18 + $0x78] sm:$0xff]  }
  0x3d   : > { %v433_v53 = vadd.f32 %v432_v42, %v431_v46  ;;  %v5241_v42 = vunpack.c.h.bf16 %v4394_v11  ;;  %v528_v47 = vadd.f32 %v527_v37, %v526_v40  ;;  %v5270_v11 = vunpack.c.h.bf16 %v4396_v54 }
  0x3e   : > { %v491_v40 = vmul.f32 %v5226_v18, %v5226_v18 }
  0x3f   : > { %v435_v60 = vadd.f32 %v434_v49, %v433_v53  ;;  %v5248_v49 = vunpack.c.l.bf16 %v4395_v38  ;;  %v448_v50 = vsel %vm398_vm1, %v5241_v42, 0.0  ;;  %v531_v53 = vsel %vm398_vm1, %v484_v36, 0.0 }
  0x40   : > { %v530_v57 = vadd.f32 %v529_v45, %v528_v47  ;;  %v456_v25 = vsel %vm398_vm1, %v5270_v11, 0.0  ;;  %v539_v36 = vsel %vm398_vm1, %v488_v5, 0.0  ;;  %v492_v47 = vmul.f32 %v5233_v27, %v5233_v27 }
  0x41   : > { %v437_v4 = vadd.f32 %v436_v56, %v435_v60  ;;  %v450_v59 = vsel %vm398_vm1, %v5248_v49, 0.0  ;;  %v487_v60 = vmul.f32 %v5196_v48, %v5196_v48  ;;  %v493_v54 = vmul.f32 %v5241_v42, %v5241_v42 }
  0x42   : > { %v532_v1 = vadd.f32 %v531_v53, %v530_v57  ;;  %v5293_v53 = vunpack.c.h.bf16 %v4397_v22 }
  0x43   : > { %v439_v16 = vadd.f32 %v438_v0, %v437_v4  ;;  %v452_v4 = vsel %vm398_vm1, %v5256_v58, 0.0  ;;  %v549_v5 = vsel %vm398_vm1, %v493_v54, 0.0 }
  0x44   : > { %v534_v9 = vadd.f32 %v533_v62, %v532_v1  ;;  %v494_v62 = vmul.f32 %v5248_v49, %v5248_v49 }
  0x45   : > { %v441_v24 = vadd.f32 %v440_v7, %v439_v16  ;;  %v535_v7 = vsel %vm398_vm1, %v486_v51, 0.0  ;;  %v454_v16 = vsel %vm398_vm1, %v5263_v2, 0.0 }
  0x47   : > { %v443_v39 = vadd.f32 %v442_v19, %v441_v24  ;;  %v537_v19 = vsel %vm398_vm1, %v487_v60, 0.0  ;;  %v536_v24 = vadd.f32 %v535_v7, %v534_v9  ;;  %v460_v60 = vsel %vm398_vm1, %v5293_v53, 0.0 }
  0x48   : > { %v496_v9 = vmul.f32 %v5263_v2, %v5263_v2 }
  0x49   : > { %v445_v46 = vadd.f32 %v444_v31, %v443_v39  ;;  %v490_v31 = vmul.f32 %v5218_v6, %v5218_v6  ;;  %v538_v38 = vadd.f32 %v537_v19, %v536_v24  ;;  %v5283_v39 = vunpack.c.l.bf16 %v4397_v22 }
  0x4a   : > { %v497_v19 = vmul.f32 %v5270_v11, %v5270_v11 }
  0x4b   : > { %v447_v56 = vadd.f32 %v446_v43, %v445_v46  ;;  %v541_v43 = vsel %vm398_vm1, %v489_v17, 0.0  ;;  %v540_v45 = vadd.f32 %v539_v36, %v538_v38  ;;  %v458_v46 = vsel %vm398_vm1, %v5283_v39, 0.0 }
  0x4c   : > { %v557_v38 = vsel %vm398_vm1, %v497_v19, 0.0 }
  0x4d   : > { %v449_v0 = vadd.f32 %v448_v50, %v447_v56  ;;  %v543_v50 = vsel %vm398_vm1, %v490_v31, 0.0  ;;  %v542_v51 = vadd.f32 %v541_v43, %v540_v45  ;;  %v545_v56 = vsel %vm398_vm1, %v491_v40, 0.0 }
  0x4e   : > { %v555_v31 = vsel %vm398_vm1, %v496_v9, 0.0  ;;  %v7229_v9 = vmov 0  }
  0x4f   : > { %v451_v8 = vadd.f32 %v450_v59, %v449_v0  ;;  %v544_v59 = vadd.f32 %v543_v50, %v542_v51  ;;  %v547_v0 = vsel %vm398_vm1, %v492_v47, 0.0  ;;  %2749 = vmatprep.subr.bf16.mxu0 %v7229_v9  ;;  %2504 = vmatprep.subr.bf16.mxu1 %v7229_v9  ;;  %328 = vst.msk [vmem:[#allocation2] sm:$0xff] %vm5343_vm5, %v7229_v9  ;;  %329 = vst.msk [vmem:[#allocation2 + $0x8] sm:$0xff] %vm5343_vm5, %v7229_v9 }
  0x50   : > { %330 = vst.msk [vmem:[#allocation2 + $0x110] sm:$0xff] %vm5343_vm5, %v7229_v9  ;;  %331 = vst.msk [vmem:[#allocation2 + $0x118] sm:$0xff] %vm5343_vm5, %v7229_v9 }
  0x51   : > { %v453_v23 = vadd.f32 %v452_v4, %v451_v8  ;;  %v546_v1 = vadd.f32 %v545_v56, %v544_v59  ;;  %v495_v4 = vmul.f32 %v5256_v58, %v5256_v58 }
  0x53   : > { %v455_v37 = vadd.f32 %v454_v16, %v453_v23  ;;  %v548_v8 = vadd.f32 %v547_v0, %v546_v1  ;;  %v551_v16 = vsel %vm398_vm1, %v494_v62, 0.0  ;;  %v553_v22 = vsel %vm398_vm1, %v495_v4, 0.0 }
  0x55   : > { %v457_v44 = vadd.f32 %v456_v25, %v455_v37  ;;  %v550_v17 = vadd.f32 %v549_v5, %v548_v8  ;;  %v498_v25 = vmul.f32 %v5283_v39, %v5283_v39  ;;  %v499_v37 = vmul.f32 %v5293_v53, %v5293_v53  ;;  %v4669_v8 = vld [vmem:[%s7222_s4 + $0x98] sm:$0xff]  }
  0x56   : > { %2505 = vmatpush1.bf16.msra.mxu1 %v4669_v8  ;;  %v397_v8 = vld [vmem:[%s7220_s2] sm:$0x1] }
  0x57   : > { %v459_v57 = vadd.f32 %v458_v46, %v457_v44  ;;  %v552_v24 = vadd.f32 %v551_v16, %v550_v17  ;;  %v559_v44 = vsel %vm398_vm1, %v498_v25, 0.0  ;;  %v561_v46 = vsel %vm398_vm1, %v499_v37, 0.0  ;;  %v4668_v16 = vld [vmem:[%s7222_s4 + $0x30] sm:$0xff]   ;;  %2506 = vmatprep.subr.bf16.mxu1 %v7229_v9  ;;  %v4673_v25 = vld [vmem:[%s7222_s4 + $0x88] sm:$0xff]  }
  0x58   : > { %v4671_v17 = vld [vmem:[%s7222_s4 + $0x90] sm:$0xff]  }
  0x59   : > { %v461_v7 = vadd.f32 %v460_v60, %v459_v57  ;;  %v554_v36 = vadd.f32 %v553_v22, %v552_v24  ;;  %v4670_v24 = vld [vmem:[%s7222_s4 + $0x28] sm:$0xff]  }
  0x5a   : > { %2507 = vmatpush1.bf16.msra.mxu1 %v4671_v17 }
  0x5b   : > { %v462_v23 = vrot.slane %v461_v7, 4  ;;  %v556_v43 = vadd.f32 %v555_v31, %v554_v36  ;;  %2508 = vmatprep.subr.bf16.mxu1 %v7229_v9 }
  0x5d   : > { %v463_v40 = vadd.f32 %v462_v23, %v461_v7  ;;  %v558_v45 = vadd.f32 %v557_v38, %v556_v43  ;;  %v4667_v7 = vld [vmem:[%s7222_s4 + $0x38] sm:$0xff]   ;;  %v4672_v38 = vld [vmem:[%s7222_s4 + $0x20] sm:$0xff]  }
  0x5e   : > { %2509 = vmatpush1.bf16.msra.mxu1 %v4673_v25 }
  0x5f   : > { %v464_v47 = vrot.slane %v463_v40, 2  ;;  %v560_v50 = vadd.f32 %v559_v44, %v558_v45  ;;  %2510 = vmatprep.subr.bf16.mxu1 %v7229_v9  ;;  %v4674_v45 = vld [vmem:[%s7222_s4 + $0x18] sm:$0xff]  }
  0x61   : > { %v562_v51 = vadd.f32 %v561_v46, %v560_v50  ;;  %v465_v54 = vadd.f32 %v464_v47, %v463_v40  ;;  %v4675_v40 = vld [vmem:[%s7222_s4 + $0x80] sm:$0xff]   ;;  %v4677_v46 = vld [vmem:[%s7222_s4 + $0x78] sm:$0xff]   ;;  %v4676_v47 = vld [vmem:[%s7222_s4 + $0x10] sm:$0xff]  }
  0x62   : > { %2511 = vmatpush1.bf16.msra.mxu1 %v4675_v40  ;;  %v4679_v50 = vld [vmem:[%s7222_s4 + $0x70] sm:$0xff]  }
  0x63   : > { %v563_v56 = vrot.slane %v562_v51, 4  ;;  %v466_v59 = vrot.slane %v465_v54, 1  ;;  %2512 = vmatprep.subr.bf16.mxu1 %v7229_v9 }
  0x65   : > { %v564_v57 = vadd.f32 %v563_v56, %v562_v51  ;;  %v467_v0 = vadd.f32 %v466_v59, %v465_v54  ;;  %v672_v51 = vlaneseq  ;;  %v4678_v54 = vld [vmem:[%s7222_s4 + $0x8] sm:$0xff]   ;;  %v3983_v59 = vld [vmem:[%s7219_s1] ss:$0 sm:$0xff] }
  0x66   : > { %2513 = vmatpush1.bf16.msra.mxu1 %v4677_v46  ;;  %v4681_v56 = vld [vmem:[%s7222_s4 + $0x68] sm:$0xff]  }
  0x67   : > { %v565_v60 = vrot.slane %v564_v57, 2  ;;  %2514 = vmatprep.subr.bf16.mxu1 %v7229_v9 }
  0x69   : > { %v566_v62 = vadd.f32 %v565_v60, %v564_v57  ;;  %v5393_v57 = vshrl.u32 %v672_v51, 7  ;;  %v4680_v60 = vld [vmem:[%s7222_s4] sm:$0xff]  }
  0x6a   : > { %2515 = vmatpush1.bf16.msra.mxu1 %v4679_v50 }
  0x6b   : > { %v567_v1 = vrot.slane %v566_v62, 1  ;;  %2516 = vmatprep.subr.bf16.mxu1 %v7229_v9  ;;  %vm1451_vm6 = vcmp.lt.s32.totalorder %v5393_v57, 1  ;;  %vm1644_vm7 = vcmp.lt.s32.totalorder %v5393_v57, 7 }
  0x6d   : > { %v568_v4 = vadd.f32 %v567_v1, %v566_v62  ;;  %v4683_v62 = vld [vmem:[%s7222_s4 + $0x60] sm:$0xff]   ;;  %v674_v1 = vsub.s32 1, %v5393_v57 }
  0x6e   : > { %2517 = vmatpush1.bf16.msra.mxu1 %v4681_v56 }
  0x6f   : > { %v570_v5 = vsel %vm569_vm2, %v467_v0, %v568_v4  ;;  %2518 = vmatprep.subr.bf16.mxu1 %v7229_v9 }
  0x70   : > { %4460 = vmatmul.mubr.msk.f32.vlgmr.msra.gmra.mxu0 %vm398_vm1, %v570_v5  ;;  %v4682_v5 = vld [vmem:[%s7222_s4 + $0x58] sm:$0xff]  }
  0x71   : > { %2750 = vmatpush1.bf16.msra.mxu0 %v4667_v7 }
  0x72   : > { %2751 = vmatprep.subr.bf16.mxu0 %v7229_v9  ;;  %2519 = vmatpush1.bf16.msra.mxu1 %v4683_v62 }
  0x73   : > { %2528 = vmatprep.subr.bf16.mxu1 %v7229_v9 }
  0x75   : > { %2752 = vmatpush1.bf16.msra.mxu0 %v4668_v16 }
  0x76   : > { %2753 = vmatprep.subr.bf16.mxu0 %v7229_v9 }
  0x79   : > { %2754 = vmatpush1.bf16.msra.mxu0 %v4670_v24 }
  0x7a   : > { %2755 = vmatprep.subr.bf16.mxu0 %v7229_v9 }
  0x7d   : > { %2756 = vmatpush1.bf16.msra.mxu0 %v4672_v38 }
  0x7e   : > { %2757 = vmatprep.subr.bf16.mxu0 %v7229_v9 }
  0x81   : > { %2758 = vmatpush1.bf16.msra.mxu0 %v4674_v45 }
  0x82   : > { %2759 = vmatprep.subr.bf16.mxu0 %v7229_v9 }
  0x85   : > { %2760 = vmatpush1.bf16.msra.mxu0 %v4676_v47 }
  0x86   : > { %2761 = vmatprep.subr.bf16.mxu0 %v7229_v9 }
  0x89   : > { %2762 = vmatpush1.bf16.msra.mxu0 %v4678_v54 }
  0x8a   : > { %2763 = vmatprep.subr.bf16.mxu0 %v7229_v9 }
  0x8d   : > { %2764 = vmatpush1.bf16.msra.mxu0 %v4680_v60 }
  0x8e   : > { %2773 = vmatprep.subr.bf16.mxu0 %v7229_v9 }
  0x91   : > { %2774 = vmatpush2.bf16.msra.mxu0 %v4682_v5 }
  0x92   : > { %2775 = vmatprep.subr.bf16.mxu0 %v7229_v9 }
 0x130   : > { %v648_v19 = vpop.f32.mrf.mxu0 }
 0x131   : > { %v652_v22 = vmul.f32 0.001953125, %v648_v19  ;;  %v711_v19 = vsub.s32 0, %v5393_v57 }
 0x132   : > { %v4461_v23 = vpop.f32.mrf.mxu0 }
 0x133   : > { %v653_v36 = vmul.f32 %v652_v22, %v652_v22  ;;  %v4684_v23 = vld [vmem:[%s7222_s4 + $0x50] sm:$0xff]  }
 0x134   : > { %2776 = vmatpush2.bf16.msra.mxu0 %v4684_v23 }
 0x135   : > { %v655_v37 = vrot.slane %v653_v36, 7  ;;  %2777 = vmatprep.subr.bf16.mxu0 %v7229_v9 }
 0x137   : > { %v657_v43 = vsub.f32 %v652_v22, %v655_v37 }
 0x139   : > { %v658_v44 = vadd.f32 1e-05, %v657_v43 }
 0x13b   : > { %4754 = vrsqrt.f32 %v658_v44 }
 0x148   : > { %v4755_v0 = vpop.eup %4754 }
 0x149   : > { %v666_v4 = vmul.f32 %v4755_v0, %v3983_v59 }
 0x14b   : > { %v668_v7 = vrot.slane %v666_v4, 1  ;;  %v5415_v16 = vrot.slane %v666_v4, %v674_v1 }
 0x14d   : > { %v670_v17 = vmul.f32 %v668_v7, %v652_v22  ;;  %v680_v25 = vmul.f32 %v5097_v20, %v5415_v16  ;;  %v681_v37 = vmul.f32 %v5104_v26, %v5415_v16  ;;  %v676_v22 = vmul.f32 %v5083_v12, %v5415_v16 }
 0x14e   : > { %v677_v38 = vmul.f32 %v5085_v13, %v5415_v16  ;;  %v682_v40 = vmul.f32 %v5108_v28, %v5415_v16  ;;  %v683_v43 = vmul.f32 %v5110_v29, %v5415_v16  ;;  %v678_v20 = vmul.f32 %v5087_v14, %v5415_v16 }
 0x14f   : > { %v671_v24 = vsub.f32 %v397_v8, %v670_v17  ;;  %v679_v29 = vmul.f32 %v5089_v15, %v5415_v16  ;;  %v686_v45 = vmul.f32 %v5116_v33, %v5415_v16  ;;  %v687_v15 = vmul.f32 %v5118_v34, %v5415_v16 }
 0x150   : > { %v684_v60 = vmul.f32 %v5112_v30, %v5415_v16  ;;  %v685_v1 = vmul.f32 %v5114_v32, %v5415_v16  ;;  %v690_v5 = vmul.f32 %v5158_v3, %v5415_v16  ;;  %v691_v8 = vmul.f32 %v5166_v10, %v5415_v16 }
 0x151   : > { %v5424_v36 = vrot.slane %v671_v24, %v711_v19  ;;  %v688_v19 = vmul.f32 %v5143_v52, %v5415_v16  ;;  %v689_v24 = vmul.f32 %v5151_v61, %v5415_v16 }
 0x153   : > { %v5439_v44 = vadd.f32 %v5424_v36, %v680_v25  ;;  %v5442_v26 = vadd.f32 %v5424_v36, %v681_v37  ;;  %v5445_v12 = vadd.f32 %v5424_v36, %v676_v22  ;;  %v5448_v13 = vadd.f32 %v5424_v36, %v677_v38 }
 0x154   : > { %v5452_v28 = vadd.f32 %v5424_v36, %v682_v40  ;;  %v5455_v14 = vadd.f32 %v5424_v36, %v683_v43  ;;  %v5465_v51 = vadd.f32 %v5424_v36, %v678_v20  ;;  %v5469_v56 = vadd.f32 %v5424_v36, %v679_v29 }
 0x155   : > { %v3988_v46 = vmul.f32 -1.442695, %v5439_v44  ;;  %v3989_v47 = vmul.f32 -1.442695, %v5442_v26  ;;  %v3984_v50 = vmul.f32 -1.442695, %v5445_v12  ;;  %v5475_v59 = vadd.f32 %v5424_v36, %v686_v45 }
 0x156   : > { %v3985_v54 = vmul.f32 -1.442695, %v5448_v13  ;;  %v3990_v33 = vmul.f32 -1.442695, %v5452_v28  ;;  %v3991_v62 = vmul.f32 -1.442695, %v5455_v14  ;;  %v5481_v0 = vadd.f32 %v5424_v36, %v687_v15 }
 0x157   : > { %4756 = vpow2.f32 %v3988_v46  ;;  %v3986_v34 = vmul.f32 -1.442695, %v5465_v51  ;;  %v5487_v4 = vadd.f32 %v5424_v36, %v684_v60  ;;  %v3987_v30 = vmul.f32 -1.442695, %v5469_v56 }
 0x158   : > { %4758 = vpow2.f32 %v3989_v47  ;;  %v5493_v7 = vadd.f32 %v5424_v36, %v685_v1  ;;  %v3994_v32 = vmul.f32 -1.442695, %v5475_v59  ;;  %v5499_v17 = vadd.f32 %v5424_v36, %v690_v5 }
 0x159   : > { %4760 = vpow2.f32 %v3984_v50  ;;  %v3995_v3 = vmul.f32 -1.442695, %v5481_v0  ;;  %v5505_v23 = vadd.f32 %v5424_v36, %v691_v8  ;;  %v3992_v10 = vmul.f32 -1.442695, %v5487_v4 }
 0x15a   : > { %4762 = vpow2.f32 %v3985_v54  ;;  %v5511_v25 = vadd.f32 %v5424_v36, %v688_v19  ;;  %v3993_v37 = vmul.f32 -1.442695, %v5493_v7  ;;  %v5515_v52 = vadd.f32 %v5424_v36, %v689_v24 }
 0x15b   : > { %4764 = vpow2.f32 %v3990_v33  ;;  %v3998_v22 = vmul.f32 -1.442695, %v5499_v17  ;;  %v3999_v38 = vmul.f32 -1.442695, %v5505_v23  ;;  %v694_v40 = vmul.f32 %v5188_v41, %v5415_v16 }
 0x15c   : > { %4766 = vpow2.f32 %v3991_v62  ;;  %v3996_v61 = vmul.f32 -1.442695, %v5511_v25  ;;  %v695_v43 = vmul.f32 %v5196_v48, %v5415_v16  ;;  %v3997_v20 = vmul.f32 -1.442695, %v5515_v52 }
 0x15d   : > { %4768 = vpow2.f32 %v3986_v34  ;;  %v692_v29 = vmul.f32 %v5173_v21, %v5415_v16  ;;  %v5528_v45 = vadd.f32 %v5424_v36, %v694_v40  ;;  %v693_v47 = vmul.f32 %v5181_v35, %v5415_v16 }
 0x15e   : > { %4770 = vpow2.f32 %v3987_v30  ;;  %v5531_v46 = vadd.f32 %v5424_v36, %v695_v43  ;;  %v698_v60 = vmul.f32 %v5218_v6, %v5415_v16  ;;  %v699_v35 = vmul.f32 %v5226_v18, %v5415_v16 }
 0x15f   : > { %4772 = vpow2.f32 %v3994_v32  ;;  %v5536_v48 = vadd.f32 %v5424_v36, %v692_v29  ;;  %v5539_v21 = vadd.f32 %v5424_v36, %v693_v47  ;;  %v5546_v34 = vmul.f32 -1.442695, %v5528_v45 }
 0x160   : > { %4774 = vpow2.f32 %v3995_v3  ;;  %v5549_v5 = vmul.f32 -1.442695, %v5531_v46  ;;  %v5555_v6 = vadd.f32 %v5424_v36, %v698_v60  ;;  %v5561_v24 = vadd.f32 %v5424_v36, %v699_v35 }
 0x161   : > { %4776 = vpow2.f32 %v3992_v10  ;;  %v5552_v32 = vmul.f32 -1.442695, %v5536_v48  ;;  %v5558_v3 = vmul.f32 -1.442695, %v5539_v21  ;;  %v702_v43 = vmul.f32 %v5248_v49, %v5415_v16 }
 0x162   : > { %4778 = vpow2.f32 %v3993_v37  ;;  %v700_v49 = vmul.f32 %v5233_v27, %v5415_v16  ;;  %v701_v60 = vmul.f32 %v5241_v42, %v5415_v16 }
 0x163   : > { %4780 = vpow2.f32 %v3998_v22  ;;  %v696_v22 = vmul.f32 %v5203_v55, %v5415_v16 }
 0x164   : > { %v4757_v41 = vpop.eup %4756  ;;  %4782 = vpow2.f32 %v3999_v38  ;;  %v697_v38 = vmul.f32 %v5211_v63, %v5415_v16 }
 0x165   : > { %v4759_v50 = vpop.eup %4758  ;;  %v846_v54 = vadd.f32 1.0, %v4757_v41  ;;  %4784 = vpow2.f32 %v3996_v61  ;;  %v5572_v41 = vadd.f32 %v5424_v36, %v696_v22 }
 0x166   : > { %v4761_v15 = vpop.eup %4760  ;;  %v847_v33 = vadd.f32 1.0, %v4759_v50  ;;  %4786 = vpow2.f32 %v3997_v20  ;;  %v703_v20 = vmul.f32 %v5256_v58, %v5415_v16  ;;  %v5575_v55 = vadd.f32 %v5424_v36, %v697_v38 }
 0x167   : > { %v4763_v62 = vpop.eup %4762  ;;  %4788 = vrcp.f32 %v846_v54  ;;  %v842_v1 = vadd.f32 1.0, %v4761_v15  ;;  %v5578_v54 = vadd.f32 %v5424_v36, %v702_v43 }
 0x168   : > { %v4765_v30 = vpop.eup %4764  ;;  %4790 = vrcp.f32 %v847_v33  ;;  %v843_v8 = vadd.f32 1.0, %v4763_v62  ;;  %v5583_v33 = vadd.f32 %v5424_v36, %v703_v20  ;;  %v5604_v22 = vmul.f32 -1.442695, %v5575_v55 }
 0x169   : > { %v4767_v19 = vpop.eup %4766  ;;  %4792 = vrcp.f32 %v842_v1  ;;  %v848_v18 = vadd.f32 1.0, %v4765_v30  ;;  %v5588_v1 = vmul.f32 -1.442695, %v5555_v6  ;;  %v5591_v30 = vadd.f32 %v5424_v36, %v700_v49 }
 0x16a   : > { %v4769_v10 = vpop.eup %4768  ;;  %4794 = vrcp.f32 %v843_v8  ;;  %v849_v37 = vadd.f32 1.0, %v4767_v19  ;;  %v5594_v19 = vmul.f32 -1.442695, %v5561_v24  ;;  %v5611_v43 = vmul.f32 -1.442695, %v5583_v33 }
 0x16b   : > { %v4771_v61 = vpop.eup %4770  ;;  %4796 = vrcp.f32 %v848_v18  ;;  %v844_v40 = vadd.f32 1.0, %v4769_v10  ;;  %v5597_v18 = vadd.f32 %v5424_v36, %v701_v60  ;;  %v4685_v60 = vld [vmem:[%s7222_s4 + $0xb8] sm:$0xff]  }
 0x16c   : > { %v4773_v29 = vpop.eup %4772  ;;  %4798 = vrcp.f32 %v849_v37  ;;  %v845_v47 = vadd.f32 1.0, %v4771_v61  ;;  %v5601_v37 = vmul.f32 -1.442695, %v5572_v41  ;;  %2529 = vmatpush2.bf16.msra.mxu1 %v4685_v60 }
 0x16d   : > { %v4775_v50 = vpop.eup %4774  ;;  %4800 = vrcp.f32 %v844_v40  ;;  %v852_v63 = vadd.f32 1.0, %v4773_v29  ;;  %v5608_v40 = vmul.f32 -1.442695, %v5578_v54  ;;  %2530 = vmatprep.subr.bf16.mxu1 %v7229_v9 }
 0x16e   : > { %v4777_v15 = vpop.eup %4776  ;;  %4802 = vrcp.f32 %v845_v47  ;;  %v853_v58 = vadd.f32 1.0, %v4775_v50  ;;  %v5614_v47 = vmul.f32 -1.442695, %v5591_v30  ;;  %v706_v50 = vmul.f32 %v5283_v39, %v5415_v16 }
 0x16f   : > { %v4779_v35 = vpop.eup %4778  ;;  %4804 = vrcp.f32 %v852_v63  ;;  %v850_v62 = vadd.f32 1.0, %v4777_v15  ;;  %v5619_v15 = vmul.f32 -1.442695, %v5597_v18 }
 0x170   : > { %v4781_v8 = vpop.eup %4780  ;;  %4806 = vrcp.f32 %v853_v58  ;;  %v851_v27 = vadd.f32 1.0, %v4779_v35  ;;  %v707_v58 = vmul.f32 %v5293_v53, %v5415_v16  ;;  %v4686_v35 = vld [vmem:[%s7222_s4 + $0x48] sm:$0xff]  }
 0x171   : > { %v4783_v42 = vpop.eup %4782  ;;  %4808 = vrcp.f32 %v850_v62  ;;  %v856_v10 = vadd.f32 1.0, %v4781_v8  ;;  %v5633_v8 = vadd.f32 %v5424_v36, %v706_v50  ;;  %2778 = vmatpush2.bf16.msra.mxu0 %v4686_v35 }
 0x172   : > { %v4785_v38 = vpop.eup %4784  ;;  %4810 = vrcp.f32 %v851_v27  ;;  %v857_v61 = vadd.f32 1.0, %v4783_v42  ;;  %v704_v27 = vmul.f32 %v5263_v2, %v5415_v16  ;;  %2779 = vmatprep.subr.bf16.mxu0 %v7229_v9 }
 0x173   : > { %v4787_v20 = vpop.eup %4786  ;;  %4812 = vrcp.f32 %v856_v10  ;;  %v854_v29 = vadd.f32 1.0, %v4785_v38  ;;  %v5641_v10 = vadd.f32 %v5424_v36, %v707_v58  ;;  %v5645_v38 = vmul.f32 %v5270_v11, %v5415_v16 }
 0x174   : > { %v4789_v63 = vpop.eup %4788  ;;  %4814 = vrcp.f32 %v857_v61  ;;  %v855_v49 = vadd.f32 1.0, %v4787_v20  ;;  %v5674_v60 = vadd.f32 %v5424_v36, %v704_v27 }
 0x175   : > { %v4791_v62 = vpop.eup %4790  ;;  %v5630_v39 = vmul.f32 %v4789_v63, %v5439_v44  ;;  %4816 = vrcp.f32 %v854_v29 }
 0x176   : > { %v4793_v53 = vpop.eup %4792  ;;  %v5638_v42 = vmul.f32 %v4791_v62, %v5442_v26  ;;  %4818 = vrcp.f32 %v855_v49 }
 0x177   : > { %v4795_v44 = vpop.eup %4794  ;;  %v1423_v61 = vrot.slane %v5630_v39, 7  ;;  %v1616_v20 = vrot.slane %v5630_v39, 1  ;;  %v5650_v2 = vmul.f32 %v4793_v53, %v5445_v12  ;;  %4820 = vpow2.f32 %v5546_v34  ;;  %v4687_v12 = vld [vmem:[%s7222_s4 + $0xb0] sm:$0xff]   ;;  %v4688_v34 = vld [vmem:[%s7222_s4 + $0x40] sm:$0xff]  }
 0x178   : > { %v4797_v26 = vpop.eup %4796  ;;  %v1424_v11 = vrot.slane %v5638_v42, 7  ;;  %v1617_v16 = vrot.slane %v5638_v42, 1  ;;  %v4597_v29 = vpack.i.bf16 %v5638_v42, %v5630_v39  ;;  %v5660_v50 = vmul.f32 %v4795_v44, %v5448_v13  ;;  %v4689_v13 = vld [vmem:[#allocation2 + $0x4] ss:$8 sps:$4 sm:$0xff]   ;;  %2531 = vmatpush2.bf16.msra.mxu1 %v4687_v12  ;;  %2780 = vmatpush2.bf16.msra.mxu0 %v4688_v34 }
 0x179   : > { %v4799_v63 = vpop.eup %4798  ;;  %v7228_v49 = vrot.slane %v5650_v2, 7  ;;  %v5670_v58 = vmul.f32 %v4797_v26, %v5452_v28  ;;  %4822 = vpow2.f32 %v5549_v5  ;;  %v7227_v44 = vrot.slane %v5650_v2, 1  ;;  %2532 = vmatprep.subr.bf16.mxu1 %v7229_v9  ;;  %4146 = vmatprep.mubr.msk.bf16.mxu0 %vm398_vm1, %v4689_v13  ;;  %v4691_v34 = vld [vmem:[%s7222_s4 + $0xa8] sm:$0xff]  }
 0x17a   : > { %v4801_v35 = vpop.eup %4800  ;;  %4598 = vrot.lane.b32.xlu1 %v4597_v29, %s4949_s26  ;;  %v1613_v62 = vrot.slane %v5660_v50, 1  ;;  %v4587_v53 = vpack.i.bf16 %v5660_v50, %v5650_v2  ;;  %v5682_v28 = vmul.f32 %v4799_v63, %v5455_v14  ;;  %4824 = vpow2.f32 %v5552_v32  ;;  %3231 = vmatprep.subr.bf16.mxu0 %v7229_v9 }
 0x17b   : > { %v4803_v5 = vpop.eup %4802  ;;  %v1618_v27 = vrot.slane %v5670_v58, 1  ;;  %v5686_v26 = vmul.f32 %v4801_v35, %v5465_v51  ;;  %v5695_v29 = vsel %vm1451_vm6, %v1423_v61, %v1424_v11  ;;  %4826 = vpow2.f32 %v5558_v3 }
 0x17c   : > { %v4805_v14 = vpop.eup %4804  ;;  %4588 = vrot.lane.b32.xlu0 %v4587_v53, %s4949_s26  ;;  %v4602_v51 = vpack.i.bf16 %v5682_v28, %v5670_v58  ;;  %v5702_v12 = vmul.f32 %v4803_v5, %v5469_v56  ;;  %v5709_v32 = vsel %vm1644_vm7, %v1616_v20, %v1617_v16  ;;  %4828 = vpow2.f32 %v5588_v1  ;;  %2533 = vmatpush2.bf16.msra.mxu1 %v4691_v34  ;;  %v4692_v34 = vld [vmem:[%s7222_s4 + $0xa0] sm:$0xff]  }
 0x17d   : > { %v4807_v63 = vpop.eup %4806  ;;  %v1614_v35 = vrot.slane %v5686_v26, 1  ;;  %v5717_v56 = vmul.f32 %v4805_v14, %v5475_v59  ;;  %v5724_v3 = vsel %vm1644_vm7, %v1617_v16, %v1618_v27  ;;  %4830 = vpow2.f32 %v5594_v19  ;;  %2534 = vmatprep.subr.bf16.mxu1 %v7229_v9 }
 0x17e   : > { %v4809_v13 = vpop.eup %4808  ;;  %4603 = vrot.lane.b32.xlu1 %v4602_v51, %s4949_s26  ;;  %v1422_v53 = vrot.slane %v5702_v12, 7  ;;  %v4592_v5 = vpack.i.bf16 %v5702_v12, %v5686_v26  ;;  %v5732_v59 = vmul.f32 %v4807_v63, %v5481_v0  ;;  %v1420_v16 = vrot.slane %v5660_v50, 7 }
 0x17f   : > { %v4811_v1 = vpop.eup %4810  ;;  %v5737_v14 = vmul.f32 %v4809_v13, %v5487_v4  ;;  %4832 = vpow2.f32 %v5601_v37  ;;  %v5746_v51 = vsel %vm1644_vm7, %v1613_v62, %v1614_v35 }
 0x180   : > { %v4813_v0 = vpop.eup %4812  ;;  %4593 = vrot.lane.b32.xlu0 %v4592_v5, %s4949_s26  ;;  %v4612_v19 = vpack.i.bf16 %v5732_v59, %v5717_v56  ;;  %v5753_v4 = vmul.f32 %v4811_v1, %v5493_v7  ;;  %4834 = vpow2.f32 %v5604_v22  ;;  %v5762_v37 = vsel %vm1451_vm6, %v1422_v53, %v1423_v61  ;;  %2535 = vmatpush2.bf16.msra.mxu1 %v4692_v34 }
 0x181   : > { %v4815_v63 = vpop.eup %4814  ;;  %v5768_v13 = vmul.f32 %v4813_v0, %v5499_v17  ;;  %4836 = vpow2.f32 %v5608_v40  ;;  %v4014_v7 = vmul.f32 -1.442695, %v5633_v8  ;;  %v4015_v22 = vmul.f32 -1.442695, %v5641_v10  ;;  %4518 = vmatprep.subr.bf16.mxu1 %v7229_v9 }
 0x182   : > { %v4817_v5 = vpop.eup %4816  ;;  %4613 = vrot.lane.b32.xlu1 %v4612_v19, %s4949_s26  ;;  %v4607_v61 = vpack.i.bf16 %v5753_v4, %v5737_v14  ;;  %v5777_v1 = vmul.f32 %v4815_v63, %v5505_v23  ;;  %4838 = vpow2.f32 %v5611_v43  ;;  %v5782_v17 = vadd.f32 %v5424_v36, %v5645_v38 }
 0x183   : > { %v4819_v40 = vpop.eup %4818  ;;  %v5785_v0 = vmul.f32 %v4817_v5, %v5511_v25  ;;  %4840 = vpow2.f32 %v5614_v47  ;;  %v4012_v19 = vmul.f32 -1.442695, %v5674_v60  ;;  %v5795_v23 = vsel %vm1451_vm6, %v7228_v49, %v1420_v16 }
 0x184   : > { %v4821_v36 = vpop.eup %4820  ;;  %4608 = vrot.lane.b32.xlu0 %v4607_v61, %s4949_s26  ;;  %v4622_v25 = vpack.i.bf16 %v5777_v1, %v5768_v13  ;;  %v5802_v43 = vmul.f32 %v4819_v40, %v5515_v52  ;;  %4842 = vpow2.f32 %v5619_v15  ;;  %v5811_v47 = vsel %vm1644_vm7, %v7227_v44, %v1613_v62 }
 0x185   : > { %v7231_v38 = vrot.slane %v5737_v14, 1  ;;  %v860_v34 = vadd.f32 1.0, %v4821_v36  ;;  %4844 = vpow2.f32 %v4014_v7  ;;  %v1425_v63 = vrot.slane %v5670_v58, 7 }
 0x186   : > { %v4823_v5 = vpop.eup %4822  ;;  %4623 = vrot.lane.b32.xlu1 %v4622_v25, %s4949_s26  ;;  %v4617_v52 = vpack.i.bf16 %v5802_v43, %v5785_v0  ;;  %4846 = vpow2.f32 %v4015_v22  ;;  %v4013_v15 = vmul.f32 -1.442695, %v5782_v17  ;;  %v7232_v61 = vrot.slane %v5682_v28, 7 }
 0x187   : > { %v861_v40 = vadd.f32 1.0, %v4823_v5  ;;  %4848 = vrcp.f32 %v860_v34  ;;  %v5824_v62 = vsel %vm1451_vm6, %v1424_v11, %v1425_v63  ;;  %v1619_v7 = vrot.slane %v5682_v28, 1  ;;  %v4825_v36 = vpop.eup %4824 }
 0x188   : > { %4618 = vrot.lane.b32.xlu0 %v4617_v52, %s4949_s26  ;;  %4850 = vpow2.f32 %v4012_v19  ;;  %v5832_v22 = vsel %vm1451_vm6, %v1425_v63, %v7232_v61  ;;  %v1421_v25 = vrot.slane %v5686_v26, 7  ;;  %v4827_v34 = vpop.eup %4826  ;;  %v858_v42 = vadd.f32 1.0, %v4825_v36 }
 0x189   : > { %4852 = vrcp.f32 %v861_v40  ;;  %v5839_v11 = vsel %vm1644_vm7, %v1619_v7, %v7231_v38  ;;  %v5845_v19 = vsel %vm1644_vm7, %v1618_v27, %v1619_v7  ;;  %v4829_v5 = vpop.eup %4828  ;;  %v1428_v63 = vrot.slane %v5753_v4, 7 }
 0x18a   : > { %v859_v52 = vadd.f32 1.0, %v4827_v34  ;;  %4854 = vpow2.f32 %v4013_v15  ;;  %v5852_v40 = vsel %vm1451_vm6, %v1421_v25, %v1422_v53  ;;  %v4831_v36 = vpop.eup %4830  ;;  %v864_v44 = vadd.f32 1.0, %v4829_v5 }
 0x18b   : > { %4856 = vrcp.f32 %v858_v42  ;;  %v5858_v58 = vsel %vm1451_vm6, %v1420_v16, %v1421_v25  ;;  %v1615_v27 = vrot.slane %v5702_v12, 1  ;;  %v865_v15 = vadd.f32 1.0, %v4831_v36  ;;  %v2158_v36 = vld [vmem:[#allocation2 + $0x8] sm:$0xff] }
 0x18c   : > { %v4833_v7 = vpop.eup %4832  ;;  %4858 = vrcp.f32 %v859_v52  ;;  %v1429_v34 = vrot.slane %v5717_v56, 7  ;;  %v7234_v16 = vrot.slane %v5785_v0, 1  ;;  %v2157_v52 = vld [vmem:[#allocation2] sm:$0xff]  ;;  %v1622_v26 = vrot.slane %v5717_v56, 1 }
 0x18d   : > { %v4835_v49 = vpop.eup %4834  ;;  %4860 = vrcp.f32 %v864_v44  ;;  %v862_v53 = vadd.f32 1.0, %v4833_v7  ;;  %v5866_v42 = vsel %vm1644_vm7, %v1615_v27, %v1616_v20  ;;  %v5872_v50 = vsel %vm1644_vm7, %v1614_v35, %v1615_v27 }
 0x18e   : > { %v4837_v12 = vpop.eup %4836  ;;  %4862 = vrcp.f32 %v865_v15  ;;  %v863_v25 = vadd.f32 1.0, %v4835_v49  ;;  %v7235_v44 = vrot.slane %v5732_v59, 7  ;;  %v5878_v20 = vsel %vm1451_vm6, %v1428_v63, %v1429_v34 }
 0x18f   : > { %v4839_v5 = vpop.eup %4838  ;;  %4864 = vrcp.f32 %v862_v53  ;;  %v868_v39 = vadd.f32 1.0, %v4837_v12  ;;  %v1623_v53 = vrot.slane %v5732_v59, 1  ;;  %v1427_v12 = vrot.slane %v5737_v14, 7 }
 0x190   : > { %v4841_v35 = vpop.eup %4840  ;;  %4866 = vrcp.f32 %v863_v25  ;;  %v869_v27 = vadd.f32 1.0, %v4839_v5  ;;  %v5885_v49 = vsel %vm1451_vm6, %v1429_v34, %v7235_v44  ;;  %v1621_v56 = vrot.slane %v5753_v4, 1 }
 0x191   : > { %v4843_v7 = vpop.eup %4842  ;;  %4868 = vrcp.f32 %v868_v39  ;;  %v866_v15 = vadd.f32 1.0, %v4841_v35  ;;  %v4132_v25 = vcombine.low %v2157_v52, %v2158_v36  ;;  %v5894_v34 = vsel %vm1644_vm7, %v1623_v53, %v7234_v16 }
 0x192   : > { %v4845_v9 = vpop.eup %4844  ;;  %4870 = vrcp.f32 %v869_v27  ;;  %v867_v38 = vadd.f32 1.0, %v4843_v7  ;;  %v5898_v39 = vsel %vm1644_vm7, %v1622_v26, %v1623_v53  ;;  %v1432_v27 = vrot.slane %v5802_v43, 7 }
 0x193   : > { %v4847_v5 = vpop.eup %4846  ;;  %4872 = vrcp.f32 %v866_v15  ;;  %v872_v61 = vadd.f32 1.0, %v4845_v9  ;;  %v5903_v4 = vsel %vm1451_vm6, %v1427_v12, %v1428_v63  ;;  %2782 = vmatmul.mubr.bf16.vlgmr.msra.gmra.mxu0 %v4132_v25  ;;  %v7247_v36 = vrot.slane %v5682_v28, 7  ;;  %v5927_v28 = vld [vmem:[%s7222_s4 + $0xf8] sm:$0xff]  }
 0x194   : > { %v4849_v35 = vpop.eup %4848  ;;  %4874 = vrcp.f32 %v867_v38  ;;  %v873_v7 = vadd.f32 1.0, %v4847_v5  ;;  %v5916_v38 = vsel %vm1644_vm7, %v1621_v56, %v1622_v26  ;;  %v7248_v25 = vrot.slane %v5737_v14, 1  ;;  %7249 = vst [vmem:[#allocation6_spill] sm:$0xff] %v5927_v28  ;;  %3232 = vmatpush1.bf16.msra.mxu0 %v5927_v28 }
 0x195   : > { %v4851_v9 = vpop.eup %4850  ;;  %v5906_v52 = vmul.f32 %v4849_v35, %v5528_v45  ;;  %4876 = vrcp.f32 %v872_v61  ;;  %v5912_v15 = vsel %vm1451_vm6, %v7247_v36, %v1427_v12  ;;  %v1433_v26 = vrot.slane %v5768_v13, 7 }
 0x196   : > { %v4853_v53 = vpop.eup %4852  ;;  %4878 = vrcp.f32 %v873_v7  ;;  %v870_v63 = vadd.f32 1.0, %v4851_v9  ;;  %v5922_v45 = vsel %vm1644_vm7, %v7248_v25, %v1621_v56  ;;  %v7233_v5 = vrot.slane %v5777_v1, 7 }
 0x197   : > { %v4855_v61 = vpop.eup %4854  ;;  %v5930_v12 = vmul.f32 %v4853_v53, %v5531_v46  ;;  %v1626_v14 = vrot.slane %v5768_v13, 1  ;;  %v1627_v56 = vrot.slane %v5777_v1, 1  ;;  %v5950_v13 = vsel %vm1451_vm6, %v1432_v27, %v1433_v26 }
 0x198   : > { %v4857_v35 = vpop.eup %4856  ;;  %v871_v7 = vadd.f32 1.0, %v4855_v61  ;;  %4880 = vrcp.f32 %v870_v63  ;;  %v5946_v53 = vsel %vm1451_vm6, %v1433_v26, %v7233_v5  ;;  %v7251_v63 = vmov 0  }
 0x199   : > { %v4859_v9 = vpop.eup %4858  ;;  %v4632_v36 = vpack.i.bf16 %v5930_v12, %v5906_v52  ;;  %v5940_v46 = vmul.f32 %v4857_v35, %v5536_v48  ;;  %7250 = vst [vmem:[#allocation7_spill] sm:$0xff] %v5946_v53  ;;  %3233 = vmatprep.subr.bf16.mxu0 %v7251_v63  ;;  %v5958_v48 = vsel %vm1644_vm7, %v1626_v14, %v1627_v56  ;;  %v1431_v26 = vrot.slane %v5785_v0, 7 }
 0x19a   : > { %v4861_v25 = vpop.eup %4860  ;;  %v5954_v61 = vmul.f32 %v4859_v9, %v5539_v21  ;;  %4882 = vrcp.f32 %v871_v7  ;;  %7252 = vst [vmem:[#allocation8_spill] sm:$0xff] %v5958_v48  ;;  %v1625_v44 = vrot.slane %v5802_v43, 1  ;;  %v7254_v53 = vrot.slane %v5732_v59, 7 }
 0x19b   : > { %v4863_v35 = vpop.eup %4862  ;;  %4633 = vrot.lane.b32.xlu1 %v4632_v36, %s4949_s26  ;;  %v5963_v16 = vmul.f32 %v4861_v25, %v5555_v6  ;;  %v1437_v36 = vrot.slane %v5906_v52, 7  ;;  %v7253_v6 = vrot.slane %v5940_v46, 1  ;;  %v5985_v25 = vsel %vm1451_vm6, %v1431_v26, %v1432_v27 }
 0x19c   : > { %v4865_v28 = vpop.eup %4864  ;;  %v1436_v21 = vrot.slane %v5954_v61, 7  ;;  %v4627_v7 = vpack.i.bf16 %v5954_v61, %v5940_v46  ;;  %v5971_v9 = vmul.f32 %v4863_v35, %v5561_v24  ;;  %v5991_v24 = vsel %vm1451_vm6, %v7254_v53, %v1431_v26 }
 0x19d   : > { %v4867_v48 = vpop.eup %4866  ;;  %v5975_v5 = vmul.f32 %v4865_v28, %v5572_v41  ;;  %v5981_v43 = vsel %vm1644_vm7, %v1627_v56, %v7253_v6  ;;  %v6004_v59 = vsel %vm1644_vm7, %v1625_v44, %v1626_v14  ;;  %v7255_v27 = vrot.slane %v5785_v0, 1 }
 0x19e   : > { %v4869_v35 = vpop.eup %4868  ;;  %4628 = vrot.lane.b32.xlu0 %v4627_v7, %s4949_s26  ;;  %v4642_v41 = vpack.i.bf16 %v5971_v9, %v5963_v16  ;;  %v5997_v28 = vmul.f32 %v4867_v48, %v5575_v55  ;;  %v1438_v0 = vrot.slane %v5930_v12, 7 }
 0x19f   : > { %v4871_v56 = vpop.eup %4870  ;;  %v6000_v6 = vmul.f32 %v4869_v35, %v5578_v54  ;;  %v6010_v53 = vsel %vm1644_vm7, %v7255_v27, %v1625_v44  ;;  %v6025_v44 = vsel %vm1451_vm6, %v1436_v21, %v1437_v36  ;;  %v1630_v35 = vrot.slane %v5906_v52, 1 }
 0x1a0   : > { %v4873_v26 = vpop.eup %4872  ;;  %4643 = vrot.lane.b32.xlu1 %v4642_v41, %s4949_s26  ;;  %v4637_v55 = vpack.i.bf16 %v5997_v28, %v5975_v5  ;;  %v6017_v54 = vmul.f32 %v4871_v56, %v5583_v33  ;;  %7256 = vst [vmem:[#allocation9_spill] sm:$0xff] %v6025_v44  ;;  %v6040_v48 = vsel %vm1451_vm6, %v1437_v36, %v1438_v0  ;;  %v1435_v52 = vrot.slane %v5940_v46, 7  ;;  %v6058_v36 = vld [vmem:[%s7222_s4 + $0xf0] sm:$0xff]  }
 0x1a1   : > { %v4875_v7 = vpop.eup %4874  ;;  %v6020_v14 = vmul.f32 %v4873_v26, %v5591_v30  ;;  %v1631_v30 = vrot.slane %v5930_v12, 1  ;;  %7257 = vst [vmem:[#allocation10_spill] sm:$0xff] %v6040_v48  ;;  %v7258_v12 = vrot.slane %v5975_v5, 1  ;;  %7260 = vst [vmem:[#allocation12_spill] sm:$0xff] %v6058_v36  ;;  %3234 = vmatpush1.bf16.msra.mxu0 %v6058_v36 }
 0x1a2   : > { %v4877_v41 = vpop.eup %4876  ;;  %4638 = vrot.lane.b32.xlu0 %v4637_v55, %s4949_s26  ;;  %v4652_v27 = vpack.i.bf16 %v6017_v54, %v6000_v6  ;;  %v6032_v33 = vmul.f32 %v4875_v7, %v5597_v18  ;;  %3235 = vmatprep.subr.bf16.mxu0 %v7251_v63 }
 0x1a3   : > { %v4879_v56 = vpop.eup %4878  ;;  %v6036_v26 = vmul.f32 %v4877_v41, %v5633_v8  ;;  %v6053_v8 = vsel %vm1644_vm7, %v1631_v30, %v7258_v12  ;;  %v1440_v41 = vrot.slane %v5997_v28, 7  ;;  %v1636_v48 = vrot.slane %v6020_v14, 1 }
 0x1a4   : > { %4653 = vrot.lane.b32.xlu1 %v4652_v27, %s4949_s26  ;;  %v4647_v55 = vpack.i.bf16 %v6032_v33, %v6020_v14  ;;  %v6047_v18 = vmul.f32 %v4879_v56, %v5641_v10  ;;  %7259 = vst [vmem:[#allocation11_spill] sm:$0xff] %v6053_v8  ;;  %v6063_v27 = vsel %vm1644_vm7, %v1630_v35, %v1631_v30  ;;  %v7263_v56 = vrot.slane %v5777_v1, 7  ;;  %v6086_v1 = vld [vmem:[%s7222_s4 + $0xe8] sm:$0xff]  }
 0x1a5   : > { %v4881_v7 = vpop.eup %4880  ;;  %7261 = vst [vmem:[#allocation13_spill] sm:$0xff] %v6063_v27  ;;  %v6067_v10 = vsel %vm1451_vm6, %v1435_v52, %v1436_v21  ;;  %3236 = vmatpush1.bf16.msra.mxu0 %v6086_v1 }
 0x1a6   : > { %7262 = vst [vmem:[#allocation14_spill] sm:$0xff] %v6067_v10  ;;  %v6073_v12 = vsel %vm1451_vm6, %v7263_v56, %v1435_v52  ;;  %4648 = vrot.lane.b32.xlu0 %v4647_v55, %s4949_s26  ;;  %v1450_v8 = vrot.slane %v6047_v18, 7  ;;  %v4662_v30 = vpack.i.bf16 %v6047_v18, %v6036_v26  ;;  %v6081_v27 = vmul.f32 %v4881_v7, %v5674_v60 }
 0x1a7   : > { %7264 = vst [vmem:[#allocation15_spill] sm:$0xff] %v6073_v12  ;;  %v4883_v21 = vpop.eup %4882  ;;  %v1629_v52 = vrot.slane %v5954_v61, 1  ;;  %v1441_v55 = vrot.slane %v5963_v16, 7  ;;  %v1442_v56 = vrot.slane %v5971_v9, 7  ;;  %v1634_v10 = vrot.slane %v5963_v16, 1  ;;  %3237 = vmatprep.subr.bf16.mxu0 %v7251_v63 }
 0x1a8   : > { %4663 = vrot.lane.b32.xlu1 %v4662_v30, %s4949_s26  ;;  %v967_v60 = vmul.f32 %v4883_v21, %v5782_v17  ;;  %v7265_v7 = vrot.slane %v5650_v2, 7  ;;  %v1635_v61 = vrot.slane %v5971_v9, 1  ;;  %v7267_v16 = vrot.slane %v5940_v46, 1  ;;  %v6129_v46 = vld [vmem:[%s7222_s4 + $0xe0] sm:$0xff]  }
 0x1a9   : > { %v6105_v44 = vsel %vm1644_vm7, %v1629_v52, %v1630_v35  ;;  %v6115_v17 = vsel %vm1451_vm6, %v1441_v55, %v1442_v56  ;;  %v6120_v21 = vsel %vm1451_vm6, %v1440_v41, %v1441_v55  ;;  %v1444_v35 = vrot.slane %v6032_v33, 7  ;;  %3238 = vmatpush1.bf16.msra.mxu0 %v6129_v46 }
 0x1aa   : > { %v6100_v12 = vsel %vm1451_vm6, %v1450_v8, %v7265_v7  ;;  %7266 = vst [vmem:[#allocation16_spill] sm:$0xff] %v6105_v44  ;;  %v6111_v36 = vsel %vm1644_vm7, %v7267_v16, %v1629_v52  ;;  %7269 = vst [vmem:[#allocation18_spill] sm:$0xff] %v6115_v17  ;;  %v4657_v30 = vpack.i.bf16 %v967_v60, %v6081_v27  ;;  %v1640_v52 = vrot.slane %v6081_v27, 1 }
 0x1ab   : > { %7268 = vst [vmem:[#allocation17_spill] sm:$0xff] %v6111_v36  ;;  %7270 = vst [vmem:[#allocation19_spill] sm:$0xff] %v6120_v21  ;;  %v6124_v9 = vsel %vm1644_vm7, %v1635_v61, %v1636_v48  ;;  %v6136_v7 = vsel %vm1644_vm7, %v1634_v10, %v1635_v61  ;;  %v1439_v55 = vrot.slane %v5975_v5, 7  ;;  %v1633_v16 = vrot.slane %v5997_v28, 1  ;;  %3239 = vmatprep.subr.bf16.mxu0 %v7251_v63 }
 0x1ac   : > { %7271 = vst [vmem:[#allocation20_spill] sm:$0xff] %v6124_v9  ;;  %7272 = vst [vmem:[#allocation21_spill] sm:$0xff] %v6136_v7  ;;  %4658 = vrot.lane.b32.xlu0 %v4657_v30, %s4949_s26  ;;  %v1445_v17 = vrot.slane %v6000_v6, 7  ;;  %v1446_v9 = vrot.slane %v6017_v54, 7  ;;  %v1638_v21 = vrot.slane %v6000_v6, 1  ;;  %v1639_v7 = vrot.slane %v6017_v54, 1 }
 0x1ad   : > { %v6147_v36 = vsel %vm1451_vm6, %v1439_v55, %v1440_v41  ;;  %v6151_v61 = vsel %vm1451_vm6, %v1438_v0, %v1439_v55  ;;  %v1443_v30 = vrot.slane %v6020_v14, 7  ;;  %v6157_v28 = vsel %vm1644_vm7, %v1633_v16, %v1634_v10  ;;  %v6172_v54 = vld [vmem:[%s7222_s4 + $0xd8] sm:$0xff]   ;;  %s4285_s26 = sshll.u32 %s5054_s21, 8  ;;  %s311_s21 = sand.u32 1, %s4936_s28  }
 0x1ae   : > { %7273 = vst [vmem:[#allocation22_spill] sm:$0xff] %v6147_v36  ;;  %7274 = vst [vmem:[#allocation23_spill] sm:$0xff] %v6151_v61  ;;  %v7276_v44 = vrot.slane %v5975_v5, 1  ;;  %v6167_v41 = vsel %vm1451_vm6, %v1445_v17, %v1446_v9  ;;  %v6177_v14 = vsel %vm1451_vm6, %v1444_v35, %v1445_v17  ;;  %v6181_v5 = vsel %vm1644_vm7, %v1639_v7, %v1640_v52  ;;  %s6896_s17 = scalar_lea.vmem %s7224_s6, %s4285_s26  ;;  %s3977_s18 = sshll.u32 %s311_s21, 8 }
 0x1af   : > { %7275 = vst [vmem:[#allocation24_spill] sm:$0xff] %v6157_v28  ;;  %7278 = vst [vmem:[#allocation26_spill] sm:$0xff] %v6167_v41  ;;  %v6185_v0 = vsel %vm1644_vm7, %v1638_v21, %v1639_v7  ;;  %v6194_v10 = vsel %vm1451_vm6, %v1442_v56, %v1443_v30  ;;  %v1637_v17 = vrot.slane %v6032_v33, 1  ;;  %v1448_v55 = vrot.slane %v967_v60, 7  ;;  %3240 = vmatpush1.bf16.msra.mxu0 %v6172_v54  ;;  %s7076_s22 = scalar_lea.vmem [#allocation3], %s3977_s18  ;;  %s7171_s26 = scalar_lea.hbm %s7226_s8, %s4318_s23 }
 0x1b0   : > { %v6163_v6 = vsel %vm1644_vm7, %v7276_v44, %v1633_v16  ;;  %7279 = vst [vmem:[#allocation27_spill] sm:$0xff] %v6177_v14  ;;  %7280 = vst [vmem:[#allocation28_spill] sm:$0xff] %v6181_v5  ;;  %v6190_v44 = vsel %vm1451_vm6, %v1443_v30, %v1444_v35  ;;  %v1449_v16 = vrot.slane %v6036_v26, 7  ;;  %v1642_v41 = vrot.slane %v6036_v26, 1  ;;  %v6204_v35 = vld [vmem:[%s7222_s4 + $0xd0] sm:$0xff]   ;;  %3241 = vmatprep.subr.bf16.mxu0 %v7251_v63  ;;  %s3899_s24 = sshll.u32 %s7076_s22, 4  ;;  %s7173_s24 = int_to_ptr.vmem [resolvable:$true] %s3899_s24 }
 0x1b1   : > { %7277 = vst [vmem:[#allocation25_spill] sm:$0xff] %v6163_v6  ;;  %7281 = vst [vmem:[#allocation29_spill] sm:$0xff] %v6185_v0  ;;  %v1643_v7 = vrot.slane %v6047_v18, 1  ;;  %v1447_v0 = vrot.slane %v6081_v27, 7  ;;  %v1641_v5 = vrot.slane %v967_v60, 1  ;;  %v6209_v33 = vsel %vm1644_vm7, %v1637_v17, %v1638_v21  ;;  %s7178_s12 = scalar_lea.sflag [#allocation4], %s311_s21 }
 0x1b2   : > { %7282 = vst [vmem:[#allocation30_spill] sm:$0xff] %v6190_v44  ;;  %7283 = vst [vmem:[#allocation31_spill] sm:$0xff] %v6194_v10  ;;  %v6213_v56 = vsel %vm1644_vm7, %v1636_v48, %v1637_v17  ;;  %v6217_v26 = vsel %vm1451_vm6, %v1449_v16, %v1450_v8  ;;  %v6221_v18 = vsel %vm1451_vm6, %v1448_v55, %v1449_v16  ;;  %v7289_v60 = vrot.slane %v5650_v2, 1  ;;  %v6255_v2 = vld [vmem:[%s7222_s4 + $0xc8] sm:$0xff]   ;;  %s4884_s9 = scalar_lea.vmem %s7173_s24, 4096 }
 0x1b3   : > { %7284 = vst [vmem:[#allocation32_spill] sm:$0xff] %v6209_v33  ;;  %7285 = vst [vmem:[#allocation33_spill] sm:$0xff] %v6213_v56  ;;  %v6226_v27 = vsel %vm1644_vm7, %v1642_v41, %v1643_v7  ;;  %v6236_v8 = vsel %vm1451_vm6, %v1447_v0, %v1448_v55  ;;  %v6240_v21 = vsel %vm1451_vm6, %v1446_v9, %v1447_v0  ;;  %3242 = vmatpush1.bf16.msra.mxu0 %v6204_v35  ;;  %v6262_v9 = vld [vmem:[%s7222_s4 + $0xc0] sm:$0xff]   ;;  %p4885_p11 = scmp.ne.s32.totalorder %s7173_s24, %s4884_s9 }
 0x1b4   : > { %7286 = vst [vmem:[#allocation34_spill] sm:$0xff] %v6217_v26  ;;  %7287 = vst [vmem:[#allocation35_spill] sm:$0xff] %v6221_v18  ;;  %v6232_v48 = vsel %vm1644_vm7, %v1643_v7, %v7289_v60  ;;  %v6244_v30 = vsel %vm1644_vm7, %v1641_v5, %v1642_v41  ;;  %v6248_v17 = vsel %vm1644_vm7, %v1640_v52, %v1641_v5  ;;  %3243 = vmatprep.subr.bf16.mxu0 %v7251_v63  ;;  %v6269_v52 = vld [vmem:[%s7222_s4 + $0x118] sm:$0xff]   ;;  %v6276_v41 = vld [vmem:[%s7222_s4 + $0x110] sm:$0xff]  }
 0x1b5   : > { %7288 = vst [vmem:[#allocation36_spill] sm:$0xff] %v6226_v27  ;;  %7290 = vst [vmem:[#allocation37_spill] sm:$0xff] %v6232_v48  ;;  %v975_v5 = vadd.s32 32, %v5393_v57  ;;  %v976_v0 = vadd.s32 40, %v5393_v57  ;;  %v972_v55 = vadd.s32 8, %v5393_v57  ;;  %v977_v16 = vadd.s32 48, %v5393_v57  ;;  %p4886_p12 = pnand %p4885_p11, %p5036_p5 }
 0x1b6   : > { %7291 = vst [vmem:[#allocation38_spill] sm:$0xff] %v6236_v8  ;;  %7292 = vst [vmem:[#allocation39_spill] sm:$0xff] %v6240_v21  ;;  %v978_v7 = vadd.s32 56, %v5393_v57  ;;  %v973_v60 = vadd.s32 16, %v5393_v57  ;;  %v982_v8 = vadd.s32 88, %v5393_v57  ;;  %v1007_v27 = vand.u32 15, %v5393_v57 }
 0x1b7   : > { %7293 = vst [vmem:[#allocation40_spill] sm:$0xff] %v6244_v30  ;;  %7294 = vst [vmem:[#allocation41_spill] sm:$0xff] %v6248_v17  ;;  %3244 = vmatpush1.bf16.msra.mxu0 %v6255_v2  ;;  %v974_v17 = vadd.s32 24, %v5393_v57  ;;  %v1035_v30 = vand.u32 15, %v975_v5  ;;  %v1042_v21 = vand.u32 15, %v976_v0  ;;  %v980_v48 = vadd.s32 72, %v5393_v57  ;;  %p4887_p13 = pneg %p4886_p12 }
 0x1b8   : > { %7295 = vst [vmem:[#allocation42_spill] sm:$0xff] %v6255_v2  ;;  %3245 = vmatprep.subr.bf16.mxu0 %v7251_v63  ;;  %7296 = vst [vmem:[#allocation43_spill] sm:$0xff] %v6262_v9  ;;  %v1049_v26 = vand.u32 15, %v977_v16  ;;  %v1056_v18 = vand.u32 15, %v978_v7  ;;  %v985_v56 = vadd.s32 112, %v5393_v57  ;;  %v986_v44 = vadd.s32 120, %v5393_v57 }
 0x1b9   : > { %7297 = vst [vmem:[#allocation44_spill] sm:$0xff] %v6269_v52  ;;  %7298 = vst [vmem:[#allocation45_spill] sm:$0xff] %v6276_v41  ;;  %v1021_v33 = vand.u32 15, %v973_v60  ;;  %v1028_v10 = vand.u32 15, %v974_v17  ;;  %v1084_v14 = vand.u32 15, %v982_v8  ;;  %v6297_v5 = vld [vmem:[%s7222_s4 + $0x108] sm:$0xff]  }
 0x1ba   : > { %7299 = vst [vmem:[#allocation46_spill] sm:$0xff] %v6297_v5  ;;  %vm6299_vm8 = vcmp.gt.s32.totalorder %v1035_v30, 0  ;;  %vm6303_vm9 = vcmp.lt.s32.totalorder %v1042_v21, 15  ;;  %v983_v7 = vadd.s32 96, %v5393_v57  ;;  %vm6308_vm10 = vcmp.gt.s32.totalorder %v1007_v27, 0 }
 0x1bb   : > { %3246 = vmatpush1.bf16.msra.mxu0 %v6262_v9  ;;  %v1014_v9 = vand.u32 15, %v972_v55  ;;  %v984_v30 = vadd.s32 104, %v5393_v57  ;;  %vm6318_vm12 = vcmp.gt.s32.totalorder %v1049_v26, 0  ;;  %vm6322_vm13 = vcmp.lt.s32.totalorder %v1056_v18, 15 }
 0x1bc   : > { %3255 = vmatprep.subr.bf16.mxu0 %v7251_v63  ;;  %v1105_v27 = vand.u32 15, %v985_v56  ;;  %v1112_v60 = vand.u32 15, %v986_v44  ;;  %vm6327_vm14 = vcmp.gt.s32.totalorder %v1021_v33, 0  ;;  %vm6331_vm15 = vcmp.lt.s32.totalorder %v1028_v10, 15 }
 0x1bd   : > { %vm6312_vm11 = vcmp.lt.s32.totalorder %v1014_v9, 15  ;;  %vm6339_vm2 = vcmp.lt.s32.totalorder %v1084_v14, 15  ;;  %v1091_v33 = vand.u32 15, %v983_v7  ;;  %v1746_v10 = vsel %vm6303_vm9, %v5724_v3, 0.0  ;;  %v7332_v14 = vld [vmem:[#allocation7_spill] sm:$0xff] }
 0x1be   : > { %v1098_v28 = vand.u32 15, %v984_v30  ;;  %vm6360_vm6 = vcmp.gt.s32.totalorder %v1105_v27, 0  ;;  %vm6364_vm7 = vcmp.lt.s32.totalorder %v1112_v60, 15  ;;  %v6378_v30 = vld [vmem:[%s7222_s4 + $0x100] sm:$0xff]  }
 0x1bf   : > { %3256 = vmatpush2.bf16.msra.mxu0 %v6269_v52  ;;  %v981_v52 = vadd.s32 80, %v5393_v57 }
 0x1c0   : > { %3257 = vmatprep.subr.bf16.mxu0 %v7251_v63  ;;  %vm6398_vm9 = vcmp.lt.s32.totalorder %v1098_v28, 15  ;;  %v1550_v28 = vsel %vm6327_vm14, %v5858_v58, 0.0 }
 0x1c1   : > { %v1077_v2 = vand.u32 15, %v981_v52  ;;  %v1070_v52 = vand.u32 15, %v980_v48  ;;  %v7404_v31 = vld [vmem:[#allocation46_spill] sm:$0xff] }
 0x1c3   : > { %3258 = vmatpush2.bf16.msra.mxu0 %v6276_v41  ;;  %v979_v41 = vadd.s32 64, %v5393_v57  ;;  %vm6335_vm0 = vcmp.gt.s32.totalorder %v1077_v2, 0  ;;  %v1552_v2 = vsel %vm6299_vm8, %v5762_v37, 0.0  ;;  %vm6353_vm4 = vcmp.lt.s32.totalorder %v1070_v52, 15 }
 0x1c4   : > { %3259 = vmatprep.subr.bf16.mxu0 %v7251_v63  ;;  %v1742_v52 = vsel %vm6312_vm11, %v5746_v51, 0.0  ;;  %vm6383_vm8 = vcmp.gt.s32.totalorder %v1091_v33, 0 }
 0x1c5   : > { %v1063_v16 = vand.u32 15, %v979_v41 }
 0x1c7   : > { %3260 = vmatpush2.bf16.msra.mxu0 %v6297_v5  ;;  %vm6343_vm3 = vcmp.gt.s32.totalorder %v1063_v16, 0 }
 0x1c8   : > { %3261 = vmatprep.subr.bf16.mxu0 %v7251_v63 }
 0x1cb   : > { %3262 = vmatpush2.bf16.msra.mxu0 %v6378_v30 }
 0x1ec   : > { %v4599_v9 = vpop.permute.xlu1 %4598 }
 0x1ed   : > { %v4601_v44 = vunpack.i.h.bf16 %v4599_v9  ;;  %v4600_v56 = vunpack.i.l.bf16 %v4599_v9 }
 0x1ee   : > { %v4589_v36 = vpop.permute.xlu0 %4588 }
 0x1ef   : > { %v1905_v16 = vsel %vm398_vm1, %v1552_v2, %v4600_v56  ;;  %v1906_v9 = vsel %vm398_vm1, %v5695_v29, %v4601_v44  ;;  %v4591_v7 = vunpack.i.h.bf16 %v4589_v36  ;;  %v4590_v61 = vunpack.i.l.bf16 %v4589_v36 }
 0x1f0   : > { %v4290_v37 = vpack.c.bf16 %v5709_v32, %v1905_v16  ;;  %v4291_v0 = vpack.c.bf16 %v1746_v10, %v1906_v9  ;;  %v1548_v29 = vsel %vm6308_vm10, %v6100_v12, 0.0  ;;  %v4604_v36 = vpop.permute.xlu1 %4603  ;;  %v987_v56 = vadd.s32 128, %v5393_v57 }
 0x1f1   : > { %v1901_v27 = vsel %vm398_vm1, %v1548_v29, %v4590_v61  ;;  %v1902_v32 = vsel %vm398_vm1, %v5795_v23, %v4591_v7  ;;  %v4606_v60 = vunpack.i.h.bf16 %v4604_v36  ;;  %v4605_v44 = vunpack.i.l.bf16 %v4604_v36 }
 0x1f2   : > { %2129 = vst.msk [vmem:[#allocation2 + $0x30] sm:$0xff] %vm5343_vm5, %v4290_v37  ;;  %2130 = vst.msk [vmem:[#allocation2 + $0x38] sm:$0xff] %vm5343_vm5, %v4291_v0  ;;  %v4286_v51 = vpack.c.bf16 %v5811_v47, %v1901_v27  ;;  %v4287_v12 = vpack.c.bf16 %v1742_v52, %v1902_v32  ;;  %v1554_v61 = vsel %vm6318_vm12, %v5824_v62, 0.0  ;;  %v1748_v23 = vsel %vm6322_vm13, %v5839_v11, 0.0  ;;  %v4594_v17 = vpop.permute.xlu0 %4593 }
 0x1f3   : > { %v1908_v33 = vsel %vm398_vm1, %v5832_v22, %v4606_v60  ;;  %v1907_v47 = vsel %vm398_vm1, %v1554_v61, %v4605_v44  ;;  %v4596_v10 = vunpack.i.h.bf16 %v4594_v17  ;;  %v4595_v2 = vunpack.i.l.bf16 %v4594_v17 }
 0x1f4   : > { %2125 = vst.msk [vmem:[#allocation2 + $0x10] sm:$0xff] %vm5343_vm5, %v4286_v51  ;;  %2126 = vst.msk [vmem:[#allocation2 + $0x18] sm:$0xff] %vm5343_vm5, %v4287_v12  ;;  %v4293_v62 = vpack.c.bf16 %v1748_v23, %v1908_v33  ;;  %v4292_v11 = vpack.c.bf16 %v5845_v19, %v1907_v47  ;;  %v1744_v22 = vsel %vm6331_vm15, %v5866_v42, 0.0  ;;  %v4614_v21 = vpop.permute.xlu1 %4613  ;;  %v1558_v42 = vsel %vm6335_vm0, %v5878_v20, 0.0 }
 0x1f5   : > { %v1904_v41 = vsel %vm398_vm1, %v5852_v40, %v4596_v10  ;;  %v1903_v16 = vsel %vm398_vm1, %v1550_v28, %v4595_v2  ;;  %v4616_v9 = vunpack.i.h.bf16 %v4614_v21  ;;  %v4615_v7 = vunpack.i.l.bf16 %v4614_v21 }
 0x1f6   : > { %2132 = vst.msk [vmem:[#allocation2 + $0x48] sm:$0xff] %vm5343_vm5, %v4293_v62  ;;  %2131 = vst.msk [vmem:[#allocation2 + $0x40] sm:$0xff] %vm5343_vm5, %v4292_v11  ;;  %v4289_v19 = vpack.c.bf16 %v1744_v22, %v1904_v41  ;;  %v4288_v58 = vpack.c.bf16 %v5872_v50, %v1903_v16  ;;  %v1752_v40 = vsel %vm6339_vm2, %v5894_v34, 0.0  ;;  %v4609_v6 = vpop.permute.xlu0 %4608  ;;  %v1556_v34 = vsel %vm6343_vm3, %v5912_v15, 0.0  ;;  %v7335_v22 = vld [vmem:[#allocation12_spill] sm:$0xff] }
 0x1f7   : > { %v1912_v48 = vsel %vm398_vm1, %v5885_v49, %v4616_v9  ;;  %v1911_v37 = vsel %vm398_vm1, %v1558_v42, %v4615_v7  ;;  %v4611_v0 = vunpack.i.h.bf16 %v4609_v6  ;;  %v4610_v52 = vunpack.i.l.bf16 %v4609_v6 }
 0x1f8   : > { %2128 = vst.msk [vmem:[#allocation2 + $0x28] sm:$0xff] %vm5343_vm5, %v4289_v19  ;;  %2127 = vst.msk [vmem:[#allocation2 + $0x20] sm:$0xff] %vm5343_vm5, %v4288_v58  ;;  %v4297_v50 = vpack.c.bf16 %v1752_v40, %v1912_v48  ;;  %v4296_v20 = vpack.c.bf16 %v5898_v39, %v1911_v37  ;;  %v1750_v49 = vsel %vm6353_vm4, %v5916_v38, 0.0  ;;  %v4624_v26 = vpop.permute.xlu1 %4623  ;;  %v1562_v38 = vsel %vm6360_vm6, %v5950_v13, 0.0  ;;  %v7333_v13 = vld [vmem:[#allocation8_spill] sm:$0xff] }
 0x1f9   : > { %v1910_v18 = vsel %vm398_vm1, %v5903_v4, %v4611_v0  ;;  %v1909_v29 = vsel %vm398_vm1, %v1556_v34, %v4610_v52  ;;  %v4626_v36 = vunpack.i.h.bf16 %v4624_v26  ;;  %v4625_v27 = vunpack.i.l.bf16 %v4624_v26  ;;  %v6508_v58 = vld [vmem:[#allocation2 + $0x34] ss:$8 sps:$4 sm:$0xff]  }
 0x1fa   : > { %2136 = vst.msk [vmem:[#allocation2 + $0x68] sm:$0xff] %vm5343_vm5, %v4297_v50  ;;  %2135 = vst.msk [vmem:[#allocation2 + $0x60] sm:$0xff] %vm5343_vm5, %v4296_v20  ;;  %v4295_v39 = vpack.c.bf16 %v1750_v49, %v1910_v18  ;;  %v4294_v15 = vpack.c.bf16 %v5922_v45, %v1909_v29  ;;  %v1756_v4 = vsel %vm6364_vm7, %v5981_v43, 0.0  ;;  %v4619_v5 = vpop.permute.xlu0 %4618  ;;  %v1560_v43 = vsel %vm6383_vm8, %v5991_v24, 0.0  ;;  %v6522_v50 = vld [vmem:[%s7225_s7 + $0x18] sm:$0xff]  ;;  %v7372_v18 = vld [vmem:[#allocation19_spill] sm:$0xff] }
 0x1fb   : > { %v1916_v32 = vsel %vm398_vm1, %v7332_v14, %v4626_v36  ;;  %v1915_v60 = vsel %vm398_vm1, %v1562_v38, %v4625_v27  ;;  %v4621_v44 = vunpack.i.h.bf16 %v4619_v5  ;;  %v4620_v51 = vunpack.i.l.bf16 %v4619_v5  ;;  %v4693_v12 = vld [vmem:[#allocation2 + $0x10] ss:$8 sps:$4 sm:$0xff]   ;;  %v4695_v3 = vld [vmem:[#allocation2 + $0x14] ss:$8 sps:$4 sm:$0xff]   ;;  %4462 = vmatprep.subr.mxu0 %v6522_v50 }
 0x1fc   : > { %2134 = vst.msk [vmem:[#allocation2 + $0x58] sm:$0xff] %vm5343_vm5, %v4295_v39  ;;  %2133 = vst.msk [vmem:[#allocation2 + $0x50] sm:$0xff] %vm5343_vm5, %v4294_v15  ;;  %v4301_v45 = vpack.c.bf16 %v1756_v4, %v1916_v32  ;;  %v4300_v55 = vpack.c.bf16 %v7333_v13, %v1915_v60  ;;  %v1754_v61 = vsel %vm6398_vm9, %v6004_v59, 0.0  ;;  %4116 = vmatprep.mubr.msk.bf16.mxu1 %vm398_vm1, %v4695_v3  ;;  %4147 = vmatprep.mubr.msk.bf16.mxu0 %vm398_vm1, %v4695_v3  ;;  %v2163_v36 = vld [vmem:[#allocation2 + $0x30] sm:$0xff]  ;;  %v2164_v27 = vld [vmem:[#allocation2 + $0x38] sm:$0xff] }
 0x1fd   : > { %v1914_v23 = vsel %vm398_vm1, %v5985_v25, %v4621_v44  ;;  %v1913_v17 = vsel %vm398_vm1, %v1560_v43, %v4620_v51  ;;  %2537 = vmatmul.mubr.bf16.vlgmr.msra.gmra.mxu1 %v4693_v12  ;;  %2790 = vmatmul.mubr.bf16.gmra.mxu0 %v4693_v12  ;;  %v7334_v25 = vld [vmem:[#allocation6_spill] sm:$0xff]  ;;  %v989_v59 = vadd.s32 144, %v5393_v57  ;;  %v988_v2 = vadd.s32 136, %v5393_v57  ;;  %v7375_v14 = vld [vmem:[#allocation21_spill] sm:$0xff] }
 0x1fe   : > { %2140 = vst.msk [vmem:[#allocation2 + $0x88] sm:$0xff] %vm5343_vm5, %v4301_v45  ;;  %2139 = vst.msk [vmem:[#allocation2 + $0x80] sm:$0xff] %vm5343_vm5, %v4300_v55  ;;  %v4299_v33 = vpack.c.bf16 %v1754_v61, %v1914_v23  ;;  %v4298_v8 = vpack.c.bf16 %v6010_v53, %v1913_v17  ;;  %4530 = vmatpush1.bf16.msra.mxu1 %v7334_v25  ;;  %v990_v53 = vadd.s32 152, %v5393_v57  ;;  %v993_v62 = vadd.s32 176, %v5393_v57  ;;  %v6574_v23 = vld [vmem:[#allocation2 + $0x44] ss:$8 sps:$4 sm:$0xff]  }
 0x1ff   : > { %v6483_v24 = vld [vmem:[#allocation2 + $0x24] ss:$8 sps:$4 sm:$0xff]   ;;  %4519 = vmatprep.subr.bf16.mxu1 %v7251_v63  ;;  %v994_v11 = vadd.s32 184, %v5393_v57  ;;  %v991_v28 = vadd.s32 160, %v5393_v57  ;;  %v992_v21 = vadd.s32 168, %v5393_v57  ;;  %v997_v41 = vadd.s32 208, %v5393_v57 }
 0x200   : > { %2138 = vst.msk [vmem:[#allocation2 + $0x78] sm:$0xff] %vm5343_vm5, %v4299_v33  ;;  %2137 = vst.msk [vmem:[#allocation2 + $0x70] sm:$0xff] %vm5343_vm5, %v4298_v8  ;;  %4117 = vmatprep.mubr.msk.bf16.mxu1 %vm398_vm1, %v6483_v24  ;;  %4148 = vmatprep.mubr.msk.bf16.mxu0 %vm398_vm1, %v6483_v24  ;;  %v2161_v47 = vld [vmem:[#allocation2 + $0x20] sm:$0xff]  ;;  %v2162_v10 = vld [vmem:[#allocation2 + $0x28] sm:$0xff]  ;;  %v1133_v9 = vand.u32 15, %v989_v59  ;;  %v1140_v7 = vand.u32 15, %v990_v53  ;;  %v6568_v13 = vcombine.low %v2163_v36, %v2164_v27 }
 0x201   : > { %v6505_v16 = vcombine.low %v2161_v47, %v2162_v10  ;;  %v1119_v19 = vand.u32 15, %v987_v56  ;;  %v1126_v42 = vand.u32 15, %v988_v2  ;;  %v998_v40 = vadd.s32 216, %v5393_v57  ;;  %v7354_v17 = vld [vmem:[#allocation9_spill] sm:$0xff]  ;;  %v7362_v53 = vld [vmem:[#allocation10_spill] sm:$0xff]  ;;  %v7373_v36 = vld [vmem:[#allocation20_spill] sm:$0xff] }
 0x202   : > { %4531 = vmatpush1.bf16.msra.mxu1 %v7335_v22  ;;  %v995_v6 = vadd.s32 192, %v5393_v57  ;;  %v996_v48 = vadd.s32 200, %v5393_v57  ;;  %v1161_v37 = vand.u32 15, %v993_v62  ;;  %v1168_v0 = vand.u32 15, %v994_v11  ;;  %v7363_v11 = vld [vmem:[#allocation13_spill] sm:$0xff]  ;;  %v7383_v12 = vld [vmem:[#allocation42_spill] sm:$0xff] }
 0x203   : > { %4520 = vmatprep.subr.bf16.mxu1 %v7251_v63  ;;  %v1147_v52 = vand.u32 15, %v991_v28  ;;  %v1154_v20 = vand.u32 15, %v992_v21  ;;  %v1189_v34 = vand.u32 15, %v997_v41  ;;  %v1001_v49 = vadd.s32 240, %v5393_v57  ;;  %v7379_v51 = vld [vmem:[#allocation25_spill] sm:$0xff]  ;;  %v7395_v41 = vld [vmem:[#allocation36_spill] sm:$0xff] }
 0x204   : > { %vm6527_vm10 = vcmp.gt.s32.totalorder %v1133_v9, 0  ;;  %vm6531_vm11 = vcmp.lt.s32.totalorder %v1140_v7, 15  ;;  %vm6535_vm12 = vcmp.gt.s32.totalorder %v1119_v19, 0  ;;  %v1002_v39 = vadd.s32 248, %v5393_v57  ;;  %v7366_v9 = vld [vmem:[#allocation15_spill] sm:$0xff]  ;;  %v7367_v19 = vld [vmem:[#allocation16_spill] sm:$0xff] }
 0x205   : > { %2545 = vmatmul.mubr.bf16.gmra.mxu1 %v6505_v16  ;;  %2798 = vmatmul.mubr.bf16.gmra.mxu0 %v6505_v16  ;;  %vm6541_vm13 = vcmp.lt.s32.totalorder %v1126_v42, 15  ;;  %v1196_v15 = vand.u32 15, %v998_v40  ;;  %v1175_v38 = vand.u32 15, %v995_v6  ;;  %v1182_v4 = vand.u32 15, %v996_v48 }
 0x206   : > { %4118 = vmatprep.mubr.msk.bf16.mxu1 %vm398_vm1, %v6508_v58  ;;  %4149 = vmatprep.mubr.msk.bf16.mxu0 %vm398_vm1, %v6508_v58  ;;  %vm6545_vm14 = vcmp.gt.s32.totalorder %v1161_v37, 0  ;;  %vm6549_vm15 = vcmp.lt.s32.totalorder %v1168_v0, 15  ;;  %vm6553_vm0 = vcmp.gt.s32.totalorder %v1147_v52, 0  ;;  %v6558_v60 = vadd.s32 224, %v5393_v57 }
 0x207   : > { %4532 = vmatpush1.bf16.msra.mxu1 %v6086_v1  ;;  %vm6560_vm2 = vcmp.lt.s32.totalorder %v1154_v20, 15  ;;  %vm6564_vm3 = vcmp.gt.s32.totalorder %v1189_v34, 0  ;;  %v1217_v45 = vand.u32 15, %v1001_v49  ;;  %v1224_v3 = vand.u32 15, %v1002_v39  ;;  %v7371_v49 = vld [vmem:[#allocation17_spill] sm:$0xff]  ;;  %v7374_v1 = vld [vmem:[#allocation18_spill] sm:$0xff] }
 0x208   : > { %4521 = vmatprep.subr.bf16.mxu1 %v7251_v63  ;;  %v6572_v61 = vadd.s32 232, %v5393_v57  ;;  %v1566_v33 = vsel %vm6527_vm10, %v7354_v17, 0.0  ;;  %vm6580_vm4 = vcmp.lt.s32.totalorder %v1196_v15, 15  ;;  %vm6584_vm6 = vcmp.gt.s32.totalorder %v1175_v38, 0  ;;  %v7361_v57 = vld [vmem:[#allocation11_spill] sm:$0xff]  ;;  %v7377_v17 = vld [vmem:[#allocation24_spill] sm:$0xff] }
 0x209   : > { %vm6588_vm7 = vcmp.lt.s32.totalorder %v1182_v4, 15  ;;  %v1760_v59 = vsel %vm6531_vm11, %v7361_v57, 0.0  ;;  %v1203_v2 = vand.u32 15, %v6558_v60  ;;  %vm6606_vm8 = vcmp.gt.s32.totalorder %v1217_v45, 0  ;;  %v6640_v45 = vld [vmem:[#allocation2 + $0x40] ss:$8 sps:$4 sm:$0xff]  }
 0x20a   : > { %v1564_v7 = vsel %vm6535_vm12, %v7366_v9, 0.0  ;;  %v1758_v42 = vsel %vm6541_vm13, %v7367_v19, 0.0  ;;  %vm6617_vm9 = vcmp.lt.s32.totalorder %v1224_v3, 15  ;;  %v1210_v48 = vand.u32 15, %v6572_v61  ;;  %v7398_v61 = vld [vmem:[#allocation39_spill] sm:$0xff]  ;;  %v3442_v60 = vld [vmem:[%s6896_s17 + $0x90] sm:$0xff] }
 0x20b   : > { %4533 = vmatpush1.bf16.msra.mxu1 %v6129_v46  ;;  %v1570_v29 = vsel %vm6545_vm14, %v7372_v18, 0.0  ;;  %v1764_v27 = vsel %vm6549_vm15, %v7373_v36, 0.0  ;;  %v7387_v18 = vld [vmem:[#allocation30_spill] sm:$0xff]  ;;  %vm6712_vm10 = vcmp.gt.s32.totalorder %v1203_v2, 0 }
 0x20c   : > { %4522 = vmatprep.subr.bf16.mxu1 %v7251_v63  ;;  %vm6726_vm11 = vcmp.lt.s32.totalorder %v1210_v48, 15  ;;  %v1576_v48 = vsel %vm6712_vm10, %v7398_v61, 0.0  ;;  %v3447_v61 = vld [vmem:[%s6896_s17 + $0xb8] sm:$0xff] }
 0x20d   : > { %v4634_v44 = vpop.permute.xlu1 %4633  ;;  %2553 = vmatmul.mubr.bf16.gmra.mxu1 %v6568_v13  ;;  %2806 = vmatmul.mubr.bf16.gmra.mxu0 %v6568_v13 }
 0x20e   : > { %v4636_v55 = vunpack.i.h.bf16 %v4634_v44  ;;  %v4635_v43 = vunpack.i.l.bf16 %v4634_v44  ;;  %4119 = vmatprep.mubr.msk.bf16.mxu1 %vm398_vm1, %v6574_v23  ;;  %4150 = vmatprep.mubr.msk.bf16.mxu0 %vm398_vm1, %v6574_v23 }
 0x20f   : > { %4534 = vmatpush1.bf16.msra.mxu1 %v6172_v54  ;;  %v7370_v54 = vld [vmem:[#allocation14_spill] sm:$0xff] }
 0x210   : > { %v1920_v56 = vsel %vm398_vm1, %v7362_v53, %v4636_v55  ;;  %v1919_v47 = vsel %vm398_vm1, %v1566_v33, %v4635_v43  ;;  %v4629_v10 = vpop.permute.xlu0 %4628  ;;  %4523 = vmatprep.subr.bf16.mxu1 %v7251_v63  ;;  %v7376_v43 = vld [vmem:[#allocation23_spill] sm:$0xff]  ;;  %v1762_v33 = vsel %vm6560_vm2, %v7377_v17, 0.0 }
 0x211   : > { %v4305_v62 = vpack.c.bf16 %v1760_v59, %v1920_v56  ;;  %v4304_v28 = vpack.c.bf16 %v7363_v11, %v1919_v47  ;;  %v4631_v22 = vunpack.i.h.bf16 %v4629_v10  ;;  %v4630_v21 = vunpack.i.l.bf16 %v4629_v10  ;;  %v6654_v59 = vld [vmem:[#allocation2 + $0x54] ss:$8 sps:$4 sm:$0xff]   ;;  %v7380_v11 = vld [vmem:[#allocation27_spill] sm:$0xff] }
 0x212   : > { %v4644_v40 = vpop.permute.xlu1 %4643  ;;  %v1568_v3 = vsel %vm6553_vm0, %v7376_v43, 0.0  ;;  %v7394_v17 = vld [vmem:[#allocation43_spill] sm:$0xff]  ;;  %v3436_v43 = vld [vmem:[%s6896_s17 + $0x60] sm:$0xff] }
 0x213   : > { %2144 = vst.msk [vmem:[#allocation2 + $0xa8] sm:$0xff] %vm5343_vm5, %v4305_v62  ;;  %2143 = vst.msk [vmem:[#allocation2 + $0xa0] sm:$0xff] %vm5343_vm5, %v4304_v28  ;;  %v1918_v37 = vsel %vm398_vm1, %v7370_v54, %v4631_v22  ;;  %v1917_v0 = vsel %vm398_vm1, %v1564_v7, %v4630_v21  ;;  %v4646_v52 = vunpack.i.h.bf16 %v4644_v40  ;;  %v4645_v20 = vunpack.i.l.bf16 %v4644_v40  ;;  %4535 = vmatpush1.bf16.msra.mxu1 %v6204_v35  ;;  %v7378_v35 = vld [vmem:[#allocation22_spill] sm:$0xff]  ;;  %v7381_v22 = vld [vmem:[#allocation28_spill] sm:$0xff] }
 0x214   : > { %v4303_v34 = vpack.c.bf16 %v1758_v42, %v1918_v37  ;;  %v4302_v26 = vpack.c.bf16 %v7371_v49, %v1917_v0  ;;  %v4639_v39 = vpop.permute.xlu0 %4638  ;;  %4524 = vmatprep.subr.bf16.mxu1 %v7251_v63  ;;  %v1574_v28 = vsel %vm6564_vm3, %v7380_v11, 0.0  ;;  %v1768_v21 = vsel %vm6580_vm4, %v7381_v22, 0.0  ;;  %v7382_v7 = vld [vmem:[#allocation26_spill] sm:$0xff]  ;;  %v7384_v37 = vld [vmem:[#allocation29_spill] sm:$0xff] }
 0x215   : > { %v1924_v15 = vsel %vm398_vm1, %v7374_v1, %v4646_v52  ;;  %v1923_v38 = vsel %vm398_vm1, %v1570_v29, %v4645_v20  ;;  %v4641_v4 = vunpack.i.h.bf16 %v4639_v39  ;;  %v4640_v44 = vunpack.i.l.bf16 %v4639_v39  ;;  %2561 = vmatmul.mubr.bf16.gmra.mxu1 %v6640_v45  ;;  %2814 = vmatmul.mubr.bf16.gmra.mxu0 %v6640_v45  ;;  %v7385_v52 = vld [vmem:[#allocation31_spill] sm:$0xff]  ;;  %v7388_v1 = vld [vmem:[#allocation33_spill] sm:$0xff] }
 0x216   : > { %2142 = vst.msk [vmem:[#allocation2 + $0x98] sm:$0xff] %vm5343_vm5, %v4303_v34  ;;  %2141 = vst.msk [vmem:[#allocation2 + $0x90] sm:$0xff] %vm5343_vm5, %v4302_v26  ;;  %v4309_v5 = vpack.c.bf16 %v1764_v27, %v1924_v15  ;;  %v4308_v55 = vpack.c.bf16 %v7375_v14, %v1923_v38  ;;  %v4654_v57 = vpop.permute.xlu1 %4653  ;;  %4120 = vmatprep.mubr.msk.bf16.mxu1 %vm398_vm1, %v6654_v59  ;;  %4151 = vmatprep.mubr.msk.bf16.mxu0 %vm398_vm1, %v6654_v59  ;;  %v1572_v20 = vsel %vm6584_vm6, %v7385_v52, 0.0  ;;  %v7386_v34 = vld [vmem:[#allocation32_spill] sm:$0xff]  ;;  %v7389_v15 = vld [vmem:[#allocation35_spill] sm:$0xff] }
 0x217   : > { %v1922_v53 = vsel %vm398_vm1, %v7378_v35, %v4641_v4  ;;  %v1921_v56 = vsel %vm398_vm1, %v1568_v3, %v4640_v44  ;;  %v4656_v47 = vunpack.i.h.bf16 %v4654_v57  ;;  %v4655_v10 = vunpack.i.l.bf16 %v4654_v57  ;;  %4536 = vmatpush1.bf16.msra.mxu1 %v7383_v12  ;;  %v7390_v4 = vld [vmem:[#allocation34_spill] sm:$0xff]  ;;  %v6716_v3 = vld [vmem:[#allocation2 + $0x50] ss:$8 sps:$4 sm:$0xff]  }
 0x218   : > { %2148 = vst.msk [vmem:[#allocation2 + $0xc8] sm:$0xff] %vm5343_vm5, %v4309_v5  ;;  %2147 = vst.msk [vmem:[#allocation2 + $0xc0] sm:$0xff] %vm5343_vm5, %v4308_v55  ;;  %v4307_v32 = vpack.c.bf16 %v1762_v33, %v1922_v53  ;;  %v4306_v62 = vpack.c.bf16 %v7379_v51, %v1921_v56  ;;  %v4649_v9 = vpop.permute.xlu0 %4648  ;;  %v1766_v49 = vsel %vm6588_vm7, %v7386_v34, 0.0  ;;  %4525 = vmatprep.subr.bf16.mxu1 %v7251_v63  ;;  %v1578_v38 = vsel %vm6606_vm8, %v7389_v15, 0.0  ;;  %v7391_v5 = vld [vmem:[#allocation37_spill] sm:$0xff]  ;;  %v7399_v56 = vld [vmem:[#allocation40_spill] sm:$0xff] }
 0x219   : > { %v1928_v19 = vsel %vm398_vm1, %v7382_v7, %v4656_v47  ;;  %v1927_v42 = vsel %vm398_vm1, %v1574_v28, %v4655_v10  ;;  %v4651_v40 = vunpack.i.h.bf16 %v4649_v9  ;;  %v4650_v54 = vunpack.i.l.bf16 %v4649_v9  ;;  %v6730_v57 = vld [vmem:[#allocation2 + $0x64] ss:$8 sps:$4 sm:$0xff]   ;;  %v7402_v28 = vld [vmem:[#allocation41_spill] sm:$0xff]  ;;  %v3458_v15 = vld [vmem:[%s7225_s7 + $0x10] sm:$0xff] }
 0x21a   : > { %2146 = vst.msk [vmem:[#allocation2 + $0xb8] sm:$0xff] %vm5343_vm5, %v4307_v32  ;;  %2145 = vst.msk [vmem:[#allocation2 + $0xb0] sm:$0xff] %vm5343_vm5, %v4306_v62  ;;  %v4313_v8 = vpack.c.bf16 %v1768_v21, %v1928_v19  ;;  %v4312_v0 = vpack.c.bf16 %v7384_v37, %v1927_v42  ;;  %v4664_v26 = vpop.permute.xlu1 %4663  ;;  %v1772_v14 = vsel %vm6617_vm9, %v7391_v5, 0.0  ;;  %v1770_v47 = vsel %vm6726_vm11, %v7399_v56, 0.0  ;;  %v7400_v10 = vld [vmem:[#allocation38_spill] sm:$0xff]  ;;  %v7401_v62 = vld [vmem:[#allocation44_spill] sm:$0xff] }
 0x21b   : > { %v1926_v29 = vsel %vm398_vm1, %v7387_v18, %v4651_v40  ;;  %v1925_v36 = vsel %vm398_vm1, %v1572_v20, %v4650_v54  ;;  %v4666_v27 = vunpack.i.h.bf16 %v4664_v26  ;;  %v4665_v39 = vunpack.i.l.bf16 %v4664_v26  ;;  %4537 = vmatpush1.bf16.msra.mxu1 %v7394_v17  ;;  %v6759_v21 = vld [vmem:[#allocation2 + $0x60] ss:$8 sps:$4 sm:$0xff]   ;;  %v7403_v9 = vld [vmem:[#allocation45_spill] sm:$0xff]  ;;  %v6776_v42 = vld [vmem:[#allocation2 + $0x84] ss:$8 sps:$4 sm:$0xff]  }
 0x21c   : > { %2152 = vst.msk [vmem:[#allocation2 + $0xe8] sm:$0xff] %vm5343_vm5, %v4313_v8  ;;  %2151 = vst.msk [vmem:[#allocation2 + $0xe0] sm:$0xff] %vm5343_vm5, %v4312_v0  ;;  %v4311_v46 = vpack.c.bf16 %v1766_v49, %v1926_v29  ;;  %v4310_v25 = vpack.c.bf16 %v7388_v1, %v1925_v36  ;;  %4526 = vmatprep.subr.bf16.mxu1 %v7251_v63  ;;  %v6762_v7 = vld [vmem:[#allocation2 + $0x74] ss:$8 sps:$4 sm:$0xff]   ;;  %v6773_v19 = vld [vmem:[#allocation2 + $0x70] ss:$8 sps:$4 sm:$0xff]  }
 0x21d   : > { %v1932_v44 = vsel %vm398_vm1, %v7390_v4, %v4666_v27  ;;  %v1931_v55 = vsel %vm398_vm1, %v1578_v38, %v4665_v39  ;;  %2569 = vmatmul.mubr.bf16.gmra.mxu1 %v6716_v3  ;;  %2822 = vmatmul.mubr.bf16.gmra.mxu0 %v6716_v3  ;;  %v6784_v40 = vld [vmem:[#allocation2 + $0x80] ss:$8 sps:$4 sm:$0xff]   ;;  %v6786_v54 = vld [vmem:[#allocation2 + $0x94] ss:$8 sps:$4 sm:$0xff]  }
 0x21e   : > { %2150 = vst.msk [vmem:[#allocation2 + $0xd8] sm:$0xff] %vm5343_vm5, %v4311_v46  ;;  %2149 = vst.msk [vmem:[#allocation2 + $0xd0] sm:$0xff] %vm5343_vm5, %v4310_v25  ;;  %v4316_v6 = vpack.c.bf16 %v7395_v41, %v1931_v55  ;;  %v4317_v33 = vpack.c.bf16 %v1772_v14, %v1932_v44  ;;  %v4659_v2 = vpop.permute.xlu0 %4658  ;;  %4121 = vmatprep.mubr.msk.bf16.mxu1 %vm398_vm1, %v6730_v57  ;;  %4152 = vmatprep.mubr.msk.bf16.mxu0 %vm398_vm1, %v6730_v57  ;;  %v6804_v12 = vld [vmem:[#allocation2 + $0xa0] ss:$8 sps:$4 sm:$0xff]   ;;  %v3430_v38 = vld [vmem:[%s6896_s17 + $0x30] sm:$0xff] }
 0x21f   : > { %v4661_v35 = vunpack.i.h.bf16 %v4659_v2  ;;  %v4660_v53 = vunpack.i.l.bf16 %v4659_v2  ;;  %4538 = vmatpush2.bf16.msra.mxu1 %v7401_v62  ;;  %v6816_v0 = vld [vmem:[#allocation2 + $0xc4] ss:$8 sps:$4 sm:$0xff]   ;;  %v6826_v20 = vld [vmem:[#allocation2 + $0xc0] ss:$8 sps:$4 sm:$0xff]   ;;  %v3431_v4 = vld [vmem:[%s6896_s17 + $0x38] sm:$0xff] }
 0x220   : > { %2155 = vst.msk [vmem:[#allocation2 + $0x100] sm:$0xff] %vm5343_vm5, %v4316_v6  ;;  %2156 = vst.msk [vmem:[#allocation2 + $0x108] sm:$0xff] %vm5343_vm5, %v4317_v33  ;;  %4527 = vmatprep.subr.bf16.mxu1 %v7251_v63  ;;  %v3432_v44 = vld [vmem:[%s6896_s17 + $0x40] sm:$0xff]  ;;  %v3433_v5 = vld [vmem:[%s6896_s17 + $0x48] sm:$0xff] }
 0x221   : > { %v1930_v32 = vsel %vm398_vm1, %v7400_v10, %v4661_v35  ;;  %v1929_v51 = vsel %vm398_vm1, %v1576_v48, %v4660_v53  ;;  %v6806_v8 = vld [vmem:[#allocation2 + $0xb4] ss:$8 sps:$4 sm:$0xff]   ;;  %v6814_v37 = vld [vmem:[#allocation2 + $0xb0] ss:$8 sps:$4 sm:$0xff]   ;;  %v3440_v6 = vld [vmem:[%s6896_s17 + $0x80] sm:$0xff] }
 0x222   : > { %v4315_v11 = vpack.c.bf16 %v1770_v47, %v1930_v32  ;;  %v4314_v22 = vpack.c.bf16 %v7402_v28, %v1929_v51  ;;  %v3434_v14 = vld [vmem:[%s6896_s17 + $0x50] sm:$0xff]  ;;  %v3435_v55 = vld [vmem:[%s6896_s17 + $0x58] sm:$0xff]  ;;  %v3441_v33 = vld [vmem:[%s6896_s17 + $0x88] sm:$0xff] }
 0x223   : > { %4539 = vmatpush2.bf16.msra.mxu1 %v7403_v9  ;;  %v6840_v36 = vld [vmem:[#allocation2 + $0xe4] ss:$8 sps:$4 sm:$0xff]   ;;  %v6848_v27 = vld [vmem:[#allocation2 + $0xe0] ss:$8 sps:$4 sm:$0xff]   ;;  %v3438_v17 = vld [vmem:[%s6896_s17 + $0x70] sm:$0xff] }
 0x224   : > { %2154 = vst.msk [vmem:[#allocation2 + $0xf8] sm:$0xff] %vm5343_vm5, %v4315_v11  ;;  %2153 = vst.msk [vmem:[#allocation2 + $0xf0] sm:$0xff] %vm5343_vm5, %v4314_v22  ;;  %4528 = vmatprep.subr.bf16.mxu1 %v7251_v63  ;;  %vm3460_vm5 = vcmask 261120   ;;  %v3439_v41 = vld [vmem:[%s6896_s17 + $0x78] sm:$0xff]  ;;  %v3445_v35 = vld [vmem:[%s6896_s17 + $0xa8] sm:$0xff] }
 0x225   : > { %2577 = vmatmul.mubr.bf16.gmra.mxu1 %v6759_v21  ;;  %2830 = vmatmul.mubr.bf16.gmra.mxu0 %v6759_v21  ;;  %v6828_v34 = vld [vmem:[#allocation2 + $0xd4] ss:$8 sps:$4 sm:$0xff]   ;;  %v6838_v29 = vld [vmem:[#allocation2 + $0xd0] ss:$8 sps:$4 sm:$0xff]   ;;  %v3448_v48 = vld [vmem:[%s6896_s17 + $0xc0] sm:$0xff] }
 0x226   : > { %4122 = vmatprep.mubr.msk.bf16.mxu1 %vm398_vm1, %v6762_v7  ;;  %4153 = vmatprep.mubr.msk.bf16.mxu0 %vm398_vm1, %v6762_v7  ;;  %v3443_v2 = vld [vmem:[%s6896_s17 + $0x98] sm:$0xff]  ;;  %v3446_v53 = vld [vmem:[%s6896_s17 + $0xb0] sm:$0xff]  ;;  %v3449_v56 = vld [vmem:[%s6896_s17 + $0xc8] sm:$0xff] }
 0x227   : > { %4540 = vmatpush2.bf16.msra.mxu1 %v7404_v31  ;;  %v6860_v1 = vld [vmem:[#allocation2 + $0x104] ss:$8 sps:$4 sm:$0xff]   ;;  %v6868_v25 = vld [vmem:[#allocation2 + $0x100] ss:$8 sps:$4 sm:$0xff]   ;;  %v3450_v47 = vld [vmem:[%s6896_s17 + $0xd0] sm:$0xff] }
 0x228   : > { %4529 = vmatprep.subr.bf16.mxu1 %v7251_v63  ;;  %v6794_v63 = vld [vmem:[#allocation2 + $0x90] ss:$8 sps:$4 sm:$0xff]   ;;  %v3452_v28 = vld [vmem:[%s6896_s17 + $0xe0] sm:$0xff]  ;;  %v3453_v9 = vld [vmem:[%s6896_s17 + $0xe8] sm:$0xff] }
 0x229   : > { %v3451_v51 = vld [vmem:[%s6896_s17 + $0xd8] sm:$0xff] }
 0x22b   : > { %4541 = vmatpush2.bf16.msra.mxu1 %v6378_v30  ;;  %v6796_v30 = vld [vmem:[#allocation2 + $0xa4] ss:$8 sps:$4 sm:$0xff]   ;;  %v6850_v39 = vld [vmem:[#allocation2 + $0xf4] ss:$8 sps:$4 sm:$0xff]   ;;  %v6858_v46 = vld [vmem:[#allocation2 + $0xf0] ss:$8 sps:$4 sm:$0xff]  }
 0x22d   : > { %2585 = vmatmul.mubr.bf16.gmra.mxu1 %v6773_v19  ;;  %2838 = vmatmul.mubr.bf16.gmra.mxu0 %v6773_v19 }
 0x22e   : > { %4123 = vmatprep.mubr.msk.bf16.mxu1 %vm398_vm1, %v6776_v42  ;;  %4154 = vmatprep.mubr.msk.bf16.mxu0 %vm398_vm1, %v6776_v42 }
 0x235   : > { %2593 = vmatmul.mubr.bf16.gmra.mxu1 %v6784_v40  ;;  %2846 = vmatmul.mubr.bf16.gmra.mxu0 %v6784_v40 }
 0x236   : > { %4124 = vmatprep.mubr.msk.bf16.mxu1 %vm398_vm1, %v6786_v54  ;;  %4155 = vmatprep.mubr.msk.bf16.mxu0 %vm398_vm1, %v6786_v54 }
 0x23d   : > { %2601 = vmatmul.mubr.bf16.gmra.mxu1 %v6794_v63  ;;  %2854 = vmatmul.mubr.bf16.gmra.mxu0 %v6794_v63 }
 0x23e   : > { %4125 = vmatprep.mubr.msk.bf16.mxu1 %vm398_vm1, %v6796_v30  ;;  %4156 = vmatprep.mubr.msk.bf16.mxu0 %vm398_vm1, %v6796_v30 }
 0x245   : > { %2609 = vmatmul.mubr.bf16.gmra.mxu1 %v6804_v12  ;;  %2862 = vmatmul.mubr.bf16.gmra.mxu0 %v6804_v12 }
 0x246   : > { %4126 = vmatprep.mubr.msk.bf16.mxu1 %vm398_vm1, %v6806_v8  ;;  %4157 = vmatprep.mubr.msk.bf16.mxu0 %vm398_vm1, %v6806_v8 }
 0x24d   : > { %2617 = vmatmul.mubr.bf16.gmra.mxu1 %v6814_v37  ;;  %2870 = vmatmul.mubr.bf16.gmra.mxu0 %v6814_v37 }
 0x24e   : > { %4127 = vmatprep.mubr.msk.bf16.mxu1 %vm398_vm1, %v6816_v0  ;;  %4158 = vmatprep.mubr.msk.bf16.mxu0 %vm398_vm1, %v6816_v0 }
 0x253   : > { %v6824_v52 = vpop.f32.mrf.mxu0 }
 0x255   : > { %v2785_v49 = vpop.f32.mrf.mxu0  ;;  %2625 = vmatmul.mubr.bf16.gmra.mxu1 %v6826_v20  ;;  %2878 = vmatmul.mubr.bf16.gmra.mxu0 %v6826_v20 }
 0x256   : > { %4128 = vmatprep.mubr.msk.bf16.mxu1 %vm398_vm1, %v6828_v34  ;;  %4159 = vmatprep.mubr.msk.bf16.mxu0 %vm398_vm1, %v6828_v34 }
 0x257   : > { %v6836_v26 = vpop.f32.mrf.mxu0 }
 0x259   : > { %v2788_v18 = vpop.f32.mrf.mxu0 }
 0x25d   : > { %2633 = vmatmul.mubr.bf16.gmra.mxu1 %v6838_v29  ;;  %2886 = vmatmul.mubr.bf16.gmra.mxu0 %v6838_v29 }
 0x25e   : > { %4129 = vmatprep.mubr.msk.bf16.mxu1 %vm398_vm1, %v6840_v36  ;;  %4160 = vmatprep.mubr.msk.bf16.mxu0 %vm398_vm1, %v6840_v36 }
 0x265   : > { %2641 = vmatmul.mubr.bf16.gmra.mxu1 %v6848_v27  ;;  %2894 = vmatmul.mubr.bf16.gmra.mxu0 %v6848_v27 }
 0x266   : > { %4130 = vmatprep.mubr.msk.bf16.mxu1 %vm398_vm1, %v6850_v39  ;;  %4161 = vmatprep.mubr.msk.bf16.mxu0 %vm398_vm1, %v6850_v39 }
 0x26d   : > { %2649 = vmatmul.mubr.bf16.gmra.mxu1 %v6858_v46  ;;  %2902 = vmatmul.mubr.bf16.gmra.mxu0 %v6858_v46 }
 0x26e   : > { %4131 = vmatprep.mubr.msk.bf16.mxu1 %vm398_vm1, %v6860_v1  ;;  %4230 = vmatprep.mubr.msk.bf16.mxu0 %vm398_vm1, %v6483_v24  ;;  %v3457_v24 = vld [vmem:[%s7225_s7 + $0x8] sm:$0xff] }
 0x275   : > { %2657 = vmatmul.mubr.bf16.gmra.mxu1 %v6868_v25  ;;  %3264 = vmatmul.mubr.bf16.vlgmr.msra.gmra.mxu0 %v6505_v16  ;;  %v3456_v16 = vld [vmem:[%s7225_s7] sm:$0xff] }
 0x276   : > { %4231 = vmatprep.mubr.msk.bf16.mxu0 %vm398_vm1, %v6508_v58  ;;  %4233 = vmatprep.mubr.msk.bf16.mxu1 %vm398_vm1, %v6654_v59  ;;  %v3424_v58 = vld [vmem:[%s6896_s17] sm:$0xff]  ;;  %v3429_v59 = vld [vmem:[%s6896_s17 + $0x28] sm:$0xff] }
 0x277   : > { %4463 = vmatpush3.msra.mxu0 %v6522_v50  ;;  %v3425_v50 = vld [vmem:[%s6896_s17 + $0x8] sm:$0xff] }
 0x278   : > { %4464 = vmatprep.subr.mxu0 %v3458_v15 }
 0x279   : > { %4465 = vmatpush3.msra.mxu0 %v3458_v15 }
 0x27a   : > { %4466 = vmatprep.subr.mxu0 %v3457_v24 }
 0x27b   : > { %4467 = vmatpush3.msra.mxu0 %v3457_v24 }
 0x27c   : > { %4468 = vmatprep.subr.mxu0 %v3456_v16 }
 0x27d   : > { %3272 = vmatmul.mubr.bf16.gmra.mxu0 %v6568_v13  ;;  %3288 = vmatmul.mubr.bf16.vlgmr.msra.gmra.mxu1 %v6716_v3  ;;  %v3426_v13 = vld [vmem:[%s6896_s17 + $0x10] sm:$0xff]  ;;  %v3437_v3 = vld [vmem:[%s6896_s17 + $0x68] sm:$0xff] }
 0x27e   : > { %4232 = vmatprep.mubr.msk.bf16.mxu0 %vm398_vm1, %v6574_v23  ;;  %4234 = vmatprep.mubr.msk.bf16.mxu1 %vm398_vm1, %v6730_v57  ;;  %v3427_v23 = vld [vmem:[%s6896_s17 + $0x18] sm:$0xff]  ;;  %v3444_v57 = vld [vmem:[%s6896_s17 + $0xa0] sm:$0xff] }
 0x27f   : > { %4469 = vmatpush3.msra.mxu0 %v3456_v16  ;;  %v4751_v16 = vld [vmem:[#allocation2 + $0x114] ss:$8 sps:$4 sm:$0xff]  }
 0x285   : > { %3280 = vmatmul.mubr.bf16.gmra.mxu0 %v6640_v45  ;;  %3296 = vmatmul.mubr.bf16.gmra.mxu1 %v6759_v21  ;;  %v3428_v45 = vld [vmem:[%s6896_s17 + $0x20] sm:$0xff] }
 0x286   : > { %4235 = vmatprep.mubr.msk.bf16.mxu1 %vm398_vm1, %v6762_v7  ;;  %4470 = vmatprep.mubr.msk.f32.mxu0 %vm3460_vm5, %v3424_v58 }
 0x28d   : > { %3304 = vmatmul.mubr.bf16.gmra.mxu1 %v6773_v19  ;;  %4471 = vmatmul.mubr.msk.f32.vlgmr.msra.gmra.mxu0 %vm3460_vm5, %v3425_v50  ;;  %v3454_v19 = vld [vmem:[%s6896_s17 + $0xf0] sm:$0xff] }
 0x28e   : > { %4236 = vmatprep.mubr.msk.bf16.mxu1 %vm398_vm1, %v6776_v42  ;;  %4473 = vmatprep.mubr.msk.f32.mxu0 %vm3460_vm5, %v3426_v13 }
 0x291   : > { %4474 = vmatmul.mubr.msk.f32.gmra.mxu0 %vm3460_vm5, %v3427_v23 }
 0x292   : > { %4476 = vmatprep.mubr.msk.f32.mxu0 %vm3460_vm5, %v3428_v45 }
 0x295   : > { %3312 = vmatmul.mubr.bf16.gmra.mxu1 %v6784_v40  ;;  %4477 = vmatmul.mubr.msk.f32.gmra.mxu0 %vm3460_vm5, %v3429_v59 }
 0x296   : > { %4237 = vmatprep.mubr.msk.bf16.mxu1 %vm398_vm1, %v6786_v54  ;;  %4479 = vmatprep.mubr.msk.f32.mxu0 %vm3460_vm5, %v3430_v38 }
 0x299   : > { %4480 = vmatmul.mubr.msk.f32.gmra.mxu0 %vm3460_vm5, %v3431_v4  ;;  %v4753_v4 = vld [vmem:[#allocation2 + $0x110] ss:$8 sps:$4 sm:$0xff]  }
 0x29a   : > { %4482 = vmatprep.mubr.msk.f32.mxu0 %vm3460_vm5, %v3432_v44 }
 0x29d   : > { %3320 = vmatmul.mubr.bf16.gmra.mxu1 %v6794_v63  ;;  %4483 = vmatmul.mubr.msk.f32.gmra.mxu0 %vm3460_vm5, %v3433_v5  ;;  %v3455_v63 = vld [vmem:[%s6896_s17 + $0xf8] sm:$0xff]  ;;  %s4888_s17 = sshll.u32 %s4950_s13, 4  ;;  %s4889_s17 = int_to_ptr.vmem [resolvable:$false] %s4888_s17 }
 0x29e   : > { %4238 = vmatprep.mubr.msk.bf16.mxu1 %vm398_vm1, %v6796_v30  ;;  %4485 = vmatprep.mubr.msk.f32.mxu0 %vm3460_vm5, %v3434_v14  ;;  %s4890_s18 = scalar_lea.vmem %s4889_s17, 8192  ;;  %p4891_p0 = scmp.lt.s32.totalorder %s7173_s24, %s4889_s17 }
 0x29f   : > { %p4892_p1 = scmp.lt.s32.totalorder %s4890_s18, %s4884_s9 }
 0x2a1   : > { %4486 = vmatmul.mubr.msk.f32.gmra.mxu0 %vm3460_vm5, %v3435_v55  ;;  %p4893_p2 = por %p4892_p1, %p4891_p0 }
 0x2a2   : > { %4488 = vmatprep.mubr.msk.f32.mxu0 %vm3460_vm5, %v3436_v43 }
 0x2a3   : > { %p4894_p3 = pnand %p4893_p2, %p4887_p13 }
 0x2a5   : > { %3328 = vmatmul.mubr.bf16.gmra.mxu1 %v6804_v12  ;;  %4489 = vmatmul.mubr.msk.f32.gmra.mxu0 %vm3460_vm5, %v3437_v3 }
 0x2a6   : > { %4239 = vmatprep.mubr.msk.bf16.mxu1 %vm398_vm1, %v6806_v8  ;;  %4491 = vmatprep.mubr.msk.f32.mxu0 %vm3460_vm5, %v3438_v17 }
 0x2a9   : > { %4492 = vmatmul.mubr.msk.f32.gmra.mxu0 %vm3460_vm5, %v3439_v41 }
 0x2aa   : > { %4494 = vmatprep.mubr.msk.f32.mxu0 %vm3460_vm5, %v3440_v6 }
 0x2ad   : > { %3336 = vmatmul.mubr.bf16.gmra.mxu1 %v6814_v37  ;;  %4495 = vmatmul.mubr.msk.f32.gmra.mxu0 %vm3460_vm5, %v3441_v33 }
 0x2ae   : > { %4240 = vmatprep.mubr.msk.bf16.mxu1 %vm398_vm1, %v6816_v0  ;;  %4497 = vmatprep.mubr.msk.f32.mxu0 %vm3460_vm5, %v3442_v60 }
 0x2b1   : > { %4498 = vmatmul.mubr.msk.f32.gmra.mxu0 %vm3460_vm5, %v3443_v2 }
 0x2b2   : > { %4500 = vmatprep.mubr.msk.f32.mxu0 %vm3460_vm5, %v3444_v57 }
 0x2b5   : > { %3344 = vmatmul.mubr.bf16.gmra.mxu1 %v6826_v20  ;;  %4501 = vmatmul.mubr.msk.f32.gmra.mxu0 %vm3460_vm5, %v3445_v35 }
 0x2b6   : > { %4241 = vmatprep.mubr.msk.bf16.mxu1 %vm398_vm1, %v6828_v34  ;;  %4503 = vmatprep.mubr.msk.f32.mxu0 %vm3460_vm5, %v3446_v53 }
 0x2b9   : > { %4504 = vmatmul.mubr.msk.f32.gmra.mxu0 %vm3460_vm5, %v3447_v61 }
 0x2ba   : > { %4506 = vmatprep.mubr.msk.f32.mxu0 %vm3460_vm5, %v3448_v48 }
 0x2bd   : > { %v6972_v10 = vpop.f32.mrf.mxu1  ;;  %v2791_v32 = vpop.f32.mrf.mxu0  ;;  %3352 = vmatmul.mubr.bf16.gmra.mxu1 %v6838_v29  ;;  %4507 = vmatmul.mubr.msk.f32.gmra.mxu0 %vm3460_vm5, %v3449_v56 }
 0x2be   : > { %4242 = vmatprep.mubr.msk.bf16.mxu1 %vm398_vm1, %v6840_v36  ;;  %4509 = vmatprep.mubr.msk.f32.mxu0 %vm3460_vm5, %v3450_v47 }
 0x2bf   : > { %v2540_v62 = vpop.f32.mrf.mxu1  ;;  %v2793_v11 = vpop.f32.mrf.mxu0 }
 0x2c1   : > { %v6981_v22 = vpop.f32.mrf.mxu1  ;;  %v2794_v21 = vpop.f32.mrf.mxu0  ;;  %4510 = vmatmul.mubr.msk.f32.gmra.mxu0 %vm3460_vm5, %v3451_v51 }
 0x2c2   : > { %4512 = vmatprep.mubr.msk.f32.mxu0 %vm3460_vm5, %v3452_v28 }
 0x2c3   : > { %v2543_v7 = vpop.f32.mrf.mxu1  ;;  %v2796_v31 = vpop.f32.mrf.mxu0 }
 0x2c5   : > { %v2546_v42 = vpop.f32.mrf.mxu1  ;;  %v2799_v40 = vpop.f32.mrf.mxu0  ;;  %3360 = vmatmul.mubr.bf16.gmra.mxu1 %v6848_v27  ;;  %4513 = vmatmul.mubr.msk.f32.gmra.mxu0 %vm3460_vm5, %v3453_v9 }
 0x2c6   : > { %v6989_v54 = vadd.f32 %v2791_v32, %v2546_v42  ;;  %4243 = vmatprep.mubr.msk.bf16.mxu1 %vm398_vm1, %v6850_v39  ;;  %4515 = vmatprep.mubr.msk.f32.mxu0 %vm3460_vm5, %v3454_v19 }
 0x2c7   : > { %v2548_v30 = vpop.f32.mrf.mxu1  ;;  %v2801_v12 = vpop.f32.mrf.mxu0 }
 0x2c9   : > { %v2549_v8 = vpop.f32.mrf.mxu1  ;;  %v2802_v37 = vpop.f32.mrf.mxu0  ;;  %4516 = vmatmul.mubr.msk.f32.gmra.mxu0 %vm3460_vm5, %v3455_v63 }
 0x2ca   : > { %v6996_v0 = vadd.f32 %v2794_v21, %v2549_v8 }
 0x2cb   : > { %v2551_v20 = vpop.f32.mrf.mxu1  ;;  %v2804_v34 = vpop.f32.mrf.mxu0 }
 0x2cd   : > { %v2554_v49 = vpop.f32.mrf.mxu1  ;;  %v2807_v18 = vpop.f32.mrf.mxu0  ;;  %3368 = vmatmul.mubr.bf16.gmra.mxu1 %v6858_v46 }
 0x2ce   : > { %v6999_v29 = vadd.f32 %v2799_v40, %v2554_v49  ;;  %4244 = vmatprep.mubr.msk.bf16.mxu1 %vm398_vm1, %v6860_v1 }
 0x2cf   : > { %v2556_v36 = vpop.f32.mrf.mxu1  ;;  %v2809_v27 = vpop.f32.mrf.mxu0 }
 0x2d1   : > { %v2557_v39 = vpop.f32.mrf.mxu1  ;;  %v2810_v15 = vpop.f32.mrf.mxu0 }
 0x2d2   : > { %v7003_v24 = vadd.f32 %v2802_v37, %v2557_v39 }
 0x2d3   : > { %v2559_v58 = vpop.f32.mrf.mxu1  ;;  %v2812_v50 = vpop.f32.mrf.mxu0 }
 0x2d5   : > { %v2562_v13 = vpop.f32.mrf.mxu1  ;;  %v2815_v23 = vpop.f32.mrf.mxu0  ;;  %3376 = vmatmul.mubr.bf16.gmra.mxu1 %v6868_v25 }
 0x2d6   : > { %v7006_v45 = vadd.f32 %v2807_v18, %v2562_v13  ;;  %4245 = vmatprep.mubr.msk.bf16.mxu1 %vm398_vm1, %v4751_v16 }
 0x2d7   : > { %v2564_v46 = vpop.f32.mrf.mxu1  ;;  %v2817_v59 = vpop.f32.mrf.mxu0 }
 0x2d9   : > { %v2565_v1 = vpop.f32.mrf.mxu1  ;;  %v2818_v38 = vpop.f32.mrf.mxu0 }
 0x2da   : > { %v7009_v44 = vadd.f32 %v2810_v15, %v2565_v1 }
 0x2db   : > { %v2567_v5 = vpop.f32.mrf.mxu1  ;;  %v2820_v14 = vpop.f32.mrf.mxu0 }
 0x2dd   : > { %v2570_v55 = vpop.f32.mrf.mxu1  ;;  %v2823_v43 = vpop.f32.mrf.mxu0  ;;  %3384 = vmatmul.mubr.bf16.gmra.mxu1 %v4753_v4 }
 0x2de   : > { %v7011_v3 = vadd.f32 %v2815_v23, %v2570_v55 }
 0x2df   : > { %v2572_v17 = vpop.f32.mrf.mxu1  ;;  %v2825_v25 = vpop.f32.mrf.mxu0 }
 0x2e1   : > { %v2573_v41 = vpop.f32.mrf.mxu1  ;;  %v2826_v6 = vpop.f32.mrf.mxu0 }
 0x2e2   : > { %v7013_v33 = vadd.f32 %v2818_v38, %v2573_v41 }
 0x2e3   : > { %v2575_v60 = vpop.f32.mrf.mxu1  ;;  %v2828_v2 = vpop.f32.mrf.mxu0 }
 0x2e5   : > { %v2578_v57 = vpop.f32.mrf.mxu1  ;;  %v2831_v35 = vpop.f32.mrf.mxu0 }
 0x2e6   : > { %v7015_v53 = vadd.f32 %v2823_v43, %v2578_v57 }
 0x2e7   : > { %v2580_v61 = vpop.f32.mrf.mxu1  ;;  %v2833_v48 = vpop.f32.mrf.mxu0 }
 0x2e9   : > { %v2581_v56 = vpop.f32.mrf.mxu1  ;;  %v2834_v47 = vpop.f32.mrf.mxu0 }
 0x2ea   : > { %v7017_v32 = vadd.f32 %v2826_v6, %v2581_v56 }
 0x2eb   : > { %v2583_v51 = vpop.f32.mrf.mxu1  ;;  %v2836_v62 = vpop.f32.mrf.mxu0 }
 0x2ed   : > { %v2586_v11 = vpop.f32.mrf.mxu1  ;;  %v2839_v28 = vpop.f32.mrf.mxu0 }
 0x2ee   : > { %v7019_v21 = vadd.f32 %v2831_v35, %v2586_v11 }
 0x2ef   : > { %v2588_v9 = vpop.f32.mrf.mxu1  ;;  %v2841_v7 = vpop.f32.mrf.mxu0 }
 0x2f1   : > { %v2589_v31 = vpop.f32.mrf.mxu1  ;;  %v2842_v19 = vpop.f32.mrf.mxu0 }
 0x2f2   : > { %v7021_v42 = vadd.f32 %v2834_v47, %v2589_v31 }
 0x2f3   : > { %v2591_v40 = vpop.f32.mrf.mxu1  ;;  %v2844_v63 = vpop.f32.mrf.mxu0 }
 0x2f5   : > { %v2594_v30 = vpop.f32.mrf.mxu1  ;;  %v2847_v12 = vpop.f32.mrf.mxu0 }
 0x2f6   : > { %v7023_v8 = vadd.f32 %v2839_v28, %v2594_v30 }
 0x2f7   : > { %v2596_v37 = vpop.f32.mrf.mxu1  ;;  %v2849_v20 = vpop.f32.mrf.mxu0 }
 0x2f9   : > { %v2597_v34 = vpop.f32.mrf.mxu1  ;;  %v2850_v49 = vpop.f32.mrf.mxu0 }
 0x2fa   : > { %v7025_v18 = vadd.f32 %v2842_v19, %v2597_v34 }
 0x2fb   : > { %v2599_v36 = vpop.f32.mrf.mxu1  ;;  %v2852_v27 = vpop.f32.mrf.mxu0 }
 0x2fd   : > { %v2602_v39 = vpop.f32.mrf.mxu1  ;;  %v2855_v15 = vpop.f32.mrf.mxu0 }
 0x2fe   : > { %v7027_v16 = vadd.f32 %v2847_v12, %v2602_v39 }
 0x2ff   : > { %v2604_v58 = vpop.f32.mrf.mxu1  ;;  %v2857_v50 = vpop.f32.mrf.mxu0 }
 0x301   : > { %v2605_v13 = vpop.f32.mrf.mxu1  ;;  %v2858_v23 = vpop.f32.mrf.mxu0 }
 0x302   : > { %v7029_v46 = vadd.f32 %v2850_v49, %v2605_v13 }
 0x303   : > { %v2607_v59 = vpop.f32.mrf.mxu1  ;;  %v2860_v1 = vpop.f32.mrf.mxu0 }
 0x305   : > { %v2610_v38 = vpop.f32.mrf.mxu1  ;;  %v2863_v4 = vpop.f32.mrf.mxu0 }
 0x306   : > { %v7031_v5 = vadd.f32 %v2855_v15, %v2610_v38 }
 0x307   : > { %v2612_v14 = vpop.f32.mrf.mxu1  ;;  %v2865_v55 = vpop.f32.mrf.mxu0 }
 0x309   : > { %v2613_v43 = vpop.f32.mrf.mxu1  ;;  %v2866_v17 = vpop.f32.mrf.mxu0 }
 0x30a   : > { %v7033_v25 = vadd.f32 %v2858_v23, %v2613_v43 }
 0x30b   : > { %v2615_v41 = vpop.f32.mrf.mxu1  ;;  %v2868_v6 = vpop.f32.mrf.mxu0 }
 0x30d   : > { %v2618_v60 = vpop.f32.mrf.mxu1  ;;  %v2871_v2 = vpop.f32.mrf.mxu0 }
 0x30e   : > { %v7035_v57 = vadd.f32 %v2863_v4, %v2618_v60 }
 0x30f   : > { %v2620_v35 = vpop.f32.mrf.mxu1  ;;  %v2873_v61 = vpop.f32.mrf.mxu0 }
 0x311   : > { %v2621_v48 = vpop.f32.mrf.mxu1  ;;  %v2874_v56 = vpop.f32.mrf.mxu0 }
 0x312   : > { %v7037_v47 = vadd.f32 %v2866_v17, %v2621_v48 }
 0x313   : > { %v2623_v51 = vpop.f32.mrf.mxu1  ;;  %v2876_v62 = vpop.f32.mrf.mxu0 }
 0x315   : > { %v2626_v11 = vpop.f32.mrf.mxu1  ;;  %v2879_v28 = vpop.f32.mrf.mxu0 }
 0x316   : > { %v7039_v9 = vadd.f32 %v2871_v2, %v2626_v11 }
 0x317   : > { %v2628_v7 = vpop.f32.mrf.mxu1  ;;  %v2881_v31 = vpop.f32.mrf.mxu0 }
 0x319   : > { %v2629_v19 = vpop.f32.mrf.mxu1  ;;  %v2882_v40 = vpop.f32.mrf.mxu0 }
 0x31a   : > { %v7041_v63 = vadd.f32 %v2874_v56, %v2629_v19 }
 0x31b   : > { %v2631_v30 = vpop.f32.mrf.mxu1  ;;  %v2884_v12 = vpop.f32.mrf.mxu0 }
 0x31d   : > { %v2634_v37 = vpop.f32.mrf.mxu1  ;;  %v2887_v20 = vpop.f32.mrf.mxu0 }
 0x31e   : > { %v7043_v34 = vadd.f32 %v2879_v28, %v2634_v37 }
 0x31f   : > { %v2636_v49 = vpop.f32.mrf.mxu1  ;;  %v2889_v36 = vpop.f32.mrf.mxu0 }
 0x321   : > { %v2637_v27 = vpop.f32.mrf.mxu1  ;;  %v2890_v39 = vpop.f32.mrf.mxu0 }
 0x322   : > { %v7045_v15 = vadd.f32 %v2882_v40, %v2637_v27 }
 0x323   : > { %v2639_v58 = vpop.f32.mrf.mxu1  ;;  %v2892_v50 = vpop.f32.mrf.mxu0 }
 0x325   : > { %v2642_v13 = vpop.f32.mrf.mxu1  ;;  %v2895_v23 = vpop.f32.mrf.mxu0 }
 0x326   : > { %v7047_v59 = vadd.f32 %v2887_v20, %v2642_v13 }
 0x327   : > { %v2644_v1 = vpop.f32.mrf.mxu1  ;;  %v2897_v38 = vpop.f32.mrf.mxu0 }
 0x329   : > { %v2645_v4 = vpop.f32.mrf.mxu1  ;;  %v2898_v14 = vpop.f32.mrf.mxu0 }
 0x32a   : > { %v7049_v55 = vadd.f32 %v2890_v39, %v2645_v4  ;;  %v2787_v4 = vadd.f32 %v6836_v26, %v6981_v22 }
 0x32b   : > { %v2647_v43 = vpop.f32.mrf.mxu1  ;;  %v2900_v17 = vpop.f32.mrf.mxu0 }
 0x32c   : > { %v2784_v17 = vadd.f32 %v6824_v52, %v6972_v10 }
 0x32d   : > { %v2650_v41 = vpop.f32.mrf.mxu1  ;;  %v2903_v6 = vpop.f32.mrf.mxu0 }
 0x32e   : > { %v7051_v60 = vadd.f32 %v2895_v23, %v2650_v41 }
 0x32f   : > { %v2652_v2 = vpop.f32.mrf.mxu1  ;;  %v2905_v35 = vpop.f32.mrf.mxu0 }
 0x331   : > { %v2653_v61 = vpop.f32.mrf.mxu1  ;;  %v2906_v48 = vpop.f32.mrf.mxu0 }
 0x332   : > { %v7053_v56 = vadd.f32 %v2898_v14, %v2653_v61 }
 0x333   : > { %v2655_v51 = vpop.f32.mrf.mxu1  ;;  %v2908_v62 = vpop.f32.mrf.mxu0 }
 0x334   : > { %v7069_v51 = vld [vmem:[%s7223_s5] ss:$0 sm:$0xff] }
 0x335   : > { %v2658_v11 = vpop.f32.mrf.mxu1  ;;  %v3265_v28 = vpop.f32.mrf.mxu0 }
 0x336   : > { %v7055_v7 = vadd.f32 %v2903_v6, %v2658_v11  ;;  %v3392_v35 = vadd.f32 %v3265_v28, %v2784_v17 }
 0x337   : > { %v2660_v31 = vpop.f32.mrf.mxu1  ;;  %v3267_v19 = vpop.f32.mrf.mxu0 }
 0x338   : > { %v3789_v28 = vadd.f32 %v7069_v51, %v3392_v35 }
 0x339   : > { %v2661_v40 = vpop.f32.mrf.mxu1  ;;  %v3268_v30 = vpop.f32.mrf.mxu0 }
 0x33a   : > { %v7057_v12 = vadd.f32 %v2906_v48, %v2661_v40  ;;  %v3393_v41 = vadd.f32 %v3268_v30, %v2787_v4 }
 0x33b   : > { %v2663_v37 = vpop.f32.mrf.mxu1  ;;  %v3270_v20 = vpop.f32.mrf.mxu0 }
 0x33c   : > { %v3790_v22 = vadd.f32 %v7069_v51, %v3393_v41 }
 0x33d   : > { %v3273_v49 = vpop.f32.mrf.mxu0  ;;  %v3289_v36 = vpop.f32.mrf.mxu1 }
 0x33e   : > { %v3394_v52 = vadd.f32 %v3273_v49, %v6989_v54 }
 0x33f   : > { %v3275_v27 = vpop.f32.mrf.mxu0  ;;  %v3291_v39 = vpop.f32.mrf.mxu1 }
 0x340   : > { %v3791_v27 = vadd.f32 %v7069_v51, %v3394_v52 }
 0x341   : > { %v3276_v58 = vpop.f32.mrf.mxu0  ;;  %v3292_v50 = vpop.f32.mrf.mxu1 }
 0x342   : > { %v3395_v26 = vadd.f32 %v3276_v58, %v6996_v0  ;;  %v3399_v58 = vadd.f32 %v3292_v50, %v7009_v44 }
 0x343   : > { %v3278_v13 = vpop.f32.mrf.mxu0  ;;  %v3294_v23 = vpop.f32.mrf.mxu1 }
 0x344   : > { %v3792_v30 = vadd.f32 %v7069_v51, %v3395_v26  ;;  %v3796_v50 = vadd.f32 %v7069_v51, %v3399_v58 }
 0x345   : > { %v3281_v1 = vpop.f32.mrf.mxu0  ;;  %v3297_v38 = vpop.f32.mrf.mxu1 }
 0x346   : > { %v3396_v54 = vadd.f32 %v3281_v1, %v6999_v29 }
 0x347   : > { %v3283_v14 = vpop.f32.mrf.mxu0  ;;  %v3299_v43 = vpop.f32.mrf.mxu1 }
 0x348   : > { %v3398_v43 = vadd.f32 %v3289_v36, %v7006_v45  ;;  %v3793_v1 = vadd.f32 %v7069_v51, %v3396_v54 }
 0x349   : > { %v3284_v6 = vpop.f32.mrf.mxu0  ;;  %v3300_v2 = vpop.f32.mrf.mxu1 }
 0x34a   : > { %v3397_v40 = vadd.f32 %v3284_v6, %v7003_v24  ;;  %v3401_v6 = vadd.f32 %v3300_v2, %v7013_v33  ;;  %v3795_v36 = vadd.f32 %v7069_v51, %v3398_v43 }
 0x34b   : > { %v3286_v61 = vpop.f32.mrf.mxu0  ;;  %v3302_v48 = vpop.f32.mrf.mxu1 }
 0x34c   : > { %v3794_v23 = vadd.f32 %v7069_v51, %v3397_v40  ;;  %v3400_v48 = vadd.f32 %v3297_v38, %v7011_v3  ;;  %v3798_v2 = vadd.f32 %v7069_v51, %v3401_v6 }
 0x34d   : > { %v3305_v62 = vpop.f32.mrf.mxu1  ;;  %v4472_v11 = vpop.f32.mrf.mxu0 }
 0x34e   : > { %v3822_v10 = vadd.f32 %v4472_v11, %v3790_v22  ;;  %v3797_v38 = vadd.f32 %v7069_v51, %v3400_v48 }
 0x34f   : > { %v3307_v31 = vpop.f32.mrf.mxu1  ;;  %v3623_v19 = vpop.f32.mrf.mxu0 }
 0x350   : > { %3854 = vst [vmem:[%s7076_s22 + $0x8] sm:$0xff] %v3822_v10  ;;  %v3821_v0 = vadd.f32 %v3789_v28, %v3623_v19  ;;  %v3402_v28 = vadd.f32 %v3305_v62, %v7015_v53 }
 0x351   : > { %v3308_v37 = vpop.f32.mrf.mxu1  ;;  %v4475_v20 = vpop.f32.mrf.mxu0 }
 0x352   : > { %3853 = vst [vmem:[%s7076_s22] sm:$0xff] %v3821_v0  ;;  %v3824_v49 = vadd.f32 %v4475_v20, %v3792_v30  ;;  %v3403_v11 = vadd.f32 %v3308_v37, %v7017_v32  ;;  %v3799_v62 = vadd.f32 %v7069_v51, %v3402_v28 }
 0x353   : > { %v3310_v24 = vpop.f32.mrf.mxu1  ;;  %v3633_v39 = vpop.f32.mrf.mxu0 }
 0x354   : > { %3856 = vst [vmem:[%s7076_s22 + $0x18] sm:$0xff] %v3824_v49  ;;  %v3823_v13 = vadd.f32 %v3791_v27, %v3633_v39  ;;  %v3800_v0 = vadd.f32 %v7069_v51, %v3403_v11 }
 0x355   : > { %v3313_v4 = vpop.f32.mrf.mxu1  ;;  %v4478_v14 = vpop.f32.mrf.mxu0 }
 0x356   : > { %3855 = vst [vmem:[%s7076_s22 + $0x10] sm:$0xff] %v3823_v13  ;;  %v3826_v29 = vadd.f32 %v4478_v14, %v3794_v23  ;;  %v3404_v20 = vadd.f32 %v3313_v4, %v7019_v21 }
 0x357   : > { %v3315_v17 = vpop.f32.mrf.mxu1  ;;  %v3643_v41 = vpop.f32.mrf.mxu0 }
 0x358   : > { %3858 = vst [vmem:[%s7076_s22 + $0x28] sm:$0xff] %v3826_v29  ;;  %v3825_v44 = vadd.f32 %v3793_v1, %v3643_v41  ;;  %v3801_v23 = vadd.f32 %v7069_v51, %v3404_v20 }
 0x359   : > { %v3316_v35 = vpop.f32.mrf.mxu1  ;;  %v4481_v61 = vpop.f32.mrf.mxu0 }
 0x35a   : > { %3857 = vst [vmem:[%s7076_s22 + $0x20] sm:$0xff] %v3825_v44  ;;  %v3828_v45 = vadd.f32 %v4481_v61, %v3796_v50  ;;  %v3405_v40 = vadd.f32 %v3316_v35, %v7021_v42 }
 0x35b   : > { %v3318_v26 = vpop.f32.mrf.mxu1  ;;  %v3653_v22 = vpop.f32.mrf.mxu0 }
 0x35c   : > { %3860 = vst [vmem:[%s7076_s22 + $0x38] sm:$0xff] %v3828_v45  ;;  %v3827_v33 = vadd.f32 %v3795_v36, %v3653_v22  ;;  %v3802_v24 = vadd.f32 %v7069_v51, %v3405_v40 }
 0x35d   : > { %v3321_v52 = vpop.f32.mrf.mxu1  ;;  %v4484_v10 = vpop.f32.mrf.mxu0 }
 0x35e   : > { %3859 = vst [vmem:[%s7076_s22 + $0x30] sm:$0xff] %v3827_v33  ;;  %v3830_v3 = vadd.f32 %v4484_v10, %v3798_v2  ;;  %v3406_v13 = vadd.f32 %v3321_v52, %v7023_v8 }
 0x35f   : > { %v3323_v31 = vpop.f32.mrf.mxu1  ;;  %v3663_v19 = vpop.f32.mrf.mxu0 }
 0x360   : > { %3862 = vst [vmem:[%s7076_s22 + $0x48] sm:$0xff] %v3830_v3  ;;  %v3829_v32 = vadd.f32 %v3797_v38, %v3663_v19  ;;  %v3803_v6 = vadd.f32 %v7069_v51, %v3406_v13 }
 0x361   : > { %v3324_v30 = vpop.f32.mrf.mxu1  ;;  %v4487_v37 = vpop.f32.mrf.mxu0 }
 0x362   : > { %3861 = vst [vmem:[%s7076_s22 + $0x40] sm:$0xff] %v3829_v32  ;;  %v3832_v53 = vadd.f32 %v4487_v37, %v3800_v0  ;;  %v3407_v27 = vadd.f32 %v3324_v30, %v7025_v18 }
 0x363   : > { %v3326_v54 = vpop.f32.mrf.mxu1  ;;  %v3673_v49 = vpop.f32.mrf.mxu0 }
 0x364   : > { %3864 = vst [vmem:[%s7076_s22 + $0x58] sm:$0xff] %v3832_v53  ;;  %v3831_v42 = vadd.f32 %v3799_v62, %v3673_v49  ;;  %v3804_v18 = vadd.f32 %v7069_v51, %v3407_v27 }
 0x365   : > { %v3329_v39 = vpop.f32.mrf.mxu1  ;;  %v4490_v58 = vpop.f32.mrf.mxu0 }
 0x366   : > { %3863 = vst [vmem:[%s7076_s22 + $0x50] sm:$0xff] %v3831_v42  ;;  %v3834_v21 = vadd.f32 %v4490_v58, %v3802_v24  ;;  %v3408_v17 = vadd.f32 %v3329_v39, %v7027_v16 }
 0x367   : > { %v3331_v4 = vpop.f32.mrf.mxu1  ;;  %v3683_v14 = vpop.f32.mrf.mxu0 }
 0x368   : > { %3866 = vst [vmem:[%s7076_s22 + $0x68] sm:$0xff] %v3834_v21  ;;  %v3833_v43 = vadd.f32 %v3801_v23, %v3683_v14  ;;  %v3805_v26 = vadd.f32 %v7069_v51, %v3408_v17 }
 0x369   : > { %v3332_v29 = vpop.f32.mrf.mxu1  ;;  %v4493_v1 = vpop.f32.mrf.mxu0 }
 0x36a   : > { %3865 = vst [vmem:[%s7076_s22 + $0x60] sm:$0xff] %v3833_v43  ;;  %v3409_v41 = vadd.f32 %v3332_v29, %v7029_v46  ;;  %v3836_v8 = vadd.f32 %v4493_v1, %v3804_v18 }
 0x36b   : > { %v3334_v44 = vpop.f32.mrf.mxu1  ;;  %v3693_v50 = vpop.f32.mrf.mxu0 }
 0x36c   : > { %3868 = vst [vmem:[%s7076_s22 + $0x78] sm:$0xff] %v3836_v8  ;;  %v3835_v35 = vadd.f32 %v3803_v6, %v3693_v50  ;;  %v3806_v61 = vadd.f32 %v7069_v51, %v3409_v41 }
 0x36d   : > { %v3337_v48 = vpop.f32.mrf.mxu1  ;;  %v4496_v45 = vpop.f32.mrf.mxu0 }
 0x36e   : > { %3867 = vst [vmem:[%s7076_s22 + $0x70] sm:$0xff] %v3835_v35  ;;  %v3410_v36 = vadd.f32 %v3337_v48, %v7031_v5  ;;  %v3838_v16 = vadd.f32 %v4496_v45, %v3806_v61 }
 0x36f   : > { %v3339_v46 = vpop.f32.mrf.mxu1  ;;  %v3703_v22 = vpop.f32.mrf.mxu0 }
 0x370   : > { %3870 = vst [vmem:[%s7076_s22 + $0x88] sm:$0xff] %v3838_v16  ;;  %v3837_v11 = vadd.f32 %v3805_v26, %v3703_v22  ;;  %v3807_v10 = vadd.f32 %v7069_v51, %v3410_v36 }
 0x371   : > { %v3340_v33 = vpop.f32.mrf.mxu1  ;;  %v4499_v2 = vpop.f32.mrf.mxu0 }
 0x372   : > { %3869 = vst [vmem:[%s7076_s22 + $0x80] sm:$0xff] %v3837_v11  ;;  %v3411_v52 = vadd.f32 %v3340_v33, %v7033_v25 }
 0x373   : > { %v3342_v28 = vpop.f32.mrf.mxu1  ;;  %v3713_v3 = vpop.f32.mrf.mxu0 }
 0x374   : > { %v3808_v5 = vadd.f32 %v7069_v51, %v3411_v52  ;;  %v3839_v38 = vadd.f32 %v3807_v10, %v3713_v3 }
 0x375   : > { %v3345_v31 = vpop.f32.mrf.mxu1  ;;  %v4502_v19 = vpop.f32.mrf.mxu0 }
 0x376   : > { %v3840_v40 = vadd.f32 %v4499_v2, %v3808_v5  ;;  %3871 = vst [vmem:[%s7076_s22 + $0x90] sm:$0xff] %v3839_v38  ;;  %v3412_v32 = vadd.f32 %v3345_v31, %v7035_v57 }
 0x377   : > { %v3347_v0 = vpop.f32.mrf.mxu1  ;;  %v3723_v30 = vpop.f32.mrf.mxu0 }
 0x378   : > { %3872 = vst [vmem:[%s7076_s22 + $0x98] sm:$0xff] %v3840_v40  ;;  %v3809_v25 = vadd.f32 %v7069_v51, %v3412_v32 }
 0x379   : > { %v3348_v37 = vpop.f32.mrf.mxu1  ;;  %v4505_v54 = vpop.f32.mrf.mxu0 }
 0x37a   : > { %v3413_v20 = vadd.f32 %v3348_v37, %v7037_v47  ;;  %v3841_v53 = vadd.f32 %v3809_v25, %v3723_v30 }
 0x37b   : > { %v3350_v62 = vpop.f32.mrf.mxu1  ;;  %v3733_v39 = vpop.f32.mrf.mxu0 }
 0x37c   : > { %v3810_v49 = vadd.f32 %v7069_v51, %v3413_v20  ;;  %3873 = vst [vmem:[%s7076_s22 + $0xa0] sm:$0xff] %v3841_v53 }
 0x37d   : > { %v3353_v27 = vpop.f32.mrf.mxu1  ;;  %v4508_v4 = vpop.f32.mrf.mxu0 }
 0x37e   : > { %v3842_v42 = vadd.f32 %v4502_v19, %v3810_v49  ;;  %v3414_v57 = vadd.f32 %v3353_v27, %v7039_v9 }
 0x37f   : > { %v3355_v24 = vpop.f32.mrf.mxu1  ;;  %v3743_v1 = vpop.f32.mrf.mxu0 }
 0x380   : > { %3874 = vst [vmem:[%s7076_s22 + $0xa8] sm:$0xff] %v3842_v42  ;;  %v3811_v58 = vadd.f32 %v7069_v51, %v3414_v57 }
 0x381   : > { %v3356_v13 = vpop.f32.mrf.mxu1  ;;  %v4511_v44 = vpop.f32.mrf.mxu0 }
 0x382   : > { %v3415_v47 = vadd.f32 %v3356_v13, %v7041_v63  ;;  %v3843_v21 = vadd.f32 %v3811_v58, %v3733_v39 }
 0x383   : > { %v3358_v23 = vpop.f32.mrf.mxu1  ;;  %v3753_v45 = vpop.f32.mrf.mxu0 }
 0x384   : > { %v3812_v14 = vadd.f32 %v7069_v51, %v3415_v47  ;;  %3875 = vst [vmem:[%s7076_s22 + $0xb0] sm:$0xff] %v3843_v21 }
 0x385   : > { %v3361_v43 = vpop.f32.mrf.mxu1  ;;  %v4514_v22 = vpop.f32.mrf.mxu0 }
 0x386   : > { %v3844_v18 = vadd.f32 %v4505_v54, %v3812_v14  ;;  %v3416_v9 = vadd.f32 %v3361_v43, %v7043_v34 }
 0x387   : > { %v3363_v29 = vpop.f32.mrf.mxu1  ;;  %v3763_v10 = vpop.f32.mrf.mxu0 }
 0x388   : > { %3876 = vst [vmem:[%s7076_s22 + $0xb8] sm:$0xff] %v3844_v18  ;;  %v3813_v17 = vadd.f32 %v7069_v51, %v3416_v9 }
 0x389   : > { %v3364_v41 = vpop.f32.mrf.mxu1  ;;  %v4517_v31 = vpop.f32.mrf.mxu0 }
 0x38a   : > { %v3417_v63 = vadd.f32 %v3364_v41, %v7045_v15  ;;  %v3845_v8 = vadd.f32 %v3813_v17, %v3743_v1 }
 0x38b   : > { %v3366_v6 = vpop.f32.mrf.mxu1  ;;  %v3773_v30 = vpop.f32.mrf.mxu0 }
 0x38c   : > { %v3814_v50 = vadd.f32 %v7069_v51, %v3417_v63  ;;  %3877 = vst [vmem:[%s7076_s22 + $0xc0] sm:$0xff] %v3845_v8 }
 0x38d   : > { %v3369_v35 = vpop.f32.mrf.mxu1 }
 0x38e   : > { %v3846_v61 = vadd.f32 %v4508_v4, %v3814_v50  ;;  %v3418_v34 = vadd.f32 %v3369_v35, %v7047_v59 }
 0x38f   : > { %v3371_v48 = vpop.f32.mrf.mxu1 }
 0x390   : > { %3878 = vst [vmem:[%s7076_s22 + $0xc8] sm:$0xff] %v3846_v61  ;;  %v3815_v36 = vadd.f32 %v7069_v51, %v3418_v34 }
 0x391   : > { %v3372_v16 = vpop.f32.mrf.mxu1 }
 0x392   : > { %v3419_v15 = vadd.f32 %v3372_v16, %v7049_v55  ;;  %v3847_v26 = vadd.f32 %v3815_v36, %v3753_v45 }
 0x393   : > { %v3374_v46 = vpop.f32.mrf.mxu1 }
 0x394   : > { %v3816_v11 = vadd.f32 %v7069_v51, %v3419_v15  ;;  %3879 = vst [vmem:[%s7076_s22 + $0xd0] sm:$0xff] %v3847_v26 }
 0x395   : > { %v3377_v33 = vpop.f32.mrf.mxu1 }
 0x396   : > { %v3848_v2 = vadd.f32 %v4511_v44, %v3816_v11  ;;  %v3420_v59 = vadd.f32 %v3377_v33, %v7051_v60 }
 0x397   : > { %v3379_v52 = vpop.f32.mrf.mxu1 }
 0x398   : > { %3880 = vst [vmem:[%s7076_s22 + $0xd8] sm:$0xff] %v3848_v2  ;;  %v3817_v28 = vadd.f32 %v7069_v51, %v3420_v59 }
 0x399   : > { %v3380_v3 = vpop.f32.mrf.mxu1 }
 0x39a   : > { %v3421_v55 = vadd.f32 %v3380_v3, %v7053_v56  ;;  %v3849_v5 = vadd.f32 %v3817_v28, %v3763_v10 }
 0x39b   : > { %v3382_v38 = vpop.f32.mrf.mxu1 }
 0x39c   : > { %v3818_v19 = vadd.f32 %v7069_v51, %v3421_v55  ;;  %3881 = vst [vmem:[%s7076_s22 + $0xe0] sm:$0xff] %v3849_v5 }
 0x39d   : > { %v3385_v40 = vpop.f32.mrf.mxu1 }
 0x39e   : > { %v3850_v60 = vadd.f32 %v4514_v22, %v3818_v19  ;;  %v3422_v32 = vadd.f32 %v3385_v40, %v7055_v7 }
 0x39f   : > { %v3387_v0 = vpop.f32.mrf.mxu1 }
 0x3a0   : > { %3882 = vst [vmem:[%s7076_s22 + $0xe8] sm:$0xff] %v3850_v60  ;;  %v3819_v56 = vadd.f32 %v7069_v51, %v3422_v32 }
 0x3a1   : > { %v3388_v25 = vpop.f32.mrf.mxu1 }
 0x3a2   : > { %v3423_v37 = vadd.f32 %v3388_v25, %v7057_v12  ;;  %v3851_v20 = vadd.f32 %v3819_v56, %v3773_v30 }
 0x3a3   : > { %v3390_v53 = vpop.f32.mrf.mxu1 }
 0x3a4   : > { %v3820_v62 = vadd.f32 %v7069_v51, %v3423_v37  ;;  %3883 = vst [vmem:[%s7076_s22 + $0xf0] sm:$0xff] %v3851_v20 }
 0x3a6   : > { %v3852_v7 = vadd.f32 %v4517_v31, %v3820_v62 }
 0x3a8   : > { %3884 = vst [vmem:[%s7076_s22 + $0xf8] sm:$0xff] %v3852_v7 }
 0x3a9   : > { %4897 = shalt.err (!%p4894_p3)
}
 0x3aa   : > { %s4898_s21 = scalar_lea.hbm %s7171_s26, 4096  ;;  %s4902_s22 = scalar_lea.hbm %s7226_s8, 8192 }
 0x3ab   : > { %p4899_p4 = scmp.ne.s32.totalorder %s7171_s26, %s4898_s21  ;;  %p4903_p9 = scmp.lt.s32.totalorder %s7171_s26, %s7226_s8 }
 0x3ac   : > { %p4904_p10 = scmp.lt.s32.totalorder %s4902_s22, %s4898_s21 }
 0x3ad   : > { %p4900_p7 = pnand %p4899_p4, %p5036_p5 }
 0x3ae   : > { %p4905_p11 = por %p4904_p10, %p4903_p9 }
 0x3af   : > { %p4901_p8 = pneg %p4900_p7 }
 0x3b1   : > { %p4906_p12 = pnand %p4905_p11, %p4901_p8 }
 0x3b3   : > { %4909 = shalt.err (!%p4906_p12)
}
 0x3b4   : > { %s4951_s10 = smov 128   ;;  %s4952_s9 = smov 8  }
 0x3b5   : > { %4542 = dma.vmem_to_hbm [thread:$0]  (%p5036_p5), %s7173_s24, 4096, %s7171_s26, %s7178_s12, %s4951_s10, %s4951_s10, %s4952_s9  }
 0x3b6 PF: > { %p4548_p13 = scmp.ge.s32.totalorder %s4944_s30, 2  ;;  %s3914_s13 = sand.u32 1, %s4932_s27  }
 0x3b7   : > { %s3915_s17 = scalar_lea.sflag [#allocation4], %s3914_s13 }
 0x3b8   : > { %p4545_p0 = pnand %p4548_p13, %p5040_p6 }
 0x3ba   : > { %p4546_p1 = pneg %p4545_p0 }
 0x3bc   : > { %4927 = dma.done.wait (%p4546_p1), %s3915_s17, 4096  }
 0x3bd   : > { %4929 = vsyncadd (%p4546_p1), %s3915_s17, 4294963200  ;;  %p18_p2 = scmp.ge.s32.totalorder %s5023_s11, 4   ;;  %s7405_s27 = smov %s4936_s28 }
 0x3be   : > { %s7406_s28 = smov %s4940_s29  ;;  %s7407_s29 = smov %s5034_s14 }
 0x3bf   : > { %s7408_s30 = smov %s5023_s11  ;;  %20 = sbr.rel (!%p18_p2) target bundleno = 3 (0x3), region = 92 }
 0x3c4   :  { %3920 = vsyncpa [#allocation4], 1 }
 0x3c5   :  { %3922 = vsyncpa [#allocation4 + $0x1], 1 }

</bundles_post_ra>
